<compile_context>
chip_gen: v5e
topology: v5e:2x2
jax: 0.10.0
libtpu: 0.0.40
codegen_flags: <defaults>
</compile_context>

<pallas_src>
import math

import jax
import jax.numpy as jnp
from jax import lax
from jax.experimental import pallas as pl
from jax.experimental.pallas import tpu as pltpu


# --------------------------------------------------------------------------
# small helpers
# --------------------------------------------------------------------------
def _round_up(x, m):
    return ((x + m - 1) // m) * m


def _tile_rows(M, target=512):
    """Row tile + grid for flattened (M, C) pointwise kernels.

    cdiv-based (the partial last block is masked by Pallas) and always >= 2
    grid steps when M is big enough so both v7x TensorCores get work."""
    if M <= 16:
        return M, 1
    grid = max(2, -(-M // target))
    tm = min(M, _round_up(-(-M // grid), 8))
    grid = -(-M // tm)
    return tm, grid


def _bn_fold(gamma, beta, mean, var, eps=1e-5):
    scale = gamma / jnp.sqrt(var + eps)
    return scale, beta - mean * scale


def _lfu_fold(y):
    """torch: cat(split(x[:, :c//4], h//2, -2), 1); cat(split(., w//2, -1), 1).
    NHWC: (B, H, W, c) -> (B, H//2, W//2, c); requires c % 4 == 0."""
    B, H, W, c = y.shape
    c4 = c // 4
    t = y[..., :c4]
    t = jnp.concatenate([t[:, : H // 2], t[:, H // 2:]], axis=-1)
    t = jnp.concatenate([t[:, :, : W // 2], t[:, :, W // 2:]], axis=-1)
    return t


# --------------------------------------------------------------------------
# Kernel 1: fused 3x3 conv, reflect pad built in VMEM, im2col + single matmul,
#           spatial row tiling with an 8-row halo block per side.
#   One call computes all three spatial convs of FFC from the channel-
#   concatenated input, so x is read from HBM (roughly) once.
# --------------------------------------------------------------------------
def _conv3x3_step_bytes(th, W, Cin, Cout):
    f32 = 4
    return f32 * (2 * th * W * Cin            # main input block (double buffered)
                  + 2 * 2 * 8 * W * Cin       # top/bottom 8-row halo blocks
                  + 2 * 9 * Cin * Cout        # weights
                  + 2 * th * W * Cout         # output block (double buffered)
                  + (th + 2) * (W + 2) * Cin  # reflect-padded scratch
                  + th * W * 9 * Cin)         # im2col scratch


def _pick_row_tile(H, W, Cin, Cout, budget_bytes=12 << 20):
    cands = [t for t in range(8, H + 1, 8)
             if H % t == 0 and _conv3x3_step_bytes(t, W, Cin, Cout) <= budget_bytes]
    if not cands:
        return 8
    multi = [t for t in cands if H // t >= 2]   # prefer >=2 row tiles (pipeline + megacore)
    return max(multi) if multi else max(cands)


def _make_conv3x3_kernel(th, W, Cin, Cout):
    def kernel(x_ref, top_ref, bot_ref, w_ref, out_ref, xp_ref, col_ref):
        i = pl.program_id(1)
        n = pl.num_programs(1)
        x = x_ref[0]                                          # (th, W, Cin)

        # ---- assemble the reflect-padded (th+2, W+2, Cin) tile in VMEM ----
        xp_ref[1:th + 1, 1:W + 1, :] = x

        # top halo row (padded row 0): reflect on the first tile, otherwise the
        # last row of the 8-row block just above this tile.
        @pl.when(i == 0)
        def _():
            xp_ref[0:1, 1:W + 1, :] = x[1:2]                  # image row 1

        @pl.when(i > 0)
        def _():
            xp_ref[0:1, 1:W + 1, :] = top_ref[0, 7:8]         # image row i*th - 1

        # bottom halo row (padded row th+1)
        @pl.when(i == n - 1)
        def _():
            xp_ref[th + 1:th + 2, 1:W + 1, :] = x[th - 2:th - 1]   # image row H-2

        @pl.when(i < n - 1)
        def _():
            xp_ref[th + 1:th + 2, 1:W + 1, :] = bot_ref[0, 0:1]    # image row (i+1)*th

        # reflect columns (also fills the 4 corners)
        xp_ref[:, 0:1, :] = xp_ref[:, 2:3, :]
        xp_ref[:, W + 1:W + 2, :] = xp_ref[:, W - 1:W, :]

        # ---- im2col: ONE (th*W, 9*Cin) buffer, ONE MXU matmul (K = 9*Cin) ----
        for dy in range(3):
            for dx in range(3):
                t = dy * 3 + dx
                col_ref[:, t * Cin:(t + 1) * Cin] = (
                    xp_ref[dy:dy + th, dx:dx + W, :].reshape(th * W, Cin))

        out_ref[0] = jnp.dot(col_ref[...], w_ref[...],
                             preferred_element_type=jnp.float32
                             ).astype(out_ref.dtype)

    return kernel


def conv3x3_reflect_pallas(x, w):
    """x: (B, H, W, Cin) f32; w: (3, 3, Cin, Cout).  3x3 conv, reflect pad 1."""
    B, H, W, Cin = x.shape
    Cout = w.shape[-1]
    assert w.shape[:2] == (3, 3)
    assert H % 8 == 0 and H >= 8 and W >= 2, "kernel assumes H % 8 == 0, W >= 2"

    th = _pick_row_tile(H, W, Cin, Cout)
    n_th = H // th
    thb = th // 8
    w_flat = w.reshape(9 * Cin, Cout).astype(jnp.float32)
    vmem_limit = int(min(64 << 20,
                         max(16 << 20, 2 * _conv3x3_step_bytes(th, W, Cin, Cout))))

    out = pl.pallas_call(
        _make_conv3x3_kernel(th, W, Cin, Cout),
        out_shape=jax.ShapeDtypeStruct((B, H * W, Cout), x.dtype),
        grid_spec=pltpu.PrefetchScalarGridSpec(
            num_scalar_prefetch=0,
            grid=(B, n_th),
            in_specs=[
                pl.BlockSpec((1, th, W, Cin), lambda b, i: (b, i, 0, 0)),
                # 8-row block just above the tile (clamped; unused when i == 0)
                pl.BlockSpec((1, 8, W, Cin),
                             lambda b, i: (b, jnp.maximum(i * thb - 1, 0), 0, 0)),
                # 8-row block just below the tile (clamped; unused when i == last)
                pl.BlockSpec((1, 8, W, Cin),
                             lambda b, i: (b, jnp.minimum((i + 1) * thb,
                                                          H // 8 - 1), 0, 0)),
                pl.BlockSpec((9 * Cin, Cout), lambda b, i: (0, 0)),
            ],
            out_specs=pl.BlockSpec((1, th * W, Cout), lambda b, i: (b, i, 0)),
            scratch_shapes=[
                pltpu.VMEM((th + 2, W + 2, Cin), jnp.float32),   # padded tile
                pltpu.VMEM((th * W, 9 * Cin), jnp.float32),      # im2col
            ],
        ),
        compiler_params=pltpu.CompilerParams(
            dimension_semantics=("parallel", "parallel"),
            vmem_limit_bytes=vmem_limit),
    )(x, x, x, w_flat)
    return out.reshape(B, H, W, Cout)


# --------------------------------------------------------------------------
# Kernel 2: 1x1 conv (pointwise matmul) fused with per-channel affine + ReLU.
# --------------------------------------------------------------------------
def _pw_affine_relu_kernel(x_ref, w_ref, s_ref, b_ref, out_ref):
    y = jnp.dot(x_ref[...], w_ref[...], preferred_element_type=jnp.float32)
    y = y * s_ref[...] + b_ref[...]
    out_ref[...] = jnp.maximum(y, 0.0).astype(out_ref.dtype)


def pw_affine_relu_pallas(x, w, scale, bias):
    """x: (..., Cin) -> ReLU((x @ w) * scale + bias), shape (..., Cout)."""
    lead = x.shape[:-1]
    Cin = x.shape[-1]
    Cout = w.shape[-1]
    M = int(math.prod(lead))
    xf = x.reshape(M, Cin)
    tm, grid = _tile_rows(M)
    out = pl.pallas_call(
        _pw_affine_relu_kernel,
        out_shape=jax.ShapeDtypeStruct((M, Cout), x.dtype),
        grid_spec=pltpu.PrefetchScalarGridSpec(
            num_scalar_prefetch=0,
            grid=(grid,),
            in_specs=[
                pl.BlockSpec((tm, Cin), lambda i: (i, 0)),
                pl.BlockSpec((Cin, Cout), lambda i: (0, 0)),
                pl.BlockSpec((1, Cout), lambda i: (0, 0)),
                pl.BlockSpec((1, Cout), lambda i: (0, 0)),
            ],
            out_specs=pl.BlockSpec((tm, Cout), lambda i: (i, 0)),
        ),
        compiler_params=pltpu.CompilerParams(
            dimension_semantics=("parallel",)),
    )(xf, w.astype(jnp.float32),
      scale.reshape(1, Cout).astype(jnp.float32),
      bias.reshape(1, Cout).astype(jnp.float32))
    return out.reshape(lead + (Cout,))


# --------------------------------------------------------------------------
# Kernel 3: SpectralTransform.conv2 fused with the residual adds:
#   out_g = l2g + (y + fu + xs_tiled) @ w2
# Grid over (B, 2, 2) spatial quadrants; xs (the LFU output) is kept at its
# small (B, H/2, W/2, c) shape and re-read per quadrant -> the 2x2 spatial
# tile is never materialized in HBM.
# --------------------------------------------------------------------------
def _conv2_fused_kernel(y_ref, fu_ref, xs_ref, l2g_ref, w_ref, out_ref):
    s = y_ref[0] + fu_ref[0] + xs_ref[0]                  # (Hh, Wh, c)
    Hh, Wh, c = s.shape
    o = jnp.dot(s.reshape(Hh * Wh, c), w_ref[...],
                preferred_element_type=jnp.float32)
    o = o + l2g_ref[0].reshape(Hh * Wh, o.shape[-1])
    out_ref[0] = o.reshape(Hh, Wh, o.shape[-1]).astype(out_ref.dtype)


def conv2_fused_pallas(y, fu, xs_small, l2g, w):
    B, H, W, c = y.shape
    Cout = w.shape[-1]
    y = y.astype(jnp.float32)
    fu = fu.astype(jnp.float32)
    xs_small = xs_small.astype(jnp.float32)
    l2g = l2g.astype(jnp.float32)

    quad_ok = (H % 2 == 0 and W % 2 == 0 and (W // 2) % 8 == 0
               and xs_small.shape[1] == H // 2 and xs_small.shape[2] == W // 2)
    if quad_ok:
        xs, qh, qw, Hh, Wh = xs_small, 2, 2, H // 2, W // 2
    else:
        # Fallback (odd / tiny W): materialize the 2x2 tile in HBM.
        xs = jnp.tile(xs_small, (1, H // xs_small.shape[1],
                                 W // xs_small.shape[2], 1))
        qh, qw, Hh, Wh = 1, 1, H, W

    out = pl.pallas_call(
        _conv2_fused_kernel,
        out_shape=jax.ShapeDtypeStruct((B, H, W, Cout), jnp.float32),
        grid_spec=pltpu.PrefetchScalarGridSpec(
            num_scalar_prefetch=0,
            grid=(B, qh, qw),
            in_specs=[
                pl.BlockSpec((1, Hh, Wh, c), lambda b, i, j: (b, i, j, 0)),
                pl.BlockSpec((1, Hh, Wh, c), lambda b, i, j: (b, i, j, 0)),
                pl.BlockSpec((1, Hh, Wh, c), lambda b, i, j: (b, 0, 0, 0)),
                pl.BlockSpec((1, Hh, Wh, Cout), lambda b, i, j: (b, i, j, 0)),
                pl.BlockSpec((c, Cout), lambda b, i, j: (0, 0)),
            ],
            out_specs=pl.BlockSpec((1, Hh, Wh, Cout),
                                   lambda b, i, j: (b, i, j, 0)),
        ),
        compiler_params=pltpu.CompilerParams(
            dimension_semantics=("parallel", "parallel", "parallel")),
    )(y, fu, xs, l2g, w.astype(jnp.float32))
    return out


# --------------------------------------------------------------------------
# FourierUnit / FFC forward (Pallas path, NHWC)
# --------------------------------------------------------------------------
def _fourier_unit_pallas(t, w, bn):
    """rfft2 -> (1x1 conv + folded BN + ReLU) on [re|im] channels -> irfft2."""
    Hh, Ww, cch = t.shape[1], t.shape[2], t.shape[3]
    # TODO(synk): the 2-D FFT (torch.fft.rfftn/irfftn) stays in XLA (jnp.fft);
    # a DFT-as-matmul Pallas version (review suggestion) is future work.
    f = jnp.fft.rfft2(t, axes=(1, 2), norm="ortho")
    fr = jnp.concatenate([f.real, f.imag], axis=-1).astype(jnp.float32)
    scale, bias = _bn_fold(*bn)
    g = pw_affine_relu_pallas(fr, w, scale, bias)
    gc = lax.complex(g[..., :cch], g[..., cch:])
    return jnp.fft.irfft2(gc, s=(Hh, Ww), axes=(1, 2),
                          norm="ortho").astype(jnp.float32)


def ffc_forward(x_l, x_g, params):
    B, H, W, in_cl = x_l.shape
    in_cg = x_g.shape[-1]
    out_cl = params["w_l2l"].shape[-1]
    out_cg = params["w_l2g"].shape[-1]

    # --- fused spatial 3x3 convs (reflect pad), ONE pallas_call --------------
    #   output columns [:out_cl]  = convl2l(x_l) + convg2l(x_g)   (= out_l)
    #   output columns [out_cl:]  = convl2g(x_l)                  (x_g rows zeroed)
    Cin = in_cl + in_cg
    Cout = out_cl + out_cg
    wc = jnp.zeros((3, 3, Cin, Cout), jnp.float32)
    wc = wc.at[:, :, :in_cl, :out_cl].set(params["w_l2l"])
    wc = wc.at[:, :, in_cl:, :out_cl].set(params["w_g2l"])
    wc = wc.at[:, :, :in_cl, out_cl:].set(params["w_l2g"])
    # TODO(synk): at large (MXU-bound) channel counts, split the fused weight so
    # the structurally-zero in_cg x out_cg quadrant isn't multiplied.
    x_full = jnp.concatenate([x_l, x_g], axis=-1)
    spat = conv3x3_reflect_pallas(x_full, wc)
    out_l = spat[..., :out_cl]
    l2g = spat[..., out_cl:]

    # --- SpectralTransform(x_g) ----------------------------------------------
    # conv1 (1x1, no bias) + BatchNorm (folded, eval mode) + ReLU.
    # TODO(synk): BatchNorm is modeled in eval mode (running stats only).
    scale1, bias1 = _bn_fold(params["bn1_gamma"], params["bn1_beta"],
                             params["bn1_mean"], params["bn1_var"])
    y = pw_affine_relu_pallas(x_g, params["w1"], scale1, bias1)        # (B,H,W,c)

    fu = _fourier_unit_pallas(
        y, params["w_fu"],
        (params["fu_bn_gamma"], params["fu_bn_beta"],
         params["fu_bn_mean"], params["fu_bn_var"]))                   # (B,H,W,c)

    xs = _fourier_unit_pallas(
        _lfu_fold(y), params["w_lfu"],
        (params["lfu_bn_gamma"], params["lfu_bn_beta"],
         params["lfu_bn_mean"], params["lfu_bn_var"]))                 # (B,H/2,W/2,c)

    out_g = conv2_fused_pallas(y, fu, xs, l2g, params["w2"])           # (B,H,W,out_cg)
    return out_l, out_g


# --------------------------------------------------------------------------
# pure-JAX reference (mirrors the PyTorch forward, NHWC) for the sanity check
# --------------------------------------------------------------------------
def _conv3x3_reflect_ref(x, w_hwio):
    xp = jnp.pad(x, ((0, 0), (1, 1), (1, 1), (0, 0)), mode="reflect")
    return lax.conv_general_dilated(
        xp, w_hwio, (1, 1), "VALID",
        dimension_numbers=("NHWC", "HWIO", "NHWC"),
        precision=lax.Precision.HIGHEST)


def _fourier_unit_ref(t, w, bn):
    Hh, Ww, cch = t.shape[1], t.shape[2], t.shape[3]
    f = jnp.fft.rfft2(t, axes=(1, 2), norm="ortho")
    fr = jnp.concatenate([f.real, f.imag], axis=-1)
    scale, bias = _bn_fold(*bn)
    g = jnp.maximum(jnp.einsum("bhwc,cd->bhwd", fr, w,
                               precision=lax.Precision.HIGHEST) * scale + bias, 0.0)
    gc = lax.complex(g[..., :cch], g[..., cch:])
    return jnp.fft.irfft2(gc, s=(Hh, Ww), axes=(1, 2), norm="ortho")


def ffc_reference(x_l, x_g, params):
    out_l = (_conv3x3_reflect_ref(x_l, params["w_l2l"])
             + _conv3x3_reflect_ref(x_g, params["w_g2l"]))
    l2g = _conv3x3_reflect_ref(x_l, params["w_l2g"])

    scale1, bias1 = _bn_fold(params["bn1_gamma"], params["bn1_beta"],
                             params["bn1_mean"], params["bn1_var"])
    y = jnp.einsum("bhwc,cd->bhwd", x_g, params["w1"],
                   precision=lax.Precision.HIGHEST)
    y = jnp.maximum(y * scale1 + bias1, 0.0)

    fu = _fourier_unit_ref(y, params["w_fu"],
                           (params["fu_bn_gamma"], params["fu_bn_beta"],
                            params["fu_bn_mean"], params["fu_bn_var"]))
    xs = _fourier_unit_ref(_lfu_fold(y), params["w_lfu"],
                           (params["lfu_bn_gamma"], params["lfu_bn_beta"],
                            params["lfu_bn_mean"], params["lfu_bn_var"]))
    xs = jnp.tile(xs, (1, 2, 2, 1))

    out_g = l2g + jnp.einsum("bhwc,cd->bhwd", y + fu + xs, params["w2"],
                             precision=lax.Precision.HIGHEST)
    return out_l, out_g


# --------------------------------------------------------------------------
# parameter init (HWIO conv weights; BN running stats for eval-mode folding)
# --------------------------------------------------------------------------
def init_ffc_params(key, in_cl, in_cg, out_cl, out_cg):
    assert out_cg % 2 == 0 and (out_cg // 2) % 4 == 0, "LFU needs (out_cg//2) % 4 == 0"
    c = out_cg // 2
    ks = jax.random.split(key, 19)
    n = jax.random.normal
    p = {
        "w_l2l": 0.1 * n(ks[0], (3, 3, in_cl, out_cl), jnp.float32),
        "w_g2l": 0.1 * n(ks[1], (3, 3, in_cg, out_cl), jnp.float32),
        "w_l2g": 0.1 * n(ks[2], (3, 3, in_cl, out_cg), jnp.float32),
        "w1":    0.2 * n(ks[3], (in_cg, c), jnp.float32),
        "w_fu":  0.2 * n(ks[4], (2 * c, 2 * c), jnp.float32),
        "w_lfu": 0.2 * n(ks[5], (2 * c, 2 * c), jnp.float32),
        "w2":    0.2 * n(ks[6], (c, out_cg), jnp.float32),
    }

    def bn(i, ch):
        return {"gamma": 1.0 + 0.1 * n(ks[i], (ch,), jnp.float32),
                "beta":  0.1 * n(ks[i + 1], (ch,), jnp.float32),
                "mean":  0.1 * n(ks[i + 2], (ch,), jnp.float32),
                "var":   1.0 + 0.1 * jnp.abs(n(ks[i + 3], (ch,), jnp.float32))}

    for name, (i, ch) in {"bn1": (7, c), "fu_bn": (11, 2 * c),
                          "lfu_bn": (15, 2 * c)}.items():
        for k, v in bn(i, ch).items():
            p[f"{name}_{k}"] = v
    return p


if __name__ == "__main__":
    # FFC(in_channels=32, out_channels=32, kernel_size=3, ratio_gin=0.5,
    #     ratio_gout=0.5, stride=1, padding=1, padding_type='reflect',
    #     enable_lfu=True, gated=False, bias=False), eval-mode BatchNorm.
    in_channels, out_channels = 32, 32
    B, H, W = 2, 16, 16
    in_cg = in_channels // 2
    in_cl = in_channels - in_cg
    out_cg = out_channels // 2
    out_cl = out_channels - out_cg

    key = jax.random.PRNGKey(0)
    kx, kp = jax.random.split(key)
    x = jax.random.normal(kx, (B, H, W, in_channels), jnp.float32)   # NHWC
    x_l, x_g = x[..., :in_cl], x[..., in_cl:]
    params = init_ffc_params(kp, in_cl, in_cg, out_cl, out_cg)

    fwd = jax.jit(ffc_forward)
    out_l, out_g = fwd(x_l, x_g, params)
    jax.block_until_ready((out_l, out_g))

    assert out_l.shape == (B, H, W, out_cl)
    assert out_g.shape == (B, H, W, out_cg)
    assert bool(jnp.all(jnp.isfinite(out_l))) and bool(jnp.all(jnp.isfinite(out_g)))

    ref_l, ref_g = ffc_reference(x_l, x_g, params)
    err_l = float(jnp.max(jnp.abs(out_l - ref_l)))
    err_g = float(jnp.max(jnp.abs(out_g - ref_g)))
    # Pallas dots run at default MXU precision (bf16 passes); the reference is
    # f32 HIGHEST, so allow a small numeric gap.
    assert err_l < 5e-2, f"out_l mismatch: max abs err {err_l}"
    assert err_g < 5e-2, f"out_g mismatch: max abs err {err_g}"

    print("KERNEL_OK")
</pallas_src>

<mosaic_0001>
module attributes {stable_mosaic.version = 11 : i64} {
  func.func @_pw_affine_relu_kernel(%arg0: i32, %arg1: memref<256x16xf32, #tpu.memory_space<vmem>>, %arg2: memref<16x8xf32, #tpu.memory_space<vmem>>, %arg3: memref<1x8xf32, #tpu.memory_space<vmem>>, %arg4: memref<1x8xf32, #tpu.memory_space<vmem>>, %arg5: memref<256x8xf32, #tpu.memory_space<vmem>>) attributes {dimension_semantics = [#tpu.dimension_semantics<parallel>], iteration_bounds = array<i64: 2>, scalar_prefetch = 0 : i64, scratch_operands = 0 : i64, tpu.core_type = #tpu.core_type<tc>, window_params = [{transform_indices = @transform_0, window_bounds = array<i64: 256, 16>}, {pipeline_mode = #tpu.pipeline_mode<synchronous>, transform_indices = @transform_1, window_bounds = array<i64: 16, 8>}, {pipeline_mode = #tpu.pipeline_mode<synchronous>, transform_indices = @transform_2, window_bounds = array<i64: 1, 8>}, {pipeline_mode = #tpu.pipeline_mode<synchronous>, transform_indices = @transform_3, window_bounds = array<i64: 1, 8>}, {transform_indices = @transform_4, window_bounds = array<i64: 256, 8>}]} {
    %c0 = arith.constant 0 : index
    %c0_0 = arith.constant 0 : index
    %0 = vector.load %arg1[%c0, %c0_0] : memref<256x16xf32, #tpu.memory_space<vmem>>, vector<256x16xf32>
    %c0_1 = arith.constant 0 : index
    %c0_2 = arith.constant 0 : index
    %1 = vector.load %arg2[%c0_1, %c0_2] : memref<16x8xf32, #tpu.memory_space<vmem>>, vector<16x8xf32>
    %cst = arith.constant dense<0.000000e+00> : vector<256x8xf32>
    %2 = tpu.matmul %0, %1, %cst {dimension_numbers = #tpu.dot_dimension_numbers<[1], [0], [0], [1], [0, 0, 1, 1], [], []>} : vector<256x16xf32>, vector<16x8xf32>, vector<256x8xf32> -> vector<256x8xf32>
    %c0_3 = arith.constant 0 : index
    %c0_4 = arith.constant 0 : index
    %3 = vector.load %arg3[%c0_3, %c0_4] : memref<1x8xf32, #tpu.memory_space<vmem>>, vector<1x8xf32>
    %4 = vector.broadcast %3 : vector<1x8xf32> to vector<256x8xf32>
    %5 = arith.mulf %2, %4 : vector<256x8xf32>
    %c0_5 = arith.constant 0 : index
    %c0_6 = arith.constant 0 : index
    %6 = vector.load %arg4[%c0_5, %c0_6] : memref<1x8xf32, #tpu.memory_space<vmem>>, vector<1x8xf32>
    %7 = vector.broadcast %6 : vector<1x8xf32> to vector<256x8xf32>
    %8 = arith.addf %5, %7 : vector<256x8xf32>
    %cst_7 = arith.constant 0.000000e+00 : f32
    %9 = vector.broadcast %cst_7 : f32 to vector<256x8xf32>
    %10 = arith.maximumf %8, %9 : vector<256x8xf32>
    %c0_8 = arith.constant 0 : index
    %c0_9 = arith.constant 0 : index
    %11 = vector.load %arg5[%c0_8, %c0_9] : memref<256x8xf32, #tpu.memory_space<vmem>>, vector<256x8xf32>
    tpu.vector_store %arg5[%c0_8, %c0_9], %10 {strides = array<i32>} : memref<256x8xf32, #tpu.memory_space<vmem>>, vector<256x8xf32>,
    return
  }
  func.func @transform_0(%arg0: i32) -> (i32, i32) {
    %c0_i32 = arith.constant 0 : i32
    %c0_i32_0 = arith.constant 0 : i32
    return %arg0, %c0_i32 : i32, i32
  }
  func.func @transform_1(%arg0: i32) -> (i32, i32) {
    %c0_i32 = arith.constant 0 : i32
    %c0_i32_0 = arith.constant 0 : i32
    %c0_i32_1 = arith.constant 0 : i32
    return %c0_i32, %c0_i32_0 : i32, i32
  }
  func.func @transform_2(%arg0: i32) -> (i32, i32) {
    %c0_i32 = arith.constant 0 : i32
    %c0_i32_0 = arith.constant 0 : i32
    %c0_i32_1 = arith.constant 0 : i32
    return %c0_i32, %c0_i32_0 : i32, i32
  }
  func.func @transform_3(%arg0: i32) -> (i32, i32) {
    %c0_i32 = arith.constant 0 : i32
    %c0_i32_0 = arith.constant 0 : i32
    %c0_i32_1 = arith.constant 0 : i32
    return %c0_i32, %c0_i32_0 : i32, i32
  }
  func.func @transform_4(%arg0: i32) -> (i32, i32) {
    %c0_i32 = arith.constant 0 : i32
    %c0_i32_0 = arith.constant 0 : i32
    return %arg0, %c0_i32 : i32, i32
  }
}

module attributes {stable_mosaic.version = 11 : i64} {
  func.func @_pw_affine_relu_kernel(%arg0: i32, %arg1: memref<40x16xf32, #tpu.memory_space<vmem>>, %arg2: memref<16x16xf32, #tpu.memory_space<vmem>>, %arg3: memref<1x16xf32, #tpu.memory_space<vmem>>, %arg4: memref<1x16xf32, #tpu.memory_space<vmem>>, %arg5: memref<40x16xf32, #tpu.memory_space<vmem>>) attributes {dimension_semantics = [#tpu.dimension_semantics<parallel>], iteration_bounds = array<i64: 2>, scalar_prefetch = 0 : i64, scratch_operands = 0 : i64, tpu.core_type = #tpu.core_type<tc>, window_params = [{transform_indices = @transform_0, window_bounds = array<i64: 40, 16>}, {pipeline_mode = #tpu.pipeline_mode<synchronous>, transform_indices = @transform_1, window_bounds = array<i64: 16, 16>}, {pipeline_mode = #tpu.pipeline_mode<synchronous>, transform_indices = @transform_2, window_bounds = array<i64: 1, 16>}, {pipeline_mode = #tpu.pipeline_mode<synchronous>, transform_indices = @transform_3, window_bounds = array<i64: 1, 16>}, {transform_indices = @transform_4, window_bounds = array<i64: 40, 16>}]} {
    %c0 = arith.constant 0 : index
    %c0_0 = arith.constant 0 : index
    %0 = vector.load %arg1[%c0, %c0_0] : memref<40x16xf32, #tpu.memory_space<vmem>>, vector<40x16xf32>
    %c0_1 = arith.constant 0 : index
    %c0_2 = arith.constant 0 : index
    %1 = vector.load %arg2[%c0_1, %c0_2] : memref<16x16xf32, #tpu.memory_space<vmem>>, vector<16x16xf32>
    %cst = arith.constant dense<0.000000e+00> : vector<40x16xf32>
    %2 = tpu.matmul %0, %1, %cst {dimension_numbers = #tpu.dot_dimension_numbers<[1], [0], [0], [1], [0, 0, 1, 1], [], []>} : vector<40x16xf32>, vector<16x16xf32>, vector<40x16xf32> -> vector<40x16xf32>
    %c0_3 = arith.constant 0 : index
    %c0_4 = arith.constant 0 : index
    %3 = vector.load %arg3[%c0_3, %c0_4] : memref<1x16xf32, #tpu.memory_space<vmem>>, vector<1x16xf32>
    %4 = vector.broadcast %3 : vector<1x16xf32> to vector<40x16xf32>
    %5 = arith.mulf %2, %4 : vector<40x16xf32>
    %c0_5 = arith.constant 0 : index
    %c0_6 = arith.constant 0 : index
    %6 = vector.load %arg4[%c0_5, %c0_6] : memref<1x16xf32, #tpu.memory_space<vmem>>, vector<1x16xf32>
    %7 = vector.broadcast %6 : vector<1x16xf32> to vector<40x16xf32>
    %8 = arith.addf %5, %7 : vector<40x16xf32>
    %cst_7 = arith.constant 0.000000e+00 : f32
    %9 = vector.broadcast %cst_7 : f32 to vector<40x16xf32>
    %10 = arith.maximumf %8, %9 : vector<40x16xf32>
    %c0_8 = arith.constant 0 : index
    %c0_9 = arith.constant 0 : index
    %11 = vector.load %arg5[%c0_8, %c0_9] : memref<40x16xf32, #tpu.memory_space<vmem>>, vector<40x16xf32>
    tpu.vector_store %arg5[%c0_8, %c0_9], %10 {strides = array<i32>} : memref<40x16xf32, #tpu.memory_space<vmem>>, vector<40x16xf32>,
    return
  }
  func.func @transform_0(%arg0: i32) -> (i32, i32) {
    %c0_i32 = arith.constant 0 : i32
    %c0_i32_0 = arith.constant 0 : i32
    return %arg0, %c0_i32 : i32, i32
  }
  func.func @transform_1(%arg0: i32) -> (i32, i32) {
    %c0_i32 = arith.constant 0 : i32
    %c0_i32_0 = arith.constant 0 : i32
    %c0_i32_1 = arith.constant 0 : i32
    return %c0_i32, %c0_i32_0 : i32, i32
  }
  func.func @transform_2(%arg0: i32) -> (i32, i32) {
    %c0_i32 = arith.constant 0 : i32
    %c0_i32_0 = arith.constant 0 : i32
    %c0_i32_1 = arith.constant 0 : i32
    return %c0_i32, %c0_i32_0 : i32, i32
  }
  func.func @transform_3(%arg0: i32) -> (i32, i32) {
    %c0_i32 = arith.constant 0 : i32
    %c0_i32_0 = arith.constant 0 : i32
    %c0_i32_1 = arith.constant 0 : i32
    return %c0_i32, %c0_i32_0 : i32, i32
  }
  func.func @transform_4(%arg0: i32) -> (i32, i32) {
    %c0_i32 = arith.constant 0 : i32
    %c0_i32_0 = arith.constant 0 : i32
    return %arg0, %c0_i32 : i32, i32
  }
}

module attributes {stable_mosaic.version = 11 : i64} {
  func.func @_pw_affine_relu_kernel(%arg0: i32, %arg1: memref<144x16xf32, #tpu.memory_space<vmem>>, %arg2: memref<16x16xf32, #tpu.memory_space<vmem>>, %arg3: memref<1x16xf32, #tpu.memory_space<vmem>>, %arg4: memref<1x16xf32, #tpu.memory_space<vmem>>, %arg5: memref<144x16xf32, #tpu.memory_space<vmem>>) attributes {dimension_semantics = [#tpu.dimension_semantics<parallel>], iteration_bounds = array<i64: 2>, scalar_prefetch = 0 : i64, scratch_operands = 0 : i64, tpu.core_type = #tpu.core_type<tc>, window_params = [{transform_indices = @transform_0, window_bounds = array<i64: 144, 16>}, {pipeline_mode = #tpu.pipeline_mode<synchronous>, transform_indices = @transform_1, window_bounds = array<i64: 16, 16>}, {pipeline_mode = #tpu.pipeline_mode<synchronous>, transform_indices = @transform_2, window_bounds = array<i64: 1, 16>}, {pipeline_mode = #tpu.pipeline_mode<synchronous>, transform_indices = @transform_3, window_bounds = array<i64: 1, 16>}, {transform_indices = @transform_4, window_bounds = array<i64: 144, 16>}]} {
    %c0 = arith.constant 0 : index
    %c0_0 = arith.constant 0 : index
    %0 = vector.load %arg1[%c0, %c0_0] : memref<144x16xf32, #tpu.memory_space<vmem>>, vector<144x16xf32>
    %c0_1 = arith.constant 0 : index
    %c0_2 = arith.constant 0 : index
    %1 = vector.load %arg2[%c0_1, %c0_2] : memref<16x16xf32, #tpu.memory_space<vmem>>, vector<16x16xf32>
    %cst = arith.constant dense<0.000000e+00> : vector<144x16xf32>
    %2 = tpu.matmul %0, %1, %cst {dimension_numbers = #tpu.dot_dimension_numbers<[1], [0], [0], [1], [0, 0, 1, 1], [], []>} : vector<144x16xf32>, vector<16x16xf32>, vector<144x16xf32> -> vector<144x16xf32>
    %c0_3 = arith.constant 0 : index
    %c0_4 = arith.constant 0 : index
    %3 = vector.load %arg3[%c0_3, %c0_4] : memref<1x16xf32, #tpu.memory_space<vmem>>, vector<1x16xf32>
    %4 = vector.broadcast %3 : vector<1x16xf32> to vector<144x16xf32>
    %5 = arith.mulf %2, %4 : vector<144x16xf32>
    %c0_5 = arith.constant 0 : index
    %c0_6 = arith.constant 0 : index
    %6 = vector.load %arg4[%c0_5, %c0_6] : memref<1x16xf32, #tpu.memory_space<vmem>>, vector<1x16xf32>
    %7 = vector.broadcast %6 : vector<1x16xf32> to vector<144x16xf32>
    %8 = arith.addf %5, %7 : vector<144x16xf32>
    %cst_7 = arith.constant 0.000000e+00 : f32
    %9 = vector.broadcast %cst_7 : f32 to vector<144x16xf32>
    %10 = arith.maximumf %8, %9 : vector<144x16xf32>
    %c0_8 = arith.constant 0 : index
    %c0_9 = arith.constant 0 : index
    %11 = vector.load %arg5[%c0_8, %c0_9] : memref<144x16xf32, #tpu.memory_space<vmem>>, vector<144x16xf32>
    tpu.vector_store %arg5[%c0_8, %c0_9], %10 {strides = array<i32>} : memref<144x16xf32, #tpu.memory_space<vmem>>, vector<144x16xf32>,
    return
  }
  func.func @transform_0(%arg0: i32) -> (i32, i32) {
    %c0_i32 = arith.constant 0 : i32
    %c0_i32_0 = arith.constant 0 : i32
    return %arg0, %c0_i32 : i32, i32
  }
  func.func @transform_1(%arg0: i32) -> (i32, i32) {
    %c0_i32 = arith.constant 0 : i32
    %c0_i32_0 = arith.constant 0 : i32
    %c0_i32_1 = arith.constant 0 : i32
    return %c0_i32, %c0_i32_0 : i32, i32
  }
  func.func @transform_2(%arg0: i32) -> (i32, i32) {
    %c0_i32 = arith.constant 0 : i32
    %c0_i32_0 = arith.constant 0 : i32
    %c0_i32_1 = arith.constant 0 : i32
    return %c0_i32, %c0_i32_0 : i32, i32
  }
  func.func @transform_3(%arg0: i32) -> (i32, i32) {
    %c0_i32 = arith.constant 0 : i32
    %c0_i32_0 = arith.constant 0 : i32
    %c0_i32_1 = arith.constant 0 : i32
    return %c0_i32, %c0_i32_0 : i32, i32
  }
  func.func @transform_4(%arg0: i32) -> (i32, i32) {
    %c0_i32 = arith.constant 0 : i32
    %c0_i32_0 = arith.constant 0 : i32
    return %arg0, %c0_i32 : i32, i32
  }
}

module attributes {stable_mosaic.version = 11 : i64} {
  func.func @kernel(%arg0: i32, %arg1: i32, %arg2: memref<1x8x16x32xf32, #tpu.memory_space<vmem>>, %arg3: memref<1x8x16x32xf32, #tpu.memory_space<vmem>>, %arg4: memref<1x8x16x32xf32, #tpu.memory_space<vmem>>, %arg5: memref<288x32xf32, #tpu.memory_space<vmem>>, %arg6: memref<1x128x32xf32, #tpu.memory_space<vmem>>, %arg7: memref<10x18x32xf32, #tpu.memory_space<vmem>>, %arg8: memref<128x288xf32, #tpu.memory_space<vmem>>) attributes {dimension_semantics = [#tpu.dimension_semantics<parallel>, #tpu.dimension_semantics<parallel>], iteration_bounds = array<i64: 2, 2>, scalar_prefetch = 0 : i64, scratch_operands = 2 : i64, tpu.core_type = #tpu.core_type<tc>, window_params = [{transform_indices = @transform_0, window_bounds = array<i64: 1, 8, 16, 32>}, {transform_indices = @transform_1, window_bounds = array<i64: 1, 8, 16, 32>}, {transform_indices = @transform_2, window_bounds = array<i64: 1, 8, 16, 32>}, {pipeline_mode = #tpu.pipeline_mode<synchronous>, transform_indices = @transform_3, window_bounds = array<i64: 288, 32>}, {transform_indices = @transform_4, window_bounds = array<i64: 1, 128, 32>}]} {
    %c0 = arith.constant 0 : index
    %c0_0 = arith.constant 0 : index
    %c0_1 = arith.constant 0 : index
    %c0_2 = arith.constant 0 : index
    %0 = vector.load %arg2[%c0, %c0_0, %c0_1, %c0_2] : memref<1x8x16x32xf32, #tpu.memory_space<vmem>>, vector<1x8x16x32xf32>
    %1 = vector.shape_cast %0 : vector<1x8x16x32xf32> to vector<8x16x32xf32>
    %c1 = arith.constant 1 : index
    %c1_3 = arith.constant 1 : index
    %c0_4 = arith.constant 0 : index
    %2 = vector.load %arg7[%c1, %c1_3, %c0_4] : memref<10x18x32xf32, #tpu.memory_space<vmem>>, vector<8x16x32xf32>
    tpu.vector_store %arg7[%c1, %c1_3, %c0_4], %1 {strides = array<i32>} : memref<10x18x32xf32, #tpu.memory_space<vmem>>, vector<8x16x32xf32>,
    %c0_i32 = arith.constant 0 : i32
    %3 = arith.cmpi eq, %arg1, %c0_i32 : i32
    %4 = arith.extui %3 : i1 to i32
    %c0_i32_5 = arith.constant 0 : i32
    %5 = arith.cmpi ne, %4, %c0_i32_5 : i32
    scf.if %5 {
      %52 = vector.extract_strided_slice %1 {offsets = [1, 0, 0], sizes = [1, 16, 32], strides = [1, 1, 1]} : vector<8x16x32xf32> to vector<1x16x32xf32>
      %c0_64 = arith.constant 0 : index
      %c1_65 = arith.constant 1 : index
      %c0_66 = arith.constant 0 : index
      %53 = vector.load %arg7[%c0_64, %c1_65, %c0_66] : memref<10x18x32xf32, #tpu.memory_space<vmem>>, vector<1x16x32xf32>
      tpu.vector_store %arg7[%c0_64, %c1_65, %c0_66], %52 {strides = array<i32>} : memref<10x18x32xf32, #tpu.memory_space<vmem>>, vector<1x16x32xf32>,
    } else {
    }
    %c0_i32_6 = arith.constant 0 : i32
    %6 = arith.cmpi sgt, %arg1, %c0_i32_6 : i32
    %7 = arith.extui %6 : i1 to i32
    %c0_i32_7 = arith.constant 0 : i32
    %8 = arith.cmpi ne, %7, %c0_i32_7 : i32
    scf.if %8 {
      %c0_64 = arith.constant 0 : index
      %c7 = arith.constant 7 : index
      %c0_65 = arith.constant 0 : index
      %c0_66 = arith.constant 0 : index
      %52 = vector.load %arg3[%c0_64, %c7, %c0_65, %c0_66] : memref<1x8x16x32xf32, #tpu.memory_space<vmem>>, vector<1x1x16x32xf32>
      %53 = vector.shape_cast %52 : vector<1x1x16x32xf32> to vector<1x16x32xf32>
      %c0_67 = arith.constant 0 : index
      %c1_68 = arith.constant 1 : index
      %c0_69 = arith.constant 0 : index
      %54 = vector.load %arg7[%c0_67, %c1_68, %c0_69] : memref<10x18x32xf32, #tpu.memory_space<vmem>>, vector<1x16x32xf32>
      tpu.vector_store %arg7[%c0_67, %c1_68, %c0_69], %53 {strides = array<i32>} : memref<10x18x32xf32, #tpu.memory_space<vmem>>, vector<1x16x32xf32>,
    } else {
    }
    %c1_i32 = arith.constant 1 : i32
    %9 = arith.cmpi eq, %arg1, %c1_i32 : i32
    %10 = arith.extui %9 : i1 to i32
    %c0_i32_8 = arith.constant 0 : i32
    %11 = arith.cmpi ne, %10, %c0_i32_8 : i32
    scf.if %11 {
      %52 = vector.extract_strided_slice %1 {offsets = [6, 0, 0], sizes = [1, 16, 32], strides = [1, 1, 1]} : vector<8x16x32xf32> to vector<1x16x32xf32>
      %c9 = arith.constant 9 : index
      %c1_64 = arith.constant 1 : index
      %c0_65 = arith.constant 0 : index
      %53 = vector.load %arg7[%c9, %c1_64, %c0_65] : memref<10x18x32xf32, #tpu.memory_space<vmem>>, vector<1x16x32xf32>
      tpu.vector_store %arg7[%c9, %c1_64, %c0_65], %52 {strides = array<i32>} : memref<10x18x32xf32, #tpu.memory_space<vmem>>, vector<1x16x32xf32>,
    } else {
    }
    %c1_i32_9 = arith.constant 1 : i32
    %12 = arith.cmpi slt, %arg1, %c1_i32_9 : i32
    %13 = arith.extui %12 : i1 to i32
    %c0_i32_10 = arith.constant 0 : i32
    %14 = arith.cmpi ne, %13, %c0_i32_10 : i32
    scf.if %14 {
      %c0_64 = arith.constant 0 : index
      %c0_65 = arith.constant 0 : index
      %c0_66 = arith.constant 0 : index
      %c0_67 = arith.constant 0 : index
      %52 = vector.load %arg4[%c0_64, %c0_65, %c0_66, %c0_67] : memref<1x8x16x32xf32, #tpu.memory_space<vmem>>, vector<1x1x16x32xf32>
      %53 = vector.shape_cast %52 : vector<1x1x16x32xf32> to vector<1x16x32xf32>
      %c9 = arith.constant 9 : index
      %c1_68 = arith.constant 1 : index
      %c0_69 = arith.constant 0 : index
      %54 = vector.load %arg7[%c9, %c1_68, %c0_69] : memref<10x18x32xf32, #tpu.memory_space<vmem>>, vector<1x16x32xf32>
      tpu.vector_store %arg7[%c9, %c1_68, %c0_69], %53 {strides = array<i32>} : memref<10x18x32xf32, #tpu.memory_space<vmem>>, vector<1x16x32xf32>,
    } else {
    }
    %c0_11 = arith.constant 0 : index
    %c2 = arith.constant 2 : index
    %c0_12 = arith.constant 0 : index
    %15 = vector.load %arg7[%c0_11, %c2, %c0_12] : memref<10x18x32xf32, #tpu.memory_space<vmem>>, vector<10x1x32xf32>
    %c0_13 = arith.constant 0 : index
    %c0_14 = arith.constant 0 : index
    %c0_15 = arith.constant 0 : index
    %16 = vector.load %arg7[%c0_13, %c0_14, %c0_15] : memref<10x18x32xf32, #tpu.memory_space<vmem>>, vector<10x1x32xf32>
    tpu.vector_store %arg7[%c0_13, %c0_14, %c0_15], %15 {strides = array<i32>} : memref<10x18x32xf32, #tpu.memory_space<vmem>>, vector<10x1x32xf32>,
    %c0_16 = arith.constant 0 : index
    %c15 = arith.constant 15 : index
    %c0_17 = arith.constant 0 : index
    %17 = vector.load %arg7[%c0_16, %c15, %c0_17] : memref<10x18x32xf32, #tpu.memory_space<vmem>>, vector<10x1x32xf32>
    %c0_18 = arith.constant 0 : index
    %c17 = arith.constant 17 : index
    %c0_19 = arith.constant 0 : index
    %18 = vector.load %arg7[%c0_18, %c17, %c0_19] : memref<10x18x32xf32, #tpu.memory_space<vmem>>, vector<10x1x32xf32>
    tpu.vector_store %arg7[%c0_18, %c17, %c0_19], %17 {strides = array<i32>} : memref<10x18x32xf32, #tpu.memory_space<vmem>>, vector<10x1x32xf32>,
    %c0_20 = arith.constant 0 : index
    %c0_21 = arith.constant 0 : index
    %c0_22 = arith.constant 0 : index
    %19 = vector.load %arg7[%c0_20, %c0_21, %c0_22] : memref<10x18x32xf32, #tpu.memory_space<vmem>>, vector<8x16x32xf32>
    %20 = vector.shape_cast %19 : vector<8x16x32xf32> to vector<128x32xf32>
    %c0_23 = arith.constant 0 : index
    %c0_24 = arith.constant 0 : index
    %21 = vector.load %arg8[%c0_23, %c0_24] : memref<128x288xf32, #tpu.memory_space<vmem>>, vector<128x32xf32>
    tpu.vector_store %arg8[%c0_23, %c0_24], %20 {strides = array<i32>} : memref<128x288xf32, #tpu.memory_space<vmem>>, vector<128x32xf32>,
    %c0_25 = arith.constant 0 : index
    %c1_26 = arith.constant 1 : index
    %c0_27 = arith.constant 0 : index
    %22 = vector.load %arg7[%c0_25, %c1_26, %c0_27] : memref<10x18x32xf32, #tpu.memory_space<vmem>>, vector<8x16x32xf32>
    %23 = vector.shape_cast %22 : vector<8x16x32xf32> to vector<128x32xf32>
    %c0_28 = arith.constant 0 : index
    %c32 = arith.constant 32 : index
    %24 = vector.load %arg8[%c0_28, %c32] : memref<128x288xf32, #tpu.memory_space<vmem>>, vector<128x32xf32>
    tpu.vector_store %arg8[%c0_28, %c32], %23 {strides = array<i32>} : memref<128x288xf32, #tpu.memory_space<vmem>>, vector<128x32xf32>,
    %c0_29 = arith.constant 0 : index
    %c2_30 = arith.constant 2 : index
    %c0_31 = arith.constant 0 : index
    %25 = vector.load %arg7[%c0_29, %c2_30, %c0_31] : memref<10x18x32xf32, #tpu.memory_space<vmem>>, vector<8x16x32xf32>
    %26 = vector.shape_cast %25 : vector<8x16x32xf32> to vector<128x32xf32>
    %c0_32 = arith.constant 0 : index
    %c64 = arith.constant 64 : index
    %27 = vector.load %arg8[%c0_32, %c64] : memref<128x288xf32, #tpu.memory_space<vmem>>, vector<128x32xf32>
    tpu.vector_store %arg8[%c0_32, %c64], %26 {strides = array<i32>} : memref<128x288xf32, #tpu.memory_space<vmem>>, vector<128x32xf32>,
    %c1_33 = arith.constant 1 : index
    %c0_34 = arith.constant 0 : index
    %c0_35 = arith.constant 0 : index
    %28 = vector.load %arg7[%c1_33, %c0_34, %c0_35] : memref<10x18x32xf32, #tpu.memory_space<vmem>>, vector<8x16x32xf32>
    %29 = vector.shape_cast %28 : vector<8x16x32xf32> to vector<128x32xf32>
    %c0_36 = arith.constant 0 : index
    %c96 = arith.constant 96 : index
    %30 = vector.load %arg8[%c0_36, %c96] : memref<128x288xf32, #tpu.memory_space<vmem>>, vector<128x32xf32>
    tpu.vector_store %arg8[%c0_36, %c96], %29 {strides = array<i32>} : memref<128x288xf32, #tpu.memory_space<vmem>>, vector<128x32xf32>,
    %c1_37 = arith.constant 1 : index
    %c1_38 = arith.constant 1 : index
    %c0_39 = arith.constant 0 : index
    %31 = vector.load %arg7[%c1_37, %c1_38, %c0_39] : memref<10x18x32xf32, #tpu.memory_space<vmem>>, vector<8x16x32xf32>
    %32 = vector.shape_cast %31 : vector<8x16x32xf32> to vector<128x32xf32>
    %c0_40 = arith.constant 0 : index
    %c128 = arith.constant 128 : index
    %33 = vector.load %arg8[%c0_40, %c128] : memref<128x288xf32, #tpu.memory_space<vmem>>, vector<128x32xf32>
    tpu.vector_store %arg8[%c0_40, %c128], %32 {strides = array<i32>} : memref<128x288xf32, #tpu.memory_space<vmem>>, vector<128x32xf32>,
    %c1_41 = arith.constant 1 : index
    %c2_42 = arith.constant 2 : index
    %c0_43 = arith.constant 0 : index
    %34 = vector.load %arg7[%c1_41, %c2_42, %c0_43] : memref<10x18x32xf32, #tpu.memory_space<vmem>>, vector<8x16x32xf32>
    %35 = vector.shape_cast %34 : vector<8x16x32xf32> to vector<128x32xf32>
    %c0_44 = arith.constant 0 : index
    %c160 = arith.constant 160 : index
    %36 = vector.load %arg8[%c0_44, %c160] : memref<128x288xf32, #tpu.memory_space<vmem>>, vector<128x32xf32>
    tpu.vector_store %arg8[%c0_44, %c160], %35 {strides = array<i32>} : memref<128x288xf32, #tpu.memory_space<vmem>>, vector<128x32xf32>,
    %c2_45 = arith.constant 2 : index
    %c0_46 = arith.constant 0 : index
    %c0_47 = arith.constant 0 : index
    %37 = vector.load %arg7[%c2_45, %c0_46, %c0_47] : memref<10x18x32xf32, #tpu.memory_space<vmem>>, vector<8x16x32xf32>
    %38 = vector.shape_cast %37 : vector<8x16x32xf32> to vector<128x32xf32>
    %c0_48 = arith.constant 0 : index
    %c192 = arith.constant 192 : index
    %39 = vector.load %arg8[%c0_48, %c192] : memref<128x288xf32, #tpu.memory_space<vmem>>, vector<128x32xf32>
    tpu.vector_store %arg8[%c0_48, %c192], %38 {strides = array<i32>} : memref<128x288xf32, #tpu.memory_space<vmem>>, vector<128x32xf32>,
    %c2_49 = arith.constant 2 : index
    %c1_50 = arith.constant 1 : index
    %c0_51 = arith.constant 0 : index
    %40 = vector.load %arg7[%c2_49, %c1_50, %c0_51] : memref<10x18x32xf32, #tpu.memory_space<vmem>>, vector<8x16x32xf32>
    %41 = vector.shape_cast %40 : vector<8x16x32xf32> to vector<128x32xf32>
    %c0_52 = arith.constant 0 : index
    %c224 = arith.constant 224 : index
    %42 = vector.load %arg8[%c0_52, %c224] : memref<128x288xf32, #tpu.memory_space<vmem>>, vector<128x32xf32>
    tpu.vector_store %arg8[%c0_52, %c224], %41 {strides = array<i32>} : memref<128x288xf32, #tpu.memory_space<vmem>>, vector<128x32xf32>,
    %c2_53 = arith.constant 2 : index
    %c2_54 = arith.constant 2 : index
    %c0_55 = arith.constant 0 : index
    %43 = vector.load %arg7[%c2_53, %c2_54, %c0_55] : memref<10x18x32xf32, #tpu.memory_space<vmem>>, vector<8x16x32xf32>
    %44 = vector.shape_cast %43 : vector<8x16x32xf32> to vector<128x32xf32>
    %c0_56 = arith.constant 0 : index
    %c256 = arith.constant 256 : index
    %45 = vector.load %arg8[%c0_56, %c256] : memref<128x288xf32, #tpu.memory_space<vmem>>, vector<128x32xf32>
    tpu.vector_store %arg8[%c0_56, %c256], %44 {strides = array<i32>} : memref<128x288xf32, #tpu.memory_space<vmem>>, vector<128x32xf32>,
    %c0_57 = arith.constant 0 : index
    %c0_58 = arith.constant 0 : index
    %46 = vector.load %arg8[%c0_57, %c0_58] : memref<128x288xf32, #tpu.memory_space<vmem>>, vector<128x288xf32>
    %c0_59 = arith.constant 0 : index
    %c0_60 = arith.constant 0 : index
    %47 = vector.load %arg5[%c0_59, %c0_60] : memref<288x32xf32, #tpu.memory_space<vmem>>, vector<288x32xf32>
    %cst = arith.constant dense<0.000000e+00> : vector<128x32xf32>
    %48 = tpu.matmul %46, %47, %cst {dimension_numbers = #tpu.dot_dimension_numbers<[1], [0], [0], [1], [0, 0, 1, 1], [], []>} : vector<128x288xf32>, vector<288x32xf32>, vector<128x32xf32> -> vector<128x32xf32>
    %c0_61 = arith.constant 0 : index
    %c0_62 = arith.constant 0 : index
    %c0_63 = arith.constant 0 : index
    %49 = vector.load %arg6[%c0_61, %c0_62, %c0_63] : memref<1x128x32xf32, #tpu.memory_space<vmem>>, vector<1x128x32xf32>
    %50 = vector.shape_cast %49 : vector<1x128x32xf32> to vector<128x32xf32>
    %51 = vector.shape_cast %48 : vector<128x32xf32> to vector<1x128x32xf32>
    tpu.vector_store %arg6[%c0_61, %c0_62, %c0_63], %51 {strides = array<i32>} : memref<1x128x32xf32, #tpu.memory_space<vmem>>, vector<1x128x32xf32>,
    return
  }
  func.func @transform_0(%arg0: i32, %arg1: i32) -> (i32, i32, i32, i32) {
    %c0_i32 = arith.constant 0 : i32
    %c0_i32_0 = arith.constant 0 : i32
    %c0_i32_1 = arith.constant 0 : i32
    return %arg0, %arg1, %c0_i32, %c0_i32_0 : i32, i32, i32, i32
  }
  func.func @transform_1(%arg0: i32, %arg1: i32) -> (i32, i32, i32, i32) {
    %c1_i32 = arith.constant 1 : i32
    %0 = arith.muli %arg1, %c1_i32 : i32
    %c1_i32_0 = arith.constant 1 : i32
    %1 = arith.subi %0, %c1_i32_0 : i32
    %c0_i32 = arith.constant 0 : i32
    %2 = arith.maxsi %1, %c0_i32 : i32
    %c0_i32_1 = arith.constant 0 : i32
    %c0_i32_2 = arith.constant 0 : i32
    %c0_i32_3 = arith.constant 0 : i32
    return %arg0, %2, %c0_i32_1, %c0_i32_2 : i32, i32, i32, i32
  }
  func.func @transform_2(%arg0: i32, %arg1: i32) -> (i32, i32, i32, i32) {
    %c1_i32 = arith.constant 1 : i32
    %0 = arith.addi %arg1, %c1_i32 : i32
    %c1_i32_0 = arith.constant 1 : i32
    %1 = arith.muli %0, %c1_i32_0 : i32
    %c1_i32_1 = arith.constant 1 : i32
    %2 = arith.minsi %1, %c1_i32_1 : i32
    %c0_i32 = arith.constant 0 : i32
    %c0_i32_2 = arith.constant 0 : i32
    %c0_i32_3 = arith.constant 0 : i32
    return %arg0, %2, %c0_i32, %c0_i32_2 : i32, i32, i32, i32
  }
  func.func @transform_3(%arg0: i32, %arg1: i32) -> (i32, i32) {
    %c0_i32 = arith.constant 0 : i32
    %c0_i32_0 = arith.constant 0 : i32
    %c0_i32_1 = arith.constant 0 : i32
    return %c0_i32, %c0_i32_0 : i32, i32
  }
  func.func @transform_4(%arg0: i32, %arg1: i32) -> (i32, i32, i32) {
    %c0_i32 = arith.constant 0 : i32
    %c0_i32_0 = arith.constant 0 : i32
    return %arg0, %arg1, %c0_i32 : i32, i32, i32
  }
}

module attributes {stable_mosaic.version = 11 : i64} {
  func.func @_conv2_fused_kernel(%arg0: i32, %arg1: i32, %arg2: i32, %arg3: memref<1x8x8x8xf32, #tpu.memory_space<vmem>>, %arg4: memref<1x8x8x8xf32, #tpu.memory_space<vmem>>, %arg5: memref<1x8x8x8xf32, #tpu.memory_space<vmem>>, %arg6: memref<1x8x8x16xf32, #tpu.memory_space<vmem>>, %arg7: memref<8x16xf32, #tpu.memory_space<vmem>>, %arg8: memref<1x8x8x16xf32, #tpu.memory_space<vmem>>) attributes {dimension_semantics = [#tpu.dimension_semantics<parallel>, #tpu.dimension_semantics<parallel>, #tpu.dimension_semantics<parallel>], iteration_bounds = array<i64: 2, 2, 2>, scalar_prefetch = 0 : i64, scratch_operands = 0 : i64, tpu.core_type = #tpu.core_type<tc>, window_params = [{transform_indices = @transform_0, window_bounds = array<i64: 1, 8, 8, 8>}, {transform_indices = @transform_1, window_bounds = array<i64: 1, 8, 8, 8>}, {transform_indices = @transform_2, window_bounds = array<i64: 1, 8, 8, 8>}, {transform_indices = @transform_3, window_bounds = array<i64: 1, 8, 8, 16>}, {pipeline_mode = #tpu.pipeline_mode<synchronous>, transform_indices = @transform_4, window_bounds = array<i64: 8, 16>}, {transform_indices = @transform_5, window_bounds = array<i64: 1, 8, 8, 16>}]} {
    %c0 = arith.constant 0 : index
    %c0_0 = arith.constant 0 : index
    %c0_1 = arith.constant 0 : index
    %c0_2 = arith.constant 0 : index
    %0 = vector.load %arg3[%c0, %c0_0, %c0_1, %c0_2] : memref<1x8x8x8xf32, #tpu.memory_space<vmem>>, vector<1x8x8x8xf32>
    %1 = vector.shape_cast %0 : vector<1x8x8x8xf32> to vector<8x8x8xf32>
    %c0_3 = arith.constant 0 : index
    %c0_4 = arith.constant 0 : index
    %c0_5 = arith.constant 0 : index
    %c0_6 = arith.constant 0 : index
    %2 = vector.load %arg4[%c0_3, %c0_4, %c0_5, %c0_6] : memref<1x8x8x8xf32, #tpu.memory_space<vmem>>, vector<1x8x8x8xf32>
    %3 = vector.shape_cast %2 : vector<1x8x8x8xf32> to vector<8x8x8xf32>
    %4 = arith.addf %1, %3 : vector<8x8x8xf32>
    %c0_7 = arith.constant 0 : index
    %c0_8 = arith.constant 0 : index
    %c0_9 = arith.constant 0 : index
    %c0_10 = arith.constant 0 : index
    %5 = vector.load %arg5[%c0_7, %c0_8, %c0_9, %c0_10] : memref<1x8x8x8xf32, #tpu.memory_space<vmem>>, vector<1x8x8x8xf32>
    %6 = vector.shape_cast %5 : vector<1x8x8x8xf32> to vector<8x8x8xf32>
    %7 = arith.addf %4, %6 : vector<8x8x8xf32>
    %8 = vector.shape_cast %7 : vector<8x8x8xf32> to vector<64x8xf32>
    %c0_11 = arith.constant 0 : index
    %c0_12 = arith.constant 0 : index
    %9 = vector.load %arg7[%c0_11, %c0_12] : memref<8x16xf32, #tpu.memory_space<vmem>>, vector<8x16xf32>
    %cst = arith.constant dense<0.000000e+00> : vector<64x16xf32>
    %10 = tpu.matmul %8, %9, %cst {dimension_numbers = #tpu.dot_dimension_numbers<[1], [0], [0], [1], [0, 0, 1, 1], [], []>} : vector<64x8xf32>, vector<8x16xf32>, vector<64x16xf32> -> vector<64x16xf32>
    %c0_13 = arith.constant 0 : index
    %c0_14 = arith.constant 0 : index
    %c0_15 = arith.constant 0 : index
    %c0_16 = arith.constant 0 : index
    %11 = vector.load %arg6[%c0_13, %c0_14, %c0_15, %c0_16] : memref<1x8x8x16xf32, #tpu.memory_space<vmem>>, vector<1x8x8x16xf32>
    %12 = vector.shape_cast %11 : vector<1x8x8x16xf32> to vector<8x8x16xf32>
    %13 = vector.shape_cast %12 : vector<8x8x16xf32> to vector<64x16xf32>
    %14 = arith.addf %10, %13 : vector<64x16xf32>
    %15 = vector.shape_cast %14 : vector<64x16xf32> to vector<8x8x16xf32>
    %c0_17 = arith.constant 0 : index
    %c0_18 = arith.constant 0 : index
    %c0_19 = arith.constant 0 : index
    %c0_20 = arith.constant 0 : index
    %16 = vector.load %arg8[%c0_17, %c0_18, %c0_19, %c0_20] : memref<1x8x8x16xf32, #tpu.memory_space<vmem>>, vector<1x8x8x16xf32>
    %17 = vector.shape_cast %16 : vector<1x8x8x16xf32> to vector<8x8x16xf32>
    %18 = vector.shape_cast %15 : vector<8x8x16xf32> to vector<1x8x8x16xf32>
    tpu.vector_store %arg8[%c0_17, %c0_18, %c0_19, %c0_20], %18 {strides = array<i32>} : memref<1x8x8x16xf32, #tpu.memory_space<vmem>>, vector<1x8x8x16xf32>,
    return
  }
  func.func @transform_0(%arg0: i32, %arg1: i32, %arg2: i32) -> (i32, i32, i32, i32) {
    %c0_i32 = arith.constant 0 : i32
    %c0_i32_0 = arith.constant 0 : i32
    return %arg0, %arg1, %arg2, %c0_i32 : i32, i32, i32, i32
  }
  func.func @transform_1(%arg0: i32, %arg1: i32, %arg2: i32) -> (i32, i32, i32, i32) {
    %c0_i32 = arith.constant 0 : i32
    %c0_i32_0 = arith.constant 0 : i32
    return %arg0, %arg1, %arg2, %c0_i32 : i32, i32, i32, i32
  }
  func.func @transform_2(%arg0: i32, %arg1: i32, %arg2: i32) -> (i32, i32, i32, i32) {
    %c0_i32 = arith.constant 0 : i32
    %c0_i32_0 = arith.constant 0 : i32
    %c0_i32_1 = arith.constant 0 : i32
    %c0_i32_2 = arith.constant 0 : i32
    return %arg0, %c0_i32, %c0_i32_0, %c0_i32_1 : i32, i32, i32, i32
  }
  func.func @transform_3(%arg0: i32, %arg1: i32, %arg2: i32) -> (i32, i32, i32, i32) {
    %c0_i32 = arith.constant 0 : i32
    %c0_i32_0 = arith.constant 0 : i32
    return %arg0, %arg1, %arg2, %c0_i32 : i32, i32, i32, i32
  }
  func.func @transform_4(%arg0: i32, %arg1: i32, %arg2: i32) -> (i32, i32) {
    %c0_i32 = arith.constant 0 : i32
    %c0_i32_0 = arith.constant 0 : i32
    %c0_i32_1 = arith.constant 0 : i32
    return %c0_i32, %c0_i32_0 : i32, i32
  }
  func.func @transform_5(%arg0: i32, %arg1: i32, %arg2: i32) -> (i32, i32, i32, i32) {
    %c0_i32 = arith.constant 0 : i32
    %c0_i32_0 = arith.constant 0 : i32
    return %arg0, %arg1, %arg2, %c0_i32 : i32, i32, i32, i32
  }
}

</mosaic_0001>

<bundles_post_ra>
// kernel: ffc_forward.6
= control target key start
LH: loop header
LB: loop body
LE: loop exit
PB: predicated region body
PF: predicated region fallthrough
CT: control target
= control target key end

     0   :  { %9 = vsyncpa [#allocation3], 0  ;;  %s1161_s0 = inlined_call_operand.hbm [shape: f32[512,16], index: 0, kind: input, shape index: {}]   ;;  %s1162_s1 = inlined_call_operand.vmem [shape: f32[16,8], index: 1, kind: input, shape index: {}]   ;;  %s1163_s2 = inlined_call_operand.vmem [shape: f32[1,8], index: 2, kind: input, shape index: {}]   ;;  %s1164_s3 = inlined_call_operand.vmem [shape: f32[1,8], index: 3, kind: input, shape index: {}]   ;;  %s1165_s4 = inlined_call_operand.vmem [shape: f32[512,8], index: 4, kind: output, shape index: {}]  }
   0x1   :  { %11 = vsyncpa [#allocation3 + $0x1], 0  ;;  %s858_s15 = smov 0   ;;  %s860_s16 = smov 0  }
   0x2   :  { %s862_s17 = smov 0   ;;  %s864_s18 = smov 0  }
   0x3 LB: > { %s670_s19 = sadd.s32 4294967295, %s829_s18   ;;  %s878_s20 = sadd.s32 1, %s829_s18   ;;  %s829_s18 = sphi %s864_s18, %s1172_s18   ;;  %s825_s17 = sphi %s862_s17, %s1171_s17   ;;  %s821_s16 = sphi %s860_s16, %s1170_s16   ;;  %s817_s15 = sphi %s858_s15, %s1169_s15  }
   0x4   : > { %s21_s21 = ssub.s32 %s829_s18, %s878_s20  ;;  %s24_s22 = sadd.s32 1, %s825_s17 }
   0x5   : > { %p22_p0 = scmp.eq.s32.totalorder %s21_s21, 0  ;;  %p31_p1 = scmp.ne.s32.totalorder %s825_s17, %s821_s16 }
   0x6   : > { %p32_p2 = scmp.eq.s32.totalorder %s829_s18, 0  ;;  %p37_p3 = scmp.ne.s32.totalorder %s821_s16, %s817_s15 }
   0x7   : > { %s888_s23 = scalar_select %p22_p0, %s825_s17, %s24_s22  }
   0x8   : > { %p890_p4 = por %p32_p2, %p31_p1  ;;  %p38_p5 = scmp.eq.s32.totalorder %s670_s19, 0 }
   0x9   : > { %p728_p6 = scmp.lt.s32.totalorder %s829_s18, 2  ;;  %s159_s26 = sand.u32 1, %s825_s17  }
   0xa   : > { %p897_p7 = por %p38_p5, %p37_p3  ;;  %s674_s27 = sshll.u32 %s159_s26, 8 }
   0xb   : > { %s715_s28 = sshll.u32 %s829_s18, 8  ;;  %s163_s6 = scalar_lea.vmem [#allocation2], %s674_s27 }
   0xc   : > { %s168_s5 = scalar_lea.hbm %s1161_s0, %s715_s28  ;;  %s171_s7 = sshll.u32 %s163_s6, 4  ;;  %s172_s7 = int_to_ptr.vmem [resolvable:$true] %s171_s7 }
   0xd   : > { %s169_s8 = sshll.u32 %s168_s5, 4  ;;  %p908_p8 = pnand %p728_p6, %p890_p4  ;;  %s170_s8 = int_to_ptr.hbm [resolvable:$true] %s169_s8 }
   0xe   : > { %p677_p9 = scmp.ge.s32.totalorder %s829_s18, 1  ;;  %s160_s10 = scalar_lea.sflag [#allocation3], %s159_s26 }
   0xf   : > { %s765_s11 = sshra.s32 %s170_s8, 4  ;;  %p769_p11 = pneg %p908_p8  ;;  %s766_s11 = int_to_ptr.hbm [resolvable:$true] %s765_s11 }
  0x10   : > { %s767_s12 = scalar_lea.hbm %s766_s11, 256  ;;  %s772_s15 = scalar_lea.hbm %s1161_s0, 512 }
  0x11   : > { %p768_p10 = scmp.ne.s32.totalorder %s766_s11, %s767_s12  ;;  %p773_p0 = scmp.lt.s32.totalorder %s766_s11, %s1161_s0 }
  0x12   : > { %p774_p1 = scmp.lt.s32.totalorder %s772_s15, %s767_s12 }
  0x13   : > { %p770_p12 = pnand %p769_p11, %p768_p10 }
  0x14   : > { %p775_p2 = por %p774_p1, %p773_p0 }
  0x15   : > { %p771_p13 = pneg %p770_p12 }
  0x17   : > { %p776_p3 = pnand %p775_p2, %p771_p13 }
  0x19   : > { %779 = shalt.err (!%p776_p3)
}
  0x1a   : > { %s831_s24 = smov 128   ;;  %s832_s26 = smov 8  }
  0x1b   : > { %727 = dma.hbm_to_vmem [thread:$0]  (!%p908_p8), %s170_s8, 4096, %s172_s7, %s160_s10, %s831_s24, %s831_s24, %s832_s26  }
  0x1c   : > { %p179_p4 = scmp.lt.s32.totalorder %s829_s18, 3 }
  0x1e   : > { %p180_p5 = pnand %p677_p9, %p179_p4 }
  0x1f   : > { %s185_s27 = sand.u32 (!%p180_p5), 1, %s821_s16  }
  0x20   : > { %183 = sbr.rel (%p180_p5) target bundleno = 238 (0xee), region = 36  ;;  %s678_s28 = sshll.u32 (!%p180_p5), %s185_s27, 8 }
  0x21   : > { %s186_s29 = scalar_lea.sflag (!%p180_p5), [#allocation3], %s185_s27  ;;  %s927_s30 = scalar_lea.vmem (!%p180_p5), [#allocation2], %s678_s28 }
  0x25   : > { %812 = dma.done.wait (%p897_p7), %s186_s29, 4096  }
  0x26   : > { %814 = vsyncadd (%p897_p7), %s186_s29, 4294963200  ;;  %v255_v0 = vld [vmem:[%s1162_s1 + $0x8] sm:$0xff]  ;;  %v254_v1 = vld [vmem:[%s1162_s1] sm:$0xff]  ;;  %vm256_vm0 = vcmask 130048   ;;  %s679_s25 = sshll.u32 %s670_s19, 5  ;;  %vm570_vm1 = vcmask 64512  }
  0x27   : > { %717 = vmatpush.msra.mxu2 %v255_v0  ;;  %718 = vmatpush.msra.mxu3 %v255_v0  ;;  %v238_v2 = vld [vmem:[%s927_s30 + $0x80] sm:$0xff]  ;;  %v239_v6 = vld [vmem:[%s927_s30 + $0x88] sm:$0xff]  ;;  %v240_v10 = vld [vmem:[%s927_s30 + $0x90] sm:$0xff]  ;;  %p217_p6 = scmp.lt.s32.totalorder %s679_s25, 63 }
  0x28   : > { %v246_v3 = vld [vmem:[%s927_s30 + $0xc0] sm:$0xff]  ;;  %367 = vmatpush.msra.mxu0 %v255_v0  ;;  %716 = vmatpush.msra.mxu1 %v255_v0  ;;  %v247_v7 = vld [vmem:[%s927_s30 + $0xc8] sm:$0xff]  ;;  %v248_v11 = vld [vmem:[%s927_s30 + $0xd0] sm:$0xff] }
  0x29   : > { %720 = vmatpush.msra.mxu2 %v254_v1  ;;  %721 = vmatpush.msra.mxu3 %v254_v1  ;;  %v222_v4 = vld [vmem:[%s927_s30] sm:$0xff]  ;;  %v223_v8 = vld [vmem:[%s927_s30 + $0x8] sm:$0xff]  ;;  %v224_v12 = vld [vmem:[%s927_s30 + $0x10] sm:$0xff]  ;;  %s1174_s25 = smov (!%p217_p6, %s679_s25), 63 }
  0x2a   : > { %v230_v5 = vld [vmem:[%s927_s30 + $0x40] sm:$0xff]  ;;  %697 = vmatmul.msk.f32.vlgmr.msra.gmra.mxu2 %vm256_vm0, %v238_v2  ;;  %705 = vmatmul.msk.f32.vlgmr.msra.gmra.mxu3 %vm256_vm0, %v246_v3  ;;  %v231_v9 = vld [vmem:[%s927_s30 + $0x48] sm:$0xff]  ;;  %v232_v13 = vld [vmem:[%s927_s30 + $0x50] sm:$0xff]  ;;  %s680_s13 = sshll.u32 %s1174_s25, 3 }
  0x2b   : > { %368 = vmatpush.msra.mxu0 %v254_v1  ;;  %719 = vmatpush.msra.mxu1 %v254_v1  ;;  %v241_v14 = vld [vmem:[%s927_s30 + $0x98] sm:$0xff]  ;;  %v242_v18 = vld [vmem:[%s927_s30 + $0xa0] sm:$0xff]  ;;  %v243_v22 = vld [vmem:[%s927_s30 + $0xa8] sm:$0xff]  ;;  %s1022_s14 = scalar_lea.vmem %s1165_s4, %s680_s13 }
  0x2c   : > { %681 = vmatmul.msk.f32.vlgmr.msra.gmra.mxu0 %vm256_vm0, %v222_v4  ;;  %689 = vmatmul.msk.f32.vlgmr.msra.gmra.mxu1 %vm256_vm0, %v230_v5  ;;  %v249_v15 = vld [vmem:[%s927_s30 + $0xd8] sm:$0xff]  ;;  %v250_v19 = vld [vmem:[%s927_s30 + $0xe0] sm:$0xff]  ;;  %v251_v23 = vld [vmem:[%s927_s30 + $0xe8] sm:$0xff] }
  0x2d   : > { %v225_v16 = vld [vmem:[%s927_s30 + $0x18] sm:$0xff]  ;;  %v226_v20 = vld [vmem:[%s927_s30 + $0x20] sm:$0xff]  ;;  %v227_v24 = vld [vmem:[%s927_s30 + $0x28] sm:$0xff] }
  0x2e   : > { %v233_v17 = vld [vmem:[%s927_s30 + $0x58] sm:$0xff]  ;;  %v234_v21 = vld [vmem:[%s927_s30 + $0x60] sm:$0xff]  ;;  %v235_v25 = vld [vmem:[%s927_s30 + $0x68] sm:$0xff] }
  0x2f   : > { %v244_v26 = vld [vmem:[%s927_s30 + $0xb0] sm:$0xff]  ;;  %v245_v30 = vld [vmem:[%s927_s30 + $0xb8] sm:$0xff]  ;;  %v1008_v34 = vld [vmem:[%s1163_s2] ss:$0 sm:$0xff] }
  0x30   : > { %v252_v27 = vld [vmem:[%s927_s30 + $0xf0] sm:$0xff]  ;;  %v253_v31 = vld [vmem:[%s927_s30 + $0xf8] sm:$0xff]  ;;  %v1013_v35 = vld [vmem:[%s1164_s3] ss:$0 sm:$0xff] }
  0x31   : > { %v228_v28 = vld [vmem:[%s927_s30 + $0x30] sm:$0xff]  ;;  %v229_v32 = vld [vmem:[%s927_s30 + $0x38] sm:$0xff] }
  0x32   : > { %698 = vmatmul.msk.f32.gmra.mxu2 %vm256_vm0, %v239_v6  ;;  %706 = vmatmul.msk.f32.gmra.mxu3 %vm256_vm0, %v247_v7  ;;  %v236_v29 = vld [vmem:[%s927_s30 + $0x70] sm:$0xff]  ;;  %v237_v33 = vld [vmem:[%s927_s30 + $0x78] sm:$0xff] }
  0x34   : > { %682 = vmatmul.msk.f32.gmra.mxu0 %vm256_vm0, %v223_v8  ;;  %690 = vmatmul.msk.f32.gmra.mxu1 %vm256_vm0, %v231_v9 }
  0x3a   : > { %699 = vmatmul.msk.f32.gmra.mxu2 %vm256_vm0, %v240_v10  ;;  %707 = vmatmul.msk.f32.gmra.mxu3 %vm256_vm0, %v248_v11 }
  0x3c   : > { %683 = vmatmul.msk.f32.gmra.mxu0 %vm256_vm0, %v224_v12  ;;  %691 = vmatmul.msk.f32.gmra.mxu1 %vm256_vm0, %v232_v13 }
  0x42   : > { %700 = vmatmul.msk.f32.gmra.mxu2 %vm256_vm0, %v241_v14  ;;  %708 = vmatmul.msk.f32.gmra.mxu3 %vm256_vm0, %v249_v15 }
  0x44   : > { %684 = vmatmul.msk.f32.gmra.mxu0 %vm256_vm0, %v225_v16  ;;  %692 = vmatmul.msk.f32.gmra.mxu1 %vm256_vm0, %v233_v17 }
  0x4a   : > { %701 = vmatmul.msk.f32.gmra.mxu2 %vm256_vm0, %v242_v18  ;;  %709 = vmatmul.msk.f32.gmra.mxu3 %vm256_vm0, %v250_v19 }
  0x4c   : > { %685 = vmatmul.msk.f32.gmra.mxu0 %vm256_vm0, %v226_v20  ;;  %693 = vmatmul.msk.f32.gmra.mxu1 %vm256_vm0, %v234_v21 }
  0x52   : > { %702 = vmatmul.msk.f32.gmra.mxu2 %vm256_vm0, %v243_v22  ;;  %710 = vmatmul.msk.f32.gmra.mxu3 %vm256_vm0, %v251_v23 }
  0x54   : > { %686 = vmatmul.msk.f32.gmra.mxu0 %vm256_vm0, %v227_v24  ;;  %694 = vmatmul.msk.f32.gmra.mxu1 %vm256_vm0, %v235_v25 }
  0x5a   : > { %703 = vmatmul.msk.f32.gmra.mxu2 %vm256_vm0, %v244_v26  ;;  %711 = vmatmul.msk.f32.gmra.mxu3 %vm256_vm0, %v252_v27 }
  0x5c   : > { %687 = vmatmul.msk.f32.gmra.mxu0 %vm256_vm0, %v228_v28  ;;  %695 = vmatmul.msk.f32.gmra.mxu1 %vm256_vm0, %v236_v29 }
  0x62   : > { %704 = vmatmul.msk.f32.gmra.mxu2 %vm256_vm0, %v245_v30  ;;  %712 = vmatmul.msk.f32.gmra.mxu3 %vm256_vm0, %v253_v31 }
  0x64   : > { %688 = vmatmul.msk.f32.gmra.mxu0 %vm256_vm0, %v229_v32  ;;  %696 = vmatmul.msk.f32.gmra.mxu1 %vm256_vm0, %v237_v33 }
  0xa9   : > { %v370_v36 = vpop.f32.mrf.mxu0  ;;  %v394_v37 = vpop.f32.mrf.mxu1 }
  0xaa   : > { %v470_v38 = vmul.f32 %v1008_v34, %v370_v36  ;;  %v478_v39 = vmul.f32 %v1008_v34, %v394_v37 }
  0xac   : > { %v506_v40 = vadd.f32 %v1013_v35, %v470_v38  ;;  %v514_v41 = vadd.f32 %v1013_v35, %v478_v39 }
  0xad   : > { %v418_v42 = vpop.f32.mrf.mxu2  ;;  %v442_v43 = vpop.f32.mrf.mxu3 }
  0xae   : > { %v538_v44 = vmax.f32 %v506_v40, 0.0  ;;  %v546_v45 = vmax.f32 %v514_v41, 0.0  ;;  %v486_v46 = vmul.f32 %v1008_v34, %v418_v42  ;;  %v494_v47 = vmul.f32 %v1008_v34, %v442_v43 }
  0xb0   : > { %571 = vst.msk [vmem:[%s1022_s14] sm:$0xff] %vm570_vm1, %v538_v44  ;;  %v522_v48 = vadd.f32 %v1013_v35, %v486_v46  ;;  %v530_v49 = vadd.f32 %v1013_v35, %v494_v47 }
  0xb1   : > { %579 = vst.msk [vmem:[%s1022_s14 + $0x40] sm:$0xff] %vm570_vm1, %v546_v45  ;;  %v373_v50 = vpop.f32.mrf.mxu0  ;;  %v397_v51 = vpop.f32.mrf.mxu1 }
  0xb2   : > { %v554_v52 = vmax.f32 %v522_v48, 0.0  ;;  %v562_v53 = vmax.f32 %v530_v49, 0.0  ;;  %v471_v54 = vmul.f32 %v1008_v34, %v373_v50  ;;  %v479_v55 = vmul.f32 %v1008_v34, %v397_v51 }
  0xb4   : > { %587 = vst.msk [vmem:[%s1022_s14 + $0x80] sm:$0xff] %vm570_vm1, %v554_v52  ;;  %v507_v56 = vadd.f32 %v1013_v35, %v471_v54  ;;  %v515_v57 = vadd.f32 %v1013_v35, %v479_v55 }
  0xb5   : > { %595 = vst.msk [vmem:[%s1022_s14 + $0xc0] sm:$0xff] %vm570_vm1, %v562_v53  ;;  %v421_v58 = vpop.f32.mrf.mxu2  ;;  %v445_v59 = vpop.f32.mrf.mxu3 }
  0xb6   : > { %v539_v60 = vmax.f32 %v507_v56, 0.0  ;;  %v547_v61 = vmax.f32 %v515_v57, 0.0  ;;  %v487_v62 = vmul.f32 %v1008_v34, %v421_v58  ;;  %v495_v63 = vmul.f32 %v1008_v34, %v445_v59 }
  0xb8   : > { %572 = vst.msk [vmem:[%s1022_s14 + $0x8] sm:$0xff] %vm570_vm1, %v539_v60  ;;  %v523_v0 = vadd.f32 %v1013_v35, %v487_v62  ;;  %v531_v1 = vadd.f32 %v1013_v35, %v495_v63 }
  0xb9   : > { %580 = vst.msk [vmem:[%s1022_s14 + $0x48] sm:$0xff] %vm570_vm1, %v547_v61  ;;  %v376_v2 = vpop.f32.mrf.mxu0  ;;  %v400_v3 = vpop.f32.mrf.mxu1 }
  0xba   : > { %v555_v4 = vmax.f32 %v523_v0, 0.0  ;;  %v563_v5 = vmax.f32 %v531_v1, 0.0  ;;  %v472_v6 = vmul.f32 %v1008_v34, %v376_v2  ;;  %v480_v7 = vmul.f32 %v1008_v34, %v400_v3 }
  0xbc   : > { %588 = vst.msk [vmem:[%s1022_s14 + $0x88] sm:$0xff] %vm570_vm1, %v555_v4  ;;  %v508_v8 = vadd.f32 %v1013_v35, %v472_v6  ;;  %v516_v9 = vadd.f32 %v1013_v35, %v480_v7 }
  0xbd   : > { %596 = vst.msk [vmem:[%s1022_s14 + $0xc8] sm:$0xff] %vm570_vm1, %v563_v5  ;;  %v424_v10 = vpop.f32.mrf.mxu2  ;;  %v448_v11 = vpop.f32.mrf.mxu3 }
  0xbe   : > { %v540_v12 = vmax.f32 %v508_v8, 0.0  ;;  %v548_v13 = vmax.f32 %v516_v9, 0.0  ;;  %v488_v14 = vmul.f32 %v1008_v34, %v424_v10  ;;  %v496_v15 = vmul.f32 %v1008_v34, %v448_v11 }
  0xc0   : > { %573 = vst.msk [vmem:[%s1022_s14 + $0x10] sm:$0xff] %vm570_vm1, %v540_v12  ;;  %v524_v16 = vadd.f32 %v1013_v35, %v488_v14  ;;  %v532_v17 = vadd.f32 %v1013_v35, %v496_v15 }
  0xc1   : > { %581 = vst.msk [vmem:[%s1022_s14 + $0x50] sm:$0xff] %vm570_vm1, %v548_v13  ;;  %v379_v18 = vpop.f32.mrf.mxu0  ;;  %v403_v19 = vpop.f32.mrf.mxu1 }
  0xc2   : > { %v556_v20 = vmax.f32 %v524_v16, 0.0  ;;  %v564_v21 = vmax.f32 %v532_v17, 0.0  ;;  %v473_v22 = vmul.f32 %v1008_v34, %v379_v18  ;;  %v481_v23 = vmul.f32 %v1008_v34, %v403_v19 }
  0xc4   : > { %589 = vst.msk [vmem:[%s1022_s14 + $0x90] sm:$0xff] %vm570_vm1, %v556_v20  ;;  %v509_v24 = vadd.f32 %v1013_v35, %v473_v22  ;;  %v517_v25 = vadd.f32 %v1013_v35, %v481_v23 }
  0xc5   : > { %597 = vst.msk [vmem:[%s1022_s14 + $0xd0] sm:$0xff] %vm570_vm1, %v564_v21  ;;  %v427_v26 = vpop.f32.mrf.mxu2  ;;  %v451_v27 = vpop.f32.mrf.mxu3 }
  0xc6   : > { %v541_v28 = vmax.f32 %v509_v24, 0.0  ;;  %v549_v29 = vmax.f32 %v517_v25, 0.0  ;;  %v489_v30 = vmul.f32 %v1008_v34, %v427_v26  ;;  %v497_v31 = vmul.f32 %v1008_v34, %v451_v27 }
  0xc8   : > { %574 = vst.msk [vmem:[%s1022_s14 + $0x18] sm:$0xff] %vm570_vm1, %v541_v28  ;;  %v525_v32 = vadd.f32 %v1013_v35, %v489_v30  ;;  %v533_v33 = vadd.f32 %v1013_v35, %v497_v31 }
  0xc9   : > { %582 = vst.msk [vmem:[%s1022_s14 + $0x58] sm:$0xff] %vm570_vm1, %v549_v29  ;;  %v382_v36 = vpop.f32.mrf.mxu0  ;;  %v406_v37 = vpop.f32.mrf.mxu1 }
  0xca   : > { %v557_v38 = vmax.f32 %v525_v32, 0.0  ;;  %v565_v39 = vmax.f32 %v533_v33, 0.0  ;;  %v474_v40 = vmul.f32 %v1008_v34, %v382_v36  ;;  %v482_v41 = vmul.f32 %v1008_v34, %v406_v37 }
  0xcc   : > { %590 = vst.msk [vmem:[%s1022_s14 + $0x98] sm:$0xff] %vm570_vm1, %v557_v38  ;;  %v510_v42 = vadd.f32 %v1013_v35, %v474_v40  ;;  %v518_v43 = vadd.f32 %v1013_v35, %v482_v41 }
  0xcd   : > { %598 = vst.msk [vmem:[%s1022_s14 + $0xd8] sm:$0xff] %vm570_vm1, %v565_v39  ;;  %v430_v44 = vpop.f32.mrf.mxu2  ;;  %v454_v45 = vpop.f32.mrf.mxu3 }
  0xce   : > { %v542_v46 = vmax.f32 %v510_v42, 0.0  ;;  %v550_v47 = vmax.f32 %v518_v43, 0.0  ;;  %v490_v48 = vmul.f32 %v1008_v34, %v430_v44  ;;  %v498_v49 = vmul.f32 %v1008_v34, %v454_v45 }
  0xd0   : > { %575 = vst.msk [vmem:[%s1022_s14 + $0x20] sm:$0xff] %vm570_vm1, %v542_v46  ;;  %v526_v50 = vadd.f32 %v1013_v35, %v490_v48  ;;  %v534_v51 = vadd.f32 %v1013_v35, %v498_v49 }
  0xd1   : > { %583 = vst.msk [vmem:[%s1022_s14 + $0x60] sm:$0xff] %vm570_vm1, %v550_v47  ;;  %v385_v52 = vpop.f32.mrf.mxu0  ;;  %v409_v53 = vpop.f32.mrf.mxu1 }
  0xd2   : > { %v558_v54 = vmax.f32 %v526_v50, 0.0  ;;  %v566_v55 = vmax.f32 %v534_v51, 0.0  ;;  %v475_v56 = vmul.f32 %v1008_v34, %v385_v52  ;;  %v483_v57 = vmul.f32 %v1008_v34, %v409_v53 }
  0xd4   : > { %591 = vst.msk [vmem:[%s1022_s14 + $0xa0] sm:$0xff] %vm570_vm1, %v558_v54  ;;  %v511_v58 = vadd.f32 %v1013_v35, %v475_v56  ;;  %v519_v59 = vadd.f32 %v1013_v35, %v483_v57 }
  0xd5   : > { %599 = vst.msk [vmem:[%s1022_s14 + $0xe0] sm:$0xff] %vm570_vm1, %v566_v55  ;;  %v433_v60 = vpop.f32.mrf.mxu2  ;;  %v457_v61 = vpop.f32.mrf.mxu3 }
  0xd6   : > { %v543_v62 = vmax.f32 %v511_v58, 0.0  ;;  %v551_v63 = vmax.f32 %v519_v59, 0.0  ;;  %v491_v0 = vmul.f32 %v1008_v34, %v433_v60  ;;  %v499_v1 = vmul.f32 %v1008_v34, %v457_v61 }
  0xd8   : > { %576 = vst.msk [vmem:[%s1022_s14 + $0x28] sm:$0xff] %vm570_vm1, %v543_v62  ;;  %v527_v2 = vadd.f32 %v1013_v35, %v491_v0  ;;  %v535_v3 = vadd.f32 %v1013_v35, %v499_v1 }
  0xd9   : > { %584 = vst.msk [vmem:[%s1022_s14 + $0x68] sm:$0xff] %vm570_vm1, %v551_v63  ;;  %v388_v4 = vpop.f32.mrf.mxu0  ;;  %v412_v5 = vpop.f32.mrf.mxu1 }
  0xda   : > { %v559_v6 = vmax.f32 %v527_v2, 0.0  ;;  %v567_v7 = vmax.f32 %v535_v3, 0.0  ;;  %v476_v8 = vmul.f32 %v1008_v34, %v388_v4  ;;  %v484_v9 = vmul.f32 %v1008_v34, %v412_v5 }
  0xdc   : > { %592 = vst.msk [vmem:[%s1022_s14 + $0xa8] sm:$0xff] %vm570_vm1, %v559_v6  ;;  %v512_v10 = vadd.f32 %v1013_v35, %v476_v8  ;;  %v520_v11 = vadd.f32 %v1013_v35, %v484_v9 }
  0xdd   : > { %600 = vst.msk [vmem:[%s1022_s14 + $0xe8] sm:$0xff] %vm570_vm1, %v567_v7  ;;  %v436_v12 = vpop.f32.mrf.mxu2  ;;  %v460_v13 = vpop.f32.mrf.mxu3 }
  0xde   : > { %v544_v14 = vmax.f32 %v512_v10, 0.0  ;;  %v552_v15 = vmax.f32 %v520_v11, 0.0  ;;  %v492_v16 = vmul.f32 %v1008_v34, %v436_v12  ;;  %v500_v17 = vmul.f32 %v1008_v34, %v460_v13 }
  0xe0   : > { %577 = vst.msk [vmem:[%s1022_s14 + $0x30] sm:$0xff] %vm570_vm1, %v544_v14  ;;  %v528_v18 = vadd.f32 %v1013_v35, %v492_v16  ;;  %v536_v19 = vadd.f32 %v1013_v35, %v500_v17 }
  0xe1   : > { %585 = vst.msk [vmem:[%s1022_s14 + $0x70] sm:$0xff] %vm570_vm1, %v552_v15  ;;  %v391_v20 = vpop.f32.mrf.mxu0  ;;  %v415_v21 = vpop.f32.mrf.mxu1 }
  0xe2   : > { %v560_v22 = vmax.f32 %v528_v18, 0.0  ;;  %v568_v23 = vmax.f32 %v536_v19, 0.0  ;;  %v477_v24 = vmul.f32 %v1008_v34, %v391_v20  ;;  %v485_v25 = vmul.f32 %v1008_v34, %v415_v21 }
  0xe4   : > { %593 = vst.msk [vmem:[%s1022_s14 + $0xb0] sm:$0xff] %vm570_vm1, %v560_v22  ;;  %v513_v26 = vadd.f32 %v1013_v35, %v477_v24  ;;  %v521_v27 = vadd.f32 %v1013_v35, %v485_v25 }
  0xe5   : > { %601 = vst.msk [vmem:[%s1022_s14 + $0xf0] sm:$0xff] %vm570_vm1, %v568_v23  ;;  %v439_v28 = vpop.f32.mrf.mxu2  ;;  %v463_v29 = vpop.f32.mrf.mxu3 }
  0xe6   : > { %v545_v30 = vmax.f32 %v513_v26, 0.0  ;;  %v553_v31 = vmax.f32 %v521_v27, 0.0  ;;  %v493_v32 = vmul.f32 %v1008_v34, %v439_v28  ;;  %v501_v33 = vmul.f32 %v1008_v34, %v463_v29 }
  0xe8   : > { %578 = vst.msk [vmem:[%s1022_s14 + $0x38] sm:$0xff] %vm570_vm1, %v545_v30  ;;  %v529_v36 = vadd.f32 %v1013_v35, %v493_v32  ;;  %v537_v37 = vadd.f32 %v1013_v35, %v501_v33 }
  0xe9   : > { %586 = vst.msk [vmem:[%s1022_s14 + $0x78] sm:$0xff] %vm570_vm1, %v553_v31 }
  0xea   : > { %v561_v38 = vmax.f32 %v529_v36, 0.0  ;;  %v569_v39 = vmax.f32 %v537_v37, 0.0 }
  0xec   : > { %594 = vst.msk [vmem:[%s1022_s14 + $0xb8] sm:$0xff] %vm570_vm1, %v561_v38 }
  0xed   : > { %602 = vst.msk [vmem:[%s1022_s14 + $0xf8] sm:$0xff] %vm570_vm1, %v569_v39 }
  0xee PF: > { %p14_p7 = scmp.ge.s32.totalorder %s878_s20, 4   ;;  %s1169_s15 = smov %s821_s16 }
  0xef   : > { %s1170_s16 = smov %s825_s17  ;;  %s1171_s17 = smov %s888_s23 }
  0xf0   : > { %s1172_s18 = smov %s878_s20  ;;  %16 = sbr.rel (!%p14_p7) target bundleno = 3 (0x3), region = 76 }
  0xf5   :  { %625 = vsyncpa [#allocation3], 1 }
  0xf6   :  { %627 = vsyncpa [#allocation3 + $0x1], 1 }

// kernel: reverse.3
= control target key start
LH: loop header
LB: loop body
LE: loop exit
PB: predicated region body
PF: predicated region fallthrough
CT: control target
= control target key end

     0   :  { %s80_s0 = inlined_call_operand.vmem [shape: f32[2,8,8,3], index: 0, kind: input, shape index: {}]   ;;  %s81_s1 = inlined_call_operand.vmem [shape: f32[2,8,8,3], index: 1, kind: output, shape index: {}]  }
   0x1   :  { %v24_v0 = vld [vmem:[%s80_s0 + $0x10] sm:$0xff]  ;;  %v25_v1 = vld [vmem:[%s80_s0 + $0x28] sm:$0xff]  ;;  %v29_v3 = vld [vmem:[%s80_s0 + $0x20] sm:$0xff] }
   0x2   :  { %v27_v2 = vld [vmem:[%s80_s0 + $0x8] sm:$0xff]  ;;  %4 = vst [vmem:[%s81_s1] sm:$0xff] %v24_v0  ;;  %v17_v4 = vld [vmem:[%s80_s0] sm:$0xff]  ;;  %v32_v5 = vld [vmem:[%s80_s0 + $0x18] sm:$0xff] }
   0x3   :  { %26 = vst [vmem:[%s81_s1 + $0x18] sm:$0xff] %v25_v1 }
   0x4   :  { %28 = vst [vmem:[%s81_s1 + $0x8] sm:$0xff] %v27_v2 }
   0x5   :  { %30 = vst [vmem:[%s81_s1 + $0x20] sm:$0xff] %v29_v3 }
   0x6   :  { %31 = vst [vmem:[%s81_s1 + $0x10] sm:$0xff] %v17_v4 }
   0x7   :  { %33 = vst [vmem:[%s81_s1 + $0x28] sm:$0xff] %v32_v5 }

// kernel: ffc_forward.8
= control target key start
LH: loop header
LB: loop body
LE: loop exit
PB: predicated region body
PF: predicated region fallthrough
CT: control target
= control target key end

     0   :  { %s403_s15 = smov 0   ;;  %s445_s0 = inlined_call_operand.vmem [shape: f32[80,16], index: 0, kind: input, shape index: {}]   ;;  %s446_s1 = inlined_call_operand.vmem [shape: f32[16,16], index: 1, kind: input, shape index: {}]   ;;  %s447_s2 = inlined_call_operand.vmem [shape: f32[1,16], index: 2, kind: input, shape index: {}]   ;;  %s448_s3 = inlined_call_operand.vmem [shape: f32[1,16], index: 3, kind: input, shape index: {}]   ;;  %s449_s4 = inlined_call_operand.vmem [shape: f32[80,16], index: 4, kind: output, shape index: {}]  }
   0x1 LB: > { %s340_s16 = sadd.s32 4294967295, %s376_s15   ;;  %p344_p0 = scmp.ge.s32.totalorder %s376_s15, 1  ;;  %s376_s15 = sphi %s403_s15, %s14_s15  }
   0x2   : > { %p163_p1 = scmp.lt.s32.totalorder %s376_s15, 3 }
   0x4   : > { %p164_p2 = pnand %p344_p0, %p163_p1 }
   0x5   : > { %s189_s21 = smul.u32 (!%p164_p2), 5, %s340_s16 }
   0x6   : > { %167 = sbr.rel (%p164_p2) target bundleno = 163 (0xa3), region = 36 }
   0x7   : > { %p190_p3 = scmp.lt.s32.totalorder (!%p164_p2), %s189_s21, 9 }
   0xb   : > { %v207_v0 = vld [vmem:[%s446_s1 + $0x8] sm:$0xff]  ;;  %v206_v1 = vld [vmem:[%s446_s1] sm:$0xff]  ;;  %s451_s21 = smov (!%p190_p3, %s189_s21), 9  ;;  %vm208_vm0 = vcmask 130048  }
   0xc   : > { %355 = vmatpush.msra.mxu2 %v207_v0  ;;  %356 = vmatpush.msra.mxu3 %v207_v0  ;;  %s345_s22 = sshll.u32 %s451_s21, 3  ;;  %v368_v7 = vld [vmem:[%s447_s2] ss:$0 sm:$0xff] }
   0xd   : > { %238 = vmatpush.msra.mxu0 %v207_v0  ;;  %354 = vmatpush.msra.mxu1 %v207_v0  ;;  %s193_s25 = scalar_lea.vmem %s445_s0, %s345_s22  ;;  %v369_v10 = vld [vmem:[%s448_s3] ss:$0 sm:$0xff]  ;;  %s199_s6 = scalar_lea.vmem %s449_s4, %s345_s22 }
   0xe   : > { %358 = vmatpush.msra.mxu2 %v206_v1  ;;  %359 = vmatpush.msra.mxu3 %v206_v1  ;;  %v203_v2 = vld [vmem:[%s193_s25 + $0x10] sm:$0xff]  ;;  %v205_v3 = vld [vmem:[%s193_s25 + $0x20] sm:$0xff]  ;;  %v202_v5 = vld [vmem:[%s193_s25 + $0x8] sm:$0xff] }
   0xf   : > { %239 = vmatpush.msra.mxu0 %v206_v1  ;;  %357 = vmatpush.msra.mxu1 %v206_v1  ;;  %v201_v4 = vld [vmem:[%s193_s25] sm:$0xff]  ;;  %v204_v6 = vld [vmem:[%s193_s25 + $0x18] sm:$0xff] }
  0x10   : > { %349 = vmatmul.msk.f32.vlgmr.msra.gmra.mxu2 %vm208_vm0, %v203_v2  ;;  %351 = vmatmul.msk.f32.vlgmr.msra.gmra.mxu3 %vm208_vm0, %v205_v3 }
  0x11   : > { %347 = vmatmul.msk.f32.vlgmr.msra.gmra.mxu0 %vm208_vm0, %v201_v4  ;;  %348 = vmatmul.msk.f32.vlgmr.msra.gmra.mxu1 %vm208_vm0, %v202_v5 }
  0x18   : > { %350 = vmatmul.msk.f32.gmra.mxu2 %vm208_vm0, %v204_v6 }
  0x8e   : > { %v241_v8 = vpop.f32.mrf.mxu0  ;;  %v244_v9 = vpop.f32.mrf.mxu1 }
  0x8f   : > { %v260_v11 = vmul.f32 %v368_v7, %v241_v8  ;;  %v261_v12 = vmul.f32 %v368_v7, %v244_v9 }
  0x91   : > { %v269_v13 = vadd.f32 %v369_v10, %v260_v11  ;;  %v270_v14 = vadd.f32 %v369_v10, %v261_v12 }
  0x93   : > { %v247_v15 = vpop.f32.mrf.mxu2  ;;  %v274_v16 = vmax.f32 %v269_v13, 0.0  ;;  %v275_v17 = vmax.f32 %v270_v14, 0.0  ;;  %v253_v18 = vpop.f32.mrf.mxu3 }
  0x94   : > { %v262_v19 = vmul.f32 %v368_v7, %v247_v15  ;;  %v264_v20 = vmul.f32 %v368_v7, %v253_v18 }
  0x95   : > { %279 = vst.msk [vmem:[%s199_s6] sm:$0xff] %vm208_vm0, %v274_v16 }
  0x96   : > { %v271_v21 = vadd.f32 %v369_v10, %v262_v19  ;;  %280 = vst.msk [vmem:[%s199_s6 + $0x8] sm:$0xff] %vm208_vm0, %v275_v17  ;;  %v273_v22 = vadd.f32 %v369_v10, %v264_v20 }
  0x98   : > { %v276_v23 = vmax.f32 %v271_v21, 0.0  ;;  %v278_v24 = vmax.f32 %v273_v22, 0.0 }
  0x9a   : > { %281 = vst.msk [vmem:[%s199_s6 + $0x10] sm:$0xff] %vm208_vm0, %v276_v23 }
  0x9b   : > { %v250_v25 = vpop.f32.mrf.mxu2  ;;  %283 = vst.msk [vmem:[%s199_s6 + $0x20] sm:$0xff] %vm208_vm0, %v278_v24 }
  0x9c   : > { %v263_v26 = vmul.f32 %v368_v7, %v250_v25 }
  0x9e   : > { %v272_v27 = vadd.f32 %v369_v10, %v263_v26 }
  0xa0   : > { %v277_v28 = vmax.f32 %v272_v27, 0.0 }
  0xa2   : > { %282 = vst.msk [vmem:[%s199_s6 + $0x18] sm:$0xff] %vm208_vm0, %v277_v28 }
  0xa3 PF: > { %s14_s15 = sadd.s32 1, %s376_s15  }
  0xa4   : > { %p11_p4 = scmp.ge.s32.totalorder %s14_s15, 4  }
  0xa6   :  { %13 = sbr.rel (!%p11_p4) target bundleno = 1 (0x1), region = 66 }

// kernel: ffc_forward.7
= control target key start
LH: loop header
LB: loop body
LE: loop exit
PB: predicated region body
PF: predicated region fallthrough
CT: control target
= control target key end

     0   :  { %s559_s15 = smov 0   ;;  %s711_s0 = inlined_call_operand.vmem [shape: f32[288,16], index: 0, kind: input, shape index: {}]   ;;  %s712_s1 = inlined_call_operand.vmem [shape: f32[16,16], index: 1, kind: input, shape index: {}]   ;;  %s713_s2 = inlined_call_operand.vmem [shape: f32[1,16], index: 2, kind: input, shape index: {}]   ;;  %s714_s3 = inlined_call_operand.vmem [shape: f32[1,16], index: 3, kind: input, shape index: {}]   ;;  %s715_s4 = inlined_call_operand.vmem [shape: f32[288,16], index: 4, kind: output, shape index: {}]  }
   0x1 LB: > { %s483_s16 = sadd.s32 4294967295, %s532_s15   ;;  %p487_p0 = scmp.ge.s32.totalorder %s532_s15, 1  ;;  %s532_s15 = sphi %s559_s15, %s14_s15  }
   0x2   : > { %p163_p1 = scmp.lt.s32.totalorder %s532_s15, 3 }
   0x4   : > { %p164_p2 = pnand %p487_p0, %p163_p1 }
   0x5   : > { %s189_s21 = smul.u32 (!%p164_p2), 18, %s483_s16 }
   0x6   : > { %167 = sbr.rel (%p164_p2) target bundleno = 187 (0xbb), region = 36 }
   0x7   : > { %p190_p3 = scmp.lt.s32.totalorder (!%p164_p2), %s189_s21, 35 }
   0xb   : > { %v220_v0 = vld [vmem:[%s712_s1 + $0x8] sm:$0xff]  ;;  %v219_v1 = vld [vmem:[%s712_s1] sm:$0xff]  ;;  %s717_s21 = smov (!%p190_p3, %s189_s21), 35  ;;  %vm221_vm0 = vcmask 130048  }
   0xc   : > { %511 = vmatpush.msra.mxu2 %v220_v0  ;;  %290 = vmatpush.msra.mxu0 %v220_v0  ;;  %s488_s22 = sshll.u32 %s717_s21, 3  ;;  %v622_v20 = vld [vmem:[%s713_s2] ss:$0 sm:$0xff] }
   0xd   : > { %510 = vmatpush.msra.mxu1 %v220_v0  ;;  %512 = vmatpush.msra.mxu3 %v220_v0  ;;  %s581_s25 = scalar_lea.vmem %s711_s0, %s488_s22  ;;  %v627_v21 = vld [vmem:[%s714_s3] ss:$0 sm:$0xff]  ;;  %s637_s6 = scalar_lea.vmem %s715_s4, %s488_s22 }
   0xe   : > { %514 = vmatpush.msra.mxu2 %v219_v1  ;;  %291 = vmatpush.msra.mxu0 %v219_v1  ;;  %v211_v2 = vld [vmem:[%s581_s25 + $0x50] sm:$0xff]  ;;  %v201_v3 = vld [vmem:[%s581_s25] sm:$0xff]  ;;  %v206_v4 = vld [vmem:[%s581_s25 + $0x28] sm:$0xff] }
   0xf   : > { %513 = vmatpush.msra.mxu1 %v219_v1  ;;  %515 = vmatpush.msra.mxu3 %v219_v1  ;;  %v216_v5 = vld [vmem:[%s581_s25 + $0x78] sm:$0xff]  ;;  %v202_v7 = vld [vmem:[%s581_s25 + $0x8] sm:$0xff]  ;;  %v207_v8 = vld [vmem:[%s581_s25 + $0x30] sm:$0xff] }
  0x10   : > { %500 = vmatmul.msk.f32.vlgmr.msra.gmra.mxu2 %vm221_vm0, %v211_v2  ;;  %490 = vmatmul.msk.f32.vlgmr.msra.gmra.mxu0 %vm221_vm0, %v201_v3  ;;  %v212_v6 = vld [vmem:[%s581_s25 + $0x58] sm:$0xff]  ;;  %v217_v9 = vld [vmem:[%s581_s25 + $0x80] sm:$0xff]  ;;  %v203_v11 = vld [vmem:[%s581_s25 + $0x10] sm:$0xff] }
  0x11   : > { %495 = vmatmul.msk.f32.vlgmr.msra.gmra.mxu1 %vm221_vm0, %v206_v4  ;;  %505 = vmatmul.msk.f32.vlgmr.msra.gmra.mxu3 %vm221_vm0, %v216_v5  ;;  %v213_v10 = vld [vmem:[%s581_s25 + $0x60] sm:$0xff]  ;;  %v208_v12 = vld [vmem:[%s581_s25 + $0x38] sm:$0xff]  ;;  %v218_v13 = vld [vmem:[%s581_s25 + $0x88] sm:$0xff] }
  0x12   : > { %v214_v14 = vld [vmem:[%s581_s25 + $0x68] sm:$0xff]  ;;  %v204_v15 = vld [vmem:[%s581_s25 + $0x18] sm:$0xff]  ;;  %v209_v16 = vld [vmem:[%s581_s25 + $0x40] sm:$0xff] }
  0x13   : > { %v215_v17 = vld [vmem:[%s581_s25 + $0x70] sm:$0xff]  ;;  %v205_v18 = vld [vmem:[%s581_s25 + $0x20] sm:$0xff]  ;;  %v210_v19 = vld [vmem:[%s581_s25 + $0x48] sm:$0xff] }
  0x18   : > { %501 = vmatmul.msk.f32.gmra.mxu2 %vm221_vm0, %v212_v6  ;;  %491 = vmatmul.msk.f32.gmra.mxu0 %vm221_vm0, %v202_v7 }
  0x19   : > { %496 = vmatmul.msk.f32.gmra.mxu1 %vm221_vm0, %v207_v8  ;;  %506 = vmatmul.msk.f32.gmra.mxu3 %vm221_vm0, %v217_v9 }
  0x20   : > { %502 = vmatmul.msk.f32.gmra.mxu2 %vm221_vm0, %v213_v10  ;;  %492 = vmatmul.msk.f32.gmra.mxu0 %vm221_vm0, %v203_v11 }
  0x21   : > { %497 = vmatmul.msk.f32.gmra.mxu1 %vm221_vm0, %v208_v12  ;;  %507 = vmatmul.msk.f32.gmra.mxu3 %vm221_vm0, %v218_v13 }
  0x28   : > { %503 = vmatmul.msk.f32.gmra.mxu2 %vm221_vm0, %v214_v14  ;;  %493 = vmatmul.msk.f32.gmra.mxu0 %vm221_vm0, %v204_v15 }
  0x29   : > { %498 = vmatmul.msk.f32.gmra.mxu1 %vm221_vm0, %v209_v16 }
  0x30   : > { %504 = vmatmul.msk.f32.gmra.mxu2 %vm221_vm0, %v215_v17  ;;  %494 = vmatmul.msk.f32.gmra.mxu0 %vm221_vm0, %v205_v18 }
  0x31   : > { %499 = vmatmul.msk.f32.gmra.mxu1 %vm221_vm0, %v210_v19 }
  0x8d   : > { %v293_v22 = vpop.f32.mrf.mxu0 }
  0x8e   : > { %v351_v23 = vmul.f32 %v622_v20, %v293_v22  ;;  %v308_v24 = vpop.f32.mrf.mxu1 }
  0x8f   : > { %v356_v25 = vmul.f32 %v622_v20, %v308_v24 }
  0x90   : > { %v373_v26 = vadd.f32 %v627_v21, %v351_v23 }
  0x91   : > { %v378_v27 = vadd.f32 %v627_v21, %v356_v25 }
  0x92   : > { %v391_v28 = vmax.f32 %v373_v26, 0.0 }
  0x93   : > { %v396_v29 = vmax.f32 %v378_v27, 0.0  ;;  %v323_v30 = vpop.f32.mrf.mxu2 }
  0x94   : > { %409 = vst.msk [vmem:[%s637_s6] sm:$0xff] %vm221_vm0, %v391_v28  ;;  %v361_v31 = vmul.f32 %v622_v20, %v323_v30  ;;  %v338_v33 = vpop.f32.mrf.mxu3 }
  0x95   : > { %414 = vst.msk [vmem:[%s637_s6 + $0x28] sm:$0xff] %vm221_vm0, %v396_v29  ;;  %v296_v32 = vpop.f32.mrf.mxu0  ;;  %v366_v37 = vmul.f32 %v622_v20, %v338_v33 }
  0x96   : > { %v383_v34 = vadd.f32 %v627_v21, %v361_v31  ;;  %v352_v35 = vmul.f32 %v622_v20, %v296_v32  ;;  %v311_v36 = vpop.f32.mrf.mxu1 }
  0x97   : > { %v357_v38 = vmul.f32 %v622_v20, %v311_v36  ;;  %v388_v41 = vadd.f32 %v627_v21, %v366_v37 }
  0x98   : > { %v401_v39 = vmax.f32 %v383_v34, 0.0  ;;  %v374_v40 = vadd.f32 %v627_v21, %v352_v35 }
  0x99   : > { %v379_v42 = vadd.f32 %v627_v21, %v357_v38  ;;  %v406_v44 = vmax.f32 %v388_v41, 0.0 }
  0x9a   : > { %419 = vst.msk [vmem:[%s637_s6 + $0x50] sm:$0xff] %vm221_vm0, %v401_v39  ;;  %v392_v43 = vmax.f32 %v374_v40, 0.0 }
  0x9b   : > { %v397_v45 = vmax.f32 %v379_v42, 0.0  ;;  %v326_v46 = vpop.f32.mrf.mxu2  ;;  %424 = vst.msk [vmem:[%s637_s6 + $0x78] sm:$0xff] %vm221_vm0, %v406_v44 }
  0x9c   : > { %410 = vst.msk [vmem:[%s637_s6 + $0x8] sm:$0xff] %vm221_vm0, %v392_v43  ;;  %v362_v47 = vmul.f32 %v622_v20, %v326_v46  ;;  %v341_v49 = vpop.f32.mrf.mxu3 }
  0x9d   : > { %415 = vst.msk [vmem:[%s637_s6 + $0x30] sm:$0xff] %vm221_vm0, %v397_v45  ;;  %v299_v48 = vpop.f32.mrf.mxu0  ;;  %v367_v53 = vmul.f32 %v622_v20, %v341_v49 }
  0x9e   : > { %v384_v50 = vadd.f32 %v627_v21, %v362_v47  ;;  %v353_v51 = vmul.f32 %v622_v20, %v299_v48  ;;  %v314_v52 = vpop.f32.mrf.mxu1 }
  0x9f   : > { %v358_v54 = vmul.f32 %v622_v20, %v314_v52  ;;  %v389_v57 = vadd.f32 %v627_v21, %v367_v53 }
  0xa0   : > { %v402_v55 = vmax.f32 %v384_v50, 0.0  ;;  %v375_v56 = vadd.f32 %v627_v21, %v353_v51 }
  0xa1   : > { %v380_v58 = vadd.f32 %v627_v21, %v358_v54  ;;  %v407_v60 = vmax.f32 %v389_v57, 0.0 }
  0xa2   : > { %420 = vst.msk [vmem:[%s637_s6 + $0x58] sm:$0xff] %vm221_vm0, %v402_v55  ;;  %v393_v59 = vmax.f32 %v375_v56, 0.0 }
  0xa3   : > { %v398_v61 = vmax.f32 %v380_v58, 0.0  ;;  %v329_v62 = vpop.f32.mrf.mxu2  ;;  %425 = vst.msk [vmem:[%s637_s6 + $0x80] sm:$0xff] %vm221_vm0, %v407_v60 }
  0xa4   : > { %411 = vst.msk [vmem:[%s637_s6 + $0x10] sm:$0xff] %vm221_vm0, %v393_v59  ;;  %v363_v63 = vmul.f32 %v622_v20, %v329_v62  ;;  %v344_v1 = vpop.f32.mrf.mxu3 }
  0xa5   : > { %416 = vst.msk [vmem:[%s637_s6 + $0x38] sm:$0xff] %vm221_vm0, %v398_v61  ;;  %v302_v0 = vpop.f32.mrf.mxu0  ;;  %v368_v5 = vmul.f32 %v622_v20, %v344_v1 }
  0xa6   : > { %v385_v2 = vadd.f32 %v627_v21, %v363_v63  ;;  %v354_v3 = vmul.f32 %v622_v20, %v302_v0  ;;  %v317_v4 = vpop.f32.mrf.mxu1 }
  0xa7   : > { %v359_v6 = vmul.f32 %v622_v20, %v317_v4  ;;  %v390_v9 = vadd.f32 %v627_v21, %v368_v5 }
  0xa8   : > { %v403_v7 = vmax.f32 %v385_v2, 0.0  ;;  %v376_v8 = vadd.f32 %v627_v21, %v354_v3 }
  0xa9   : > { %v381_v10 = vadd.f32 %v627_v21, %v359_v6  ;;  %v408_v12 = vmax.f32 %v390_v9, 0.0 }
  0xaa   : > { %421 = vst.msk [vmem:[%s637_s6 + $0x60] sm:$0xff] %vm221_vm0, %v403_v7  ;;  %v394_v11 = vmax.f32 %v376_v8, 0.0 }
  0xab   : > { %v399_v13 = vmax.f32 %v381_v10, 0.0  ;;  %v332_v14 = vpop.f32.mrf.mxu2  ;;  %426 = vst.msk [vmem:[%s637_s6 + $0x88] sm:$0xff] %vm221_vm0, %v408_v12 }
  0xac   : > { %412 = vst.msk [vmem:[%s637_s6 + $0x18] sm:$0xff] %vm221_vm0, %v394_v11  ;;  %v364_v15 = vmul.f32 %v622_v20, %v332_v14 }
  0xad   : > { %417 = vst.msk [vmem:[%s637_s6 + $0x40] sm:$0xff] %vm221_vm0, %v399_v13  ;;  %v305_v16 = vpop.f32.mrf.mxu0 }
  0xae   : > { %v386_v17 = vadd.f32 %v627_v21, %v364_v15  ;;  %v355_v18 = vmul.f32 %v622_v20, %v305_v16  ;;  %v320_v19 = vpop.f32.mrf.mxu1 }
  0xaf   : > { %v360_v22 = vmul.f32 %v622_v20, %v320_v19 }
  0xb0   : > { %v404_v23 = vmax.f32 %v386_v17, 0.0  ;;  %v377_v24 = vadd.f32 %v627_v21, %v355_v18 }
  0xb1   : > { %v382_v25 = vadd.f32 %v627_v21, %v360_v22 }
  0xb2   : > { %422 = vst.msk [vmem:[%s637_s6 + $0x68] sm:$0xff] %vm221_vm0, %v404_v23  ;;  %v395_v26 = vmax.f32 %v377_v24, 0.0 }
  0xb3   : > { %v400_v27 = vmax.f32 %v382_v25, 0.0  ;;  %v335_v28 = vpop.f32.mrf.mxu2 }
  0xb4   : > { %413 = vst.msk [vmem:[%s637_s6 + $0x20] sm:$0xff] %vm221_vm0, %v395_v26  ;;  %v365_v29 = vmul.f32 %v622_v20, %v335_v28 }
  0xb5   : > { %418 = vst.msk [vmem:[%s637_s6 + $0x48] sm:$0xff] %vm221_vm0, %v400_v27 }
  0xb6   : > { %v387_v30 = vadd.f32 %v627_v21, %v365_v29 }
  0xb8   : > { %v405_v31 = vmax.f32 %v387_v30, 0.0 }
  0xba   : > { %423 = vst.msk [vmem:[%s637_s6 + $0x70] sm:$0xff] %vm221_vm0, %v405_v31 }
  0xbb PF: > { %s14_s15 = sadd.s32 1, %s532_s15  }
  0xbc   : > { %p11_p4 = scmp.ge.s32.totalorder %s14_s15, 4  }
  0xbe   :  { %13 = sbr.rel (!%p11_p4) target bundleno = 1 (0x1), region = 66 }

// kernel: reverse.0
= control target key start
LH: loop header
LB: loop body
LE: loop exit
PB: predicated region body
PF: predicated region fallthrough
CT: control target
= control target key end

     0   :  { %v104_v10 = vlaneseq  ;;  %v97_v14 = vld [vmem:[#allocation0 + $0x7] ss:$-1 sm:$0xff]  ;;  %v111_v19 = vld [vmem:[#allocation0 + $0x17] ss:$-1 sm:$0xff]  ;;  %s606_s0 = inlined_call_operand.vmem [shape: f32[2,8,16,7], index: 0, kind: input, shape index: {}]   ;;  %s607_s1 = inlined_call_operand.vmem [shape: f32[2,8,16,7], index: 1, kind: output, shape index: {}]  }
   0x1   :  { %v61_v0 = vld [vmem:[%s606_s0] sm:$0xff]  ;;  %v63_v1 = vld [vmem:[%s606_s0 + $0x8] sm:$0xff]  ;;  %v65_v2 = vld [vmem:[%s606_s0 + $0x10] sm:$0xff]  ;;  %v98_v21 = vrot.slane %v97_v14, 1  ;;  %v112_v25 = vrot.slane %v111_v19, 1 }
   0x2   :  { %62 = vst [vmem:[#allocation0 + $0x8] sm:$0xff] %v61_v0  ;;  %v67_v3 = vld [vmem:[%s606_s0 + $0x18] sm:$0xff]  ;;  %v69_v4 = vld [vmem:[%s606_s0 + $0x20] sm:$0xff]  ;;  %v71_v5 = vld [vmem:[%s606_s0 + $0x28] sm:$0xff]  ;;  %v517_v17 = vshrl.u32 %v104_v10, 7 }
   0x3   :  { %64 = vst [vmem:[#allocation0 + $0x18] sm:$0xff] %v63_v1  ;;  %v73_v6 = vld [vmem:[%s606_s0 + $0x30] sm:$0xff]  ;;  %v75_v7 = vld [vmem:[%s606_s0 + $0x38] sm:$0xff]  ;;  %v77_v8 = vld [vmem:[%s606_s0 + $0x40] sm:$0xff] }
   0x4   :  { %66 = vst [vmem:[#allocation0 + $0x28] sm:$0xff] %v65_v2  ;;  %v79_v9 = vld [vmem:[%s606_s0 + $0x48] sm:$0xff]  ;;  %v81_v11 = vld [vmem:[%s606_s0 + $0x50] sm:$0xff]  ;;  %v83_v12 = vld [vmem:[%s606_s0 + $0x58] sm:$0xff]  ;;  %vm106_vm0 = vcmp.lt.s32.totalorder %v517_v17, 7 }
   0x5   :  { %68 = vst [vmem:[#allocation0 + $0x38] sm:$0xff] %v67_v3  ;;  %v85_v13 = vld [vmem:[%s606_s0 + $0x60] sm:$0xff]  ;;  %v87_v15 = vld [vmem:[%s606_s0 + $0x68] sm:$0xff]  ;;  %v89_v18 = vld [vmem:[%s606_s0 + $0x70] sm:$0xff] }
   0x6   :  { %70 = vst [vmem:[#allocation0 + $0x48] sm:$0xff] %v69_v4  ;;  %v91_v20 = vld [vmem:[%s606_s0 + $0x78] sm:$0xff]  ;;  %v125_v24 = vld [vmem:[#allocation0 + $0x27] ss:$-1 sm:$0xff]  ;;  %v139_v28 = vld [vmem:[#allocation0 + $0x37] ss:$-1 sm:$0xff] }
   0x7   :  { %72 = vst [vmem:[#allocation0 + $0x58] sm:$0xff] %v71_v5  ;;  %v126_v29 = vrot.slane %v125_v24, 1  ;;  %v153_v32 = vld [vmem:[#allocation0 + $0x47] ss:$-1 sm:$0xff]  ;;  %v140_v33 = vrot.slane %v139_v28, 1 }
   0x8   :  { %74 = vst [vmem:[#allocation0 + $0x68] sm:$0xff] %v73_v6  ;;  %v167_v36 = vld [vmem:[#allocation0 + $0x57] ss:$-1 sm:$0xff]  ;;  %v154_v37 = vrot.slane %v153_v32, 1  ;;  %v181_v40 = vld [vmem:[#allocation0 + $0x67] ss:$-1 sm:$0xff] }
   0x9   :  { %76 = vst [vmem:[#allocation0 + $0x78] sm:$0xff] %v75_v7  ;;  %v102_v16 = vld [vmem:[#allocation0 + $0xf] ss:$-1 sm:$0xff]  ;;  %v168_v41 = vrot.slane %v167_v36, 1  ;;  %v195_v44 = vld [vmem:[#allocation0 + $0x77] ss:$-1 sm:$0xff] }
   0xa   :  { %78 = vst [vmem:[#allocation0 + $0x88] sm:$0xff] %v77_v8  ;;  %v116_v22 = vld [vmem:[#allocation0 + $0x1f] ss:$-1 sm:$0xff]  ;;  %v103_v23 = vrot.slane %v102_v16, 1  ;;  %v182_v45 = vrot.slane %v181_v40, 1  ;;  %v196_v49 = vrot.slane %v195_v44, 1 }
   0xb   :  { %80 = vst [vmem:[#allocation0 + $0x98] sm:$0xff] %v79_v9  ;;  %v130_v26 = vld [vmem:[#allocation0 + $0x2f] ss:$-1 sm:$0xff]  ;;  %v117_v27 = vrot.slane %v116_v22, 1  ;;  %v209_v48 = vld [vmem:[#allocation0 + $0x87] ss:$-1 sm:$0xff] }
   0xc   :  { %82 = vst [vmem:[#allocation0 + $0xa8] sm:$0xff] %v81_v11  ;;  %v144_v30 = vld [vmem:[#allocation0 + $0x3f] ss:$-1 sm:$0xff]  ;;  %v131_v31 = vrot.slane %v130_v26, 1  ;;  %v223_v52 = vld [vmem:[#allocation0 + $0x97] ss:$-1 sm:$0xff] }
   0xd   :  { %84 = vst [vmem:[#allocation0 + $0xb8] sm:$0xff] %v83_v12  ;;  %v158_v34 = vld [vmem:[#allocation0 + $0x4f] ss:$-1 sm:$0xff]  ;;  %v145_v35 = vrot.slane %v144_v30, 1  ;;  %v210_v53 = vrot.slane %v209_v48, 1  ;;  %v224_v57 = vrot.slane %v223_v52, 1 }
   0xe   :  { %86 = vst [vmem:[#allocation0 + $0xc8] sm:$0xff] %v85_v13  ;;  %v172_v38 = vld [vmem:[#allocation0 + $0x5f] ss:$-1 sm:$0xff]  ;;  %v159_v39 = vrot.slane %v158_v34, 1  ;;  %v237_v56 = vld [vmem:[#allocation0 + $0xa7] ss:$-1 sm:$0xff] }
   0xf   :  { %88 = vst [vmem:[#allocation0 + $0xd8] sm:$0xff] %v87_v15  ;;  %v186_v42 = vld [vmem:[#allocation0 + $0x6f] ss:$-1 sm:$0xff]  ;;  %v173_v43 = vrot.slane %v172_v38, 1  ;;  %v251_v60 = vld [vmem:[#allocation0 + $0xb7] ss:$-1 sm:$0xff] }
  0x10   :  { %90 = vst [vmem:[#allocation0 + $0xe8] sm:$0xff] %v89_v18  ;;  %v200_v46 = vld [vmem:[#allocation0 + $0x7f] ss:$-1 sm:$0xff]  ;;  %v187_v47 = vrot.slane %v186_v42, 1  ;;  %v238_v61 = vrot.slane %v237_v56, 1  ;;  %v252_v1 = vrot.slane %v251_v60, 1 }
  0x11   :  { %92 = vst [vmem:[#allocation0 + $0xf8] sm:$0xff] %v91_v20  ;;  %v214_v50 = vld [vmem:[#allocation0 + $0x8f] ss:$-1 sm:$0xff]  ;;  %v201_v51 = vrot.slane %v200_v46, 1  ;;  %v265_v0 = vld [vmem:[#allocation0 + $0xc7] ss:$-1 sm:$0xff] }
  0x12   :  { %99 = vst [vmem:[#allocation1] sm:$0xff] %v98_v21  ;;  %v228_v54 = vld [vmem:[#allocation0 + $0x9f] ss:$-1 sm:$0xff]  ;;  %v215_v55 = vrot.slane %v214_v50, 1  ;;  %v279_v4 = vld [vmem:[#allocation0 + $0xd7] ss:$-1 sm:$0xff] }
  0x13   :  { %107 = vst.msk [vmem:[#allocation1] sm:$0xff] %vm106_vm0, %v103_v23  ;;  %v242_v58 = vld [vmem:[#allocation0 + $0xaf] ss:$-1 sm:$0xff]  ;;  %v229_v59 = vrot.slane %v228_v54, 1  ;;  %v266_v5 = vrot.slane %v265_v0, 1  ;;  %v280_v9 = vrot.slane %v279_v4, 1 }
  0x14   :  { %113 = vst [vmem:[#allocation1 + $0x8] sm:$0xff] %v112_v25  ;;  %v256_v62 = vld [vmem:[#allocation0 + $0xbf] ss:$-1 sm:$0xff]  ;;  %v243_v63 = vrot.slane %v242_v58, 1  ;;  %v293_v8 = vld [vmem:[#allocation0 + $0xe7] ss:$-1 sm:$0xff] }
  0x15   :  { %121 = vst.msk [vmem:[#allocation1 + $0x8] sm:$0xff] %vm106_vm0, %v117_v27  ;;  %v270_v2 = vld [vmem:[#allocation0 + $0xcf] ss:$-1 sm:$0xff]  ;;  %v257_v3 = vrot.slane %v256_v62, 1  ;;  %v307_v12 = vld [vmem:[#allocation0 + $0xf7] ss:$-1 sm:$0xff] }
  0x16   :  { %127 = vst [vmem:[#allocation1 + $0x10] sm:$0xff] %v126_v29  ;;  %v284_v6 = vld [vmem:[#allocation0 + $0xdf] ss:$-1 sm:$0xff]  ;;  %v271_v7 = vrot.slane %v270_v2, 1  ;;  %v294_v13 = vrot.slane %v293_v8, 1  ;;  %v308_v16 = vrot.slane %v307_v12, 1 }
  0x17   :  { %135 = vst.msk [vmem:[#allocation1 + $0x10] sm:$0xff] %vm106_vm0, %v131_v31  ;;  %v298_v10 = vld [vmem:[#allocation0 + $0xef] ss:$-1 sm:$0xff]  ;;  %v285_v11 = vrot.slane %v284_v6, 1 }
  0x18   :  { %141 = vst [vmem:[#allocation1 + $0x18] sm:$0xff] %v140_v33  ;;  %v312_v14 = vld [vmem:[#allocation0 + $0xff] ss:$-1 sm:$0xff]  ;;  %v299_v15 = vrot.slane %v298_v10, 1 }
  0x19   :  { %149 = vst.msk [vmem:[#allocation1 + $0x18] sm:$0xff] %vm106_vm0, %v145_v35  ;;  %v313_v18 = vrot.slane %v312_v14, 1 }
  0x1a   :  { %155 = vst [vmem:[#allocation1 + $0x20] sm:$0xff] %v154_v37  ;;  %v376_v19 = vld [vmem:[#allocation1] sm:$0xff] }
  0x1b   :  { %163 = vst.msk [vmem:[#allocation1 + $0x20] sm:$0xff] %vm106_vm0, %v159_v39 }
  0x1c   :  { %169 = vst [vmem:[#allocation1 + $0x28] sm:$0xff] %v168_v41  ;;  %v378_v20 = vld [vmem:[#allocation1 + $0x8] sm:$0xff] }
  0x1d   :  { %177 = vst.msk [vmem:[#allocation1 + $0x28] sm:$0xff] %vm106_vm0, %v173_v43 }
  0x1e   :  { %183 = vst [vmem:[#allocation1 + $0x30] sm:$0xff] %v182_v45  ;;  %v380_v17 = vld [vmem:[#allocation1 + $0x10] sm:$0xff] }
  0x1f   :  { %191 = vst.msk [vmem:[#allocation1 + $0x30] sm:$0xff] %vm106_vm0, %v187_v47 }
  0x20   :  { %197 = vst [vmem:[#allocation1 + $0x38] sm:$0xff] %v196_v49  ;;  %v382_v21 = vld [vmem:[#allocation1 + $0x18] sm:$0xff] }
  0x21   :  { %205 = vst.msk [vmem:[#allocation1 + $0x38] sm:$0xff] %vm106_vm0, %v201_v51 }
  0x22   :  { %211 = vst [vmem:[#allocation1 + $0x40] sm:$0xff] %v210_v53  ;;  %v384_v22 = vld [vmem:[#allocation1 + $0x20] sm:$0xff] }
  0x23   :  { %219 = vst.msk [vmem:[#allocation1 + $0x40] sm:$0xff] %vm106_vm0, %v215_v55 }
  0x24   :  { %225 = vst [vmem:[#allocation1 + $0x48] sm:$0xff] %v224_v57  ;;  %v386_v23 = vld [vmem:[#allocation1 + $0x28] sm:$0xff] }
  0x25   :  { %233 = vst.msk [vmem:[#allocation1 + $0x48] sm:$0xff] %vm106_vm0, %v229_v59 }
  0x26   :  { %239 = vst [vmem:[#allocation1 + $0x50] sm:$0xff] %v238_v61  ;;  %v388_v24 = vld [vmem:[#allocation1 + $0x30] sm:$0xff] }
  0x27   :  { %247 = vst.msk [vmem:[#allocation1 + $0x50] sm:$0xff] %vm106_vm0, %v243_v63 }
  0x28   :  { %253 = vst [vmem:[#allocation1 + $0x58] sm:$0xff] %v252_v1  ;;  %v390_v25 = vld [vmem:[#allocation1 + $0x38] sm:$0xff] }
  0x29   :  { %261 = vst.msk [vmem:[#allocation1 + $0x58] sm:$0xff] %vm106_vm0, %v257_v3 }
  0x2a   :  { %267 = vst [vmem:[#allocation1 + $0x60] sm:$0xff] %v266_v5  ;;  %v392_v26 = vld [vmem:[#allocation1 + $0x40] sm:$0xff] }
  0x2b   :  { %275 = vst.msk [vmem:[#allocation1 + $0x60] sm:$0xff] %vm106_vm0, %v271_v7 }
  0x2c   :  { %281 = vst [vmem:[#allocation1 + $0x68] sm:$0xff] %v280_v9  ;;  %v394_v27 = vld [vmem:[#allocation1 + $0x48] sm:$0xff] }
  0x2d   :  { %289 = vst.msk [vmem:[#allocation1 + $0x68] sm:$0xff] %vm106_vm0, %v285_v11 }
  0x2e   :  { %295 = vst [vmem:[#allocation1 + $0x70] sm:$0xff] %v294_v13  ;;  %v396_v28 = vld [vmem:[#allocation1 + $0x50] sm:$0xff] }
  0x2f   :  { %303 = vst.msk [vmem:[#allocation1 + $0x70] sm:$0xff] %vm106_vm0, %v299_v15 }
  0x30   :  { %309 = vst [vmem:[#allocation1 + $0x78] sm:$0xff] %v308_v16  ;;  %v398_v29 = vld [vmem:[#allocation1 + $0x58] sm:$0xff] }
  0x31   :  { %317 = vst.msk [vmem:[#allocation1 + $0x78] sm:$0xff] %vm106_vm0, %v313_v18 }
  0x32   :  { %377 = vst [vmem:[%s607_s1] sm:$0xff] %v376_v19  ;;  %v400_v30 = vld [vmem:[#allocation1 + $0x60] sm:$0xff] }
  0x33   :  { %379 = vst [vmem:[%s607_s1 + $0x8] sm:$0xff] %v378_v20 }
  0x34   :  { %381 = vst [vmem:[%s607_s1 + $0x10] sm:$0xff] %v380_v17  ;;  %v402_v31 = vld [vmem:[#allocation1 + $0x68] sm:$0xff] }
  0x35   :  { %383 = vst [vmem:[%s607_s1 + $0x18] sm:$0xff] %v382_v21 }
  0x36   :  { %385 = vst [vmem:[%s607_s1 + $0x20] sm:$0xff] %v384_v22  ;;  %v404_v32 = vld [vmem:[#allocation1 + $0x70] sm:$0xff] }
  0x37   :  { %387 = vst [vmem:[%s607_s1 + $0x28] sm:$0xff] %v386_v23 }
  0x38   :  { %389 = vst [vmem:[%s607_s1 + $0x30] sm:$0xff] %v388_v24  ;;  %v406_v33 = vld [vmem:[#allocation1 + $0x78] sm:$0xff] }
  0x39   :  { %391 = vst [vmem:[%s607_s1 + $0x38] sm:$0xff] %v390_v25 }
  0x3a   :  { %393 = vst [vmem:[%s607_s1 + $0x40] sm:$0xff] %v392_v26 }
  0x3b   :  { %395 = vst [vmem:[%s607_s1 + $0x48] sm:$0xff] %v394_v27 }
  0x3c   :  { %397 = vst [vmem:[%s607_s1 + $0x50] sm:$0xff] %v396_v28 }
  0x3d   :  { %399 = vst [vmem:[%s607_s1 + $0x58] sm:$0xff] %v398_v29 }
  0x3e   :  { %401 = vst [vmem:[%s607_s1 + $0x60] sm:$0xff] %v400_v30 }
  0x3f   :  { %403 = vst [vmem:[%s607_s1 + $0x68] sm:$0xff] %v402_v31 }
  0x40   :  { %405 = vst [vmem:[%s607_s1 + $0x70] sm:$0xff] %v404_v32 }
  0x41   :  { %407 = vst [vmem:[%s607_s1 + $0x78] sm:$0xff] %v406_v33 }

// kernel: ffc_forward.9
= control target key start
LH: loop header
LB: loop body
LE: loop exit
PB: predicated region body
PF: predicated region fallthrough
CT: control target
= control target key end

     0   :  { %10 = vsyncpa [#allocation6], 0  ;;  %s1349_s0 = inlined_call_operand.vmem [shape: f32[2,16,16,8], index: 0, kind: input, shape index: {}]   ;;  %s1350_s1 = inlined_call_operand.vmem [shape: f32[2,16,16,8], index: 1, kind: input, shape index: {}]   ;;  %s1351_s2 = inlined_call_operand.vmem [shape: f32[2,8,8,8], index: 2, kind: input, shape index: {}]   ;;  %s1352_s3 = inlined_call_operand.vmem [shape: f32[2,16,16,16], index: 3, kind: input, shape index: {}]   ;;  %s1353_s4 = inlined_call_operand.vmem [shape: f32[8,16], index: 4, kind: input, shape index: {}]   ;;  %s1354_s5 = inlined_call_operand.hbm [shape: f32[2,16,16,16], index: 5, kind: output, shape index: {}]  }
   0x1   :  { %12 = vsyncpa [#allocation6 + $0x1], 0  ;;  %s1103_s18 = smov 0   ;;  %s1105_s19 = smov 0  }
   0x2   :  { %s1107_s20 = smov 0   ;;  %s1109_s21 = smov 0  }
   0x3   :  { %s1111_s22 = smov 0   ;;  %s1113_s23 = smov 0  }
   0x4   :  { %s1115_s24 = smov 0   ;;  %s1117_s25 = smov 0  }
   0x5   :  { %s1119_s26 = smov 0   ;;  %s1121_s27 = smov 0  }
   0x6 LB: > { %s30_s28 = sadd.s32 1, %s1056_s24  ;;  %s33_s29 = sadd.s32 1, %s1060_s25  ;;  %s1068_s27 = sphi %s1121_s27, %s18_s27   ;;  %s1064_s26 = sphi %s1119_s26, %s1375_s26   ;;  %s1060_s25 = sphi %s1117_s25, %s1374_s25   ;;  %s1056_s24 = sphi %s1115_s24, %s1373_s24   ;;  %s1052_s23 = sphi %s1113_s23, %s1372_s23   ;;  %s1048_s22 = sphi %s1111_s22, %s1371_s22   ;;  %s1044_s21 = sphi %s1109_s21, %s1370_s21   ;;  %s1040_s20 = sphi %s1107_s20, %s1369_s20   ;;  %s1036_s19 = sphi %s1105_s19, %s1368_s19   ;;  %s1032_s18 = sphi %s1103_s18, %s1367_s18  }
   0x7   : > { %p31_p0 = scmp.ge.s32.totalorder %s30_s28, 2  ;;  %s819_s30 = sadd.s32 4294967295, %s1068_s27  }
   0x8   : > { %p55_p1 = scmp.ne.s32.totalorder %s1040_s20, %s1036_s19  ;;  %s37_s6 = sadd.s32 1, %s1064_s26 }
   0x9   : > { %s1377_s28 = smov (%p31_p0, %s30_s28), 0  ;;  %s1379_s29 = smov (!%p31_p0, %s33_s29), %s1060_s25 }
   0xa   : > { %1358 = sst [smem:[#allocation8_spill]] %s1377_s28  ;;  %p56_p2 = scmp.eq.s32.totalorder %s1068_s27, 0 }
   0xb   : > { %p35_p3 = scmp.ge.s32.totalorder %s1379_s29, 2  ;;  %p196_p4 = scmp.eq.s32.totalorder %s819_s30, 7 }
   0xc   : > { %s820_s7 = sadd.s32 4294967294, %s1068_s27   ;;  %p1164_p5 = por %p56_p2, %p55_p1 }
   0xd   : > { %s1381_s29 = smov (%p35_p3, %s1379_s29), 0  ;;  %s1383_s6 = smov (!%p35_p3, %s37_s6), %s1064_s26 }
   0xe   : > { %1360 = sst [smem:[#allocation9_spill]] %s1381_s29  ;;  %p1171_p6 = por %p196_p4, %p55_p1 }
   0xf   : > { %p201_p7 = scmp.ne.s32.totalorder %s1036_s19, %s1032_s18  ;;  %p39_p8 = scmp.ge.s32.totalorder %s1383_s6, 2 }
  0x10   : > { %p202_p9 = scmp.eq.s32.totalorder %s820_s7, 7  ;;  %s42_s10 = ssub.s32 %s1060_s25, %s1381_s29 }
  0x11   : > { %s1385_s6 = smov (%p39_p8, %s1383_s6), 0  ;;  %s44_s11 = ssub.s32 %s1056_s24, %s1377_s28 }
  0x12   : > { %1362 = sst [smem:[#allocation10_spill]] %s1385_s6  ;;  %p1183_p10 = por %p202_p9, %p201_p7 }
  0x13   : > { %s41_s13 = ssub.s32 %s1064_s26, %s1385_s6  ;;  %s48_s16 = sadd.s32 1, %s1040_s20 }
  0x14   : > { %s43_s14 = sor.u32 %s42_s10, %s41_s13  ;;  %p822_p12 = scmp.ge.s32.totalorder %s1068_s27, 8 }
  0x15   : > { %s45_s15 = sor.u32 %s44_s11, %s43_s14 }
  0x16   : > { %p46_p11 = scmp.eq.s32.totalorder %s45_s15, 0  ;;  %221 = sbr.rel (%p822_p12) target bundleno = 72 (0x48), region = 20 }
  0x18   : > { %s1191_s17 = scalar_select %p46_p11, %s1040_s20, %s48_s16  }
  0x1b   : > { %224 = sbr.rel (!%p1164_p5) target bundleno = 42 (0x2a), region = 24  ;;  %s226_s30 = sand.u32 (%p1164_p5), 1, %s1040_s20  }
  0x1c   : > { %s860_s7 = sshll.u32 (%p1164_p5), %s1060_s25, 4  ;;  %s823_s29 = sshll.u32 (%p1164_p5), %s226_s30, 6 }
  0x1d   : > { %s231_s6 = sadd.s32 (%p1164_p5), %s1056_s24, %s860_s7  ;;  %s826_s10 = sshll.u32 (%p1164_p5), %s1064_s26, 5 }
  0x1e   : > { %s233_s11 = sadd.s32 (%p1164_p5), %s826_s10, %s231_s6  ;;  %s228_s28 = scalar_lea.vmem (%p1164_p5), [#allocation2], %s823_s29 }
  0x1f   : > { %s827_s13 = sshll.u32 (%p1164_p5), %s233_s11, 3 }
  0x20   : > { %s235_s16 = scalar_lea.vmem %s1349_s0, %s827_s13 }
  0x21   : > { %v278_v0 = vld [vmem:[%s235_s16] sm:$0xff]  ;;  %v280_v1 = vld [vmem:[%s235_s16 + $0x10] sm:$0xff] }
  0x22   : > { %v282_v2 = vld [vmem:[%s235_s16 + $0x20] sm:$0xff]  ;;  %279 = vst [vmem:[%s228_s28] sm:$0xff] %v278_v0  ;;  %v284_v3 = vld [vmem:[%s235_s16 + $0x30] sm:$0xff] }
  0x23   : > { %281 = vst [vmem:[%s228_s28 + $0x8] sm:$0xff] %v280_v1  ;;  %v286_v4 = vld [vmem:[%s235_s16 + $0x40] sm:$0xff]  ;;  %v288_v5 = vld [vmem:[%s235_s16 + $0x50] sm:$0xff] }
  0x24   : > { %283 = vst [vmem:[%s228_s28 + $0x10] sm:$0xff] %v282_v2  ;;  %v290_v6 = vld [vmem:[%s235_s16 + $0x60] sm:$0xff]  ;;  %v292_v7 = vld [vmem:[%s235_s16 + $0x70] sm:$0xff] }
  0x25   : > { %285 = vst [vmem:[%s228_s28 + $0x18] sm:$0xff] %v284_v3 }
  0x26   : > { %287 = vst [vmem:[%s228_s28 + $0x20] sm:$0xff] %v286_v4 }
  0x27   : > { %289 = vst [vmem:[%s228_s28 + $0x28] sm:$0xff] %v288_v5 }
  0x28   : > { %291 = vst [vmem:[%s228_s28 + $0x30] sm:$0xff] %v290_v6 }
  0x29   : > { %293 = vst [vmem:[%s228_s28 + $0x38] sm:$0xff] %v292_v7 }
  0x2a PF: > { %299 = sbr.rel (!%p1164_p5) target bundleno = 57 (0x39), region = 62  ;;  %s301_s29 = sand.u32 (%p1164_p5), 1, %s1040_s20  }
  0x2b   : > { %s861_s6 = sshll.u32 (%p1164_p5), %s1060_s25, 4  ;;  %s828_s30 = sshll.u32 (%p1164_p5), %s301_s29, 6 }
  0x2c   : > { %s306_s7 = sadd.s32 (%p1164_p5), %s1056_s24, %s861_s6  ;;  %s831_s10 = sshll.u32 (%p1164_p5), %s1064_s26, 5 }
  0x2d   : > { %s308_s11 = sadd.s32 (%p1164_p5), %s831_s10, %s306_s7  ;;  %s303_s28 = scalar_lea.vmem (%p1164_p5), [#allocation3], %s828_s30 }
  0x2e   : > { %s832_s13 = sshll.u32 (%p1164_p5), %s308_s11, 3 }
  0x2f   : > { %s310_s16 = scalar_lea.vmem %s1350_s1, %s832_s13 }
  0x30   : > { %v353_v8 = vld [vmem:[%s310_s16] sm:$0xff]  ;;  %v355_v9 = vld [vmem:[%s310_s16 + $0x10] sm:$0xff] }
  0x31   : > { %v357_v10 = vld [vmem:[%s310_s16 + $0x20] sm:$0xff]  ;;  %354 = vst [vmem:[%s303_s28] sm:$0xff] %v353_v8  ;;  %v359_v11 = vld [vmem:[%s310_s16 + $0x30] sm:$0xff] }
  0x32   : > { %356 = vst [vmem:[%s303_s28 + $0x8] sm:$0xff] %v355_v9  ;;  %v361_v12 = vld [vmem:[%s310_s16 + $0x40] sm:$0xff]  ;;  %v363_v13 = vld [vmem:[%s310_s16 + $0x50] sm:$0xff] }
  0x33   : > { %358 = vst [vmem:[%s303_s28 + $0x10] sm:$0xff] %v357_v10  ;;  %v365_v14 = vld [vmem:[%s310_s16 + $0x60] sm:$0xff]  ;;  %v367_v15 = vld [vmem:[%s310_s16 + $0x70] sm:$0xff] }
  0x34   : > { %360 = vst [vmem:[%s303_s28 + $0x18] sm:$0xff] %v359_v11 }
  0x35   : > { %362 = vst [vmem:[%s303_s28 + $0x20] sm:$0xff] %v361_v12 }
  0x36   : > { %364 = vst [vmem:[%s303_s28 + $0x28] sm:$0xff] %v363_v13 }
  0x37   : > { %366 = vst [vmem:[%s303_s28 + $0x30] sm:$0xff] %v365_v14 }
  0x38   : > { %368 = vst [vmem:[%s303_s28 + $0x38] sm:$0xff] %v367_v15 }
  0x39 PF: > { %382 = sbr.rel (!%p1164_p5) target bundleno = 72 (0x48), region = 104  ;;  %s384_s29 = sand.u32 (%p1164_p5), 1, %s1040_s20  }
  0x3a   : > { %s862_s6 = sshll.u32 (%p1164_p5), %s1060_s25, 4  ;;  %s833_s30 = sshll.u32 (%p1164_p5), %s384_s29, 6 }
  0x3b   : > { %s389_s7 = sadd.s32 (%p1164_p5), %s1056_s24, %s862_s6  ;;  %s836_s10 = sshll.u32 (%p1164_p5), %s1064_s26, 5 }
  0x3c   : > { %s391_s11 = sadd.s32 (%p1164_p5), %s836_s10, %s389_s7  ;;  %s386_s8 = scalar_lea.vmem (%p1164_p5), [#allocation4], %s833_s30 }
  0x3d   : > { %s837_s13 = sshll.u32 (%p1164_p5), %s391_s11, 3 }
  0x3e   : > { %s393_s16 = scalar_lea.vmem %s1352_s3, %s837_s13 }
  0x3f   : > { %v436_v16 = vld [vmem:[%s393_s16] sm:$0xff]  ;;  %v438_v17 = vld [vmem:[%s393_s16 + $0x10] sm:$0xff] }
  0x40   : > { %v440_v18 = vld [vmem:[%s393_s16 + $0x20] sm:$0xff]  ;;  %437 = vst [vmem:[%s386_s8] sm:$0xff] %v436_v16  ;;  %v442_v19 = vld [vmem:[%s393_s16 + $0x30] sm:$0xff] }
  0x41   : > { %439 = vst [vmem:[%s386_s8 + $0x8] sm:$0xff] %v438_v17  ;;  %v444_v20 = vld [vmem:[%s393_s16 + $0x40] sm:$0xff]  ;;  %v446_v21 = vld [vmem:[%s393_s16 + $0x50] sm:$0xff] }
  0x42   : > { %441 = vst [vmem:[%s386_s8 + $0x10] sm:$0xff] %v440_v18  ;;  %v448_v22 = vld [vmem:[%s393_s16 + $0x60] sm:$0xff]  ;;  %v450_v23 = vld [vmem:[%s393_s16 + $0x70] sm:$0xff] }
  0x43   : > { %443 = vst [vmem:[%s386_s8 + $0x18] sm:$0xff] %v442_v19 }
  0x44   : > { %445 = vst [vmem:[%s386_s8 + $0x20] sm:$0xff] %v444_v20 }
  0x45   : > { %447 = vst [vmem:[%s386_s8 + $0x28] sm:$0xff] %v446_v21 }
  0x46   : > { %449 = vst [vmem:[%s386_s8 + $0x30] sm:$0xff] %v448_v22 }
  0x47   : > { %451 = vst [vmem:[%s386_s8 + $0x38] sm:$0xff] %v450_v23 }
  0x48 PF: > { %p838_p13 = scmp.ge.s32.totalorder %s1068_s27, 1  ;;  %p456_p0 = scmp.lt.s32.totalorder %s1068_s27, 9 }
  0x4a   : > { %p457_p1 = pnand %p838_p13, %p456_p0 }
  0x4b   : > { %s463_s6 = sand.u32 (!%p457_p1), 1, %s1036_s19   ;;  %p519_p2 = scmp.lt.s32.totalorder (!%p457_p1), %s1052_s23, 1 }
  0x4c   : > { %460 = sbr.rel (%p457_p1) target bundleno = 236 (0xec), region = 142  ;;  %s1230_s30 = sshll.u32 (!%p457_p1), %s463_s6, 6 }
  0x4d   : > { %s1234_s10 = scalar_lea.vmem (!%p457_p1), [#allocation2], %s1230_s30  ;;  %s1238_s11 = scalar_lea.vmem (!%p457_p1), [#allocation3], %s1230_s30 }
  0x4e   : > { %s864_s8 = sshll.u32 (!%p457_p1), %s1048_s22, 4  ;;  %s1268_s28 = scalar_lea.vmem (!%p457_p1), [#allocation4], %s1230_s30 }
  0x4f   : > { %s662_s29 = sadd.s32 (!%p457_p1), %s1044_s21, %s864_s8  ;;  %s651_s15 = scalar_lea.sflag (!%p457_p1), [#allocation6], %s463_s6 }
  0x51   : > { %v566_v24 = vld [vmem:[%s1353_s4] sm:$0xff]  ;;  %s520_s7 = scalar_select %p519_p2, %s1052_s23, 1  ;;  %v532_v27 = vld [vmem:[%s1234_s10 + $0x30] sm:$0xff]  ;;  %v531_v36 = vld [vmem:[%s1234_s10 + $0x28] sm:$0xff]  ;;  %vm575_vm0 = vcmask 64512   ;;  %vm641_vm1 = vcmask 130048  }
  0x52   : > { %866 = vmatpush.msra.mxu2 %v566_v24  ;;  %867 = vmatpush.msra.mxu3 %v566_v24  ;;  %v530_v25 = vld [vmem:[%s1234_s10 + $0x20] sm:$0xff]  ;;  %v540_v29 = vld [vmem:[%s1238_s11 + $0x30] sm:$0xff]  ;;  %v539_v38 = vld [vmem:[%s1238_s11 + $0x28] sm:$0xff] }
  0x53   : > { %615 = vmatpush.msra.mxu0 %v566_v24  ;;  %865 = vmatpush.msra.mxu1 %v566_v24  ;;  %v538_v26 = vld [vmem:[%s1238_s11 + $0x20] sm:$0xff]  ;;  %s863_s13 = sshll.u32 %s520_s7, 6  ;;  %v548_v32 = vadd.f32 %v540_v29, %v532_v27  ;;  %v528_v34 = vld [vmem:[%s1234_s10 + $0x10] sm:$0xff]  ;;  %v533_v39 = vld [vmem:[%s1234_s10 + $0x38] sm:$0xff]  ;;  %v547_v51 = vadd.f32 %v539_v38, %v531_v36  ;;  %s856_s7 = sshll.u32 %s1052_s23, 5 }
  0x54   : > { %v546_v28 = vadd.f32 %v538_v26, %v530_v25  ;;  %v526_v30 = vld [vmem:[%s1234_s10] sm:$0xff]  ;;  %v536_v35 = vld [vmem:[%s1238_s11 + $0x10] sm:$0xff]  ;;  %s523_s16 = scalar_lea.vmem %s1351_s2, %s863_s13  ;;  %v541_v40 = vld [vmem:[%s1238_s11 + $0x38] sm:$0xff] }
  0x55   : > { %v534_v31 = vld [vmem:[%s1238_s11] sm:$0xff]  ;;  %v544_v37 = vadd.f32 %v536_v35, %v528_v34  ;;  %v556_v42 = vld [vmem:[%s523_s16 + $0x30] sm:$0xff]  ;;  %v527_v49 = vld [vmem:[%s1234_s10 + $0x8] sm:$0xff]  ;;  %v549_v52 = vadd.f32 %v541_v40, %v533_v39 }
  0x56   : > { %v542_v33 = vadd.f32 %v534_v31, %v526_v30  ;;  %v554_v41 = vld [vmem:[%s523_s16 + $0x20] sm:$0xff]  ;;  %v564_v45 = vadd.f32 %v556_v42, %v548_v32  ;;  %v552_v47 = vld [vmem:[%s523_s16 + $0x10] sm:$0xff]  ;;  %v535_v50 = vld [vmem:[%s1238_s11 + $0x8] sm:$0xff] }
  0x57   : > { %v550_v43 = vld [vmem:[%s523_s16] sm:$0xff]  ;;  %v562_v44 = vadd.f32 %v554_v41, %v546_v28  ;;  %v560_v48 = vadd.f32 %v552_v47, %v544_v37  ;;  %v529_v53 = vld [vmem:[%s1234_s10 + $0x18] sm:$0xff]  ;;  %v555_v55 = vld [vmem:[%s523_s16 + $0x28] sm:$0xff]  ;;  %v543_v57 = vadd.f32 %v535_v50, %v527_v49  ;;  %s664_s10 = sadd.s32 %s856_s7, %s662_s29  ;;  %s978_s7 = scalar_lea.hbm %s1354_s5, 512 }
  0x58   : > { %v558_v46 = vadd.f32 %v550_v43, %v542_v33  ;;  %851 = vmatmul.msk.f32.vlgmr.msra.gmra.mxu3 %vm575_vm0, %v564_v45  ;;  %v537_v54 = vld [vmem:[%s1238_s11 + $0x18] sm:$0xff]  ;;  %v551_v59 = vld [vmem:[%s523_s16 + $0x8] sm:$0xff]  ;;  %v563_v61 = vadd.f32 %v555_v55, %v547_v51  ;;  %v567_v1 = vld [vmem:[%s1268_s28] sm:$0xff]  ;;  %s1275_s11 = scalar_lea.vmem [#allocation5], %s1230_s30  ;;  %s857_s21 = sshll.u32 %s664_s10, 3 }
  0x59   : > { %849 = vmatmul.msk.f32.vlgmr.msra.gmra.mxu2 %vm575_vm0, %v562_v44  ;;  %847 = vmatmul.msk.f32.vlgmr.msra.gmra.mxu1 %vm575_vm0, %v560_v48  ;;  %v557_v56 = vld [vmem:[%s523_s16 + $0x38] sm:$0xff]  ;;  %v545_v58 = vadd.f32 %v537_v54, %v529_v53  ;;  %v559_v63 = vadd.f32 %v551_v59, %v543_v57  ;;  %v569_v2 = vld [vmem:[%s1268_s28 + $0x10] sm:$0xff]  ;;  %v571_v7 = vld [vmem:[%s1268_s28 + $0x20] sm:$0xff]  ;;  %s666_s30 = scalar_lea.hbm %s1354_s5, %s857_s21  ;;  %s667_s13 = sshll.u32 %s1275_s11, 4  ;;  %s668_s13 = int_to_ptr.vmem [resolvable:$true] %s667_s13 }
  0x5a   : > { %845 = vmatmul.msk.f32.vlgmr.msra.gmra.mxu0 %vm575_vm0, %v558_v46  ;;  %v553_v60 = vld [vmem:[%s523_s16 + $0x18] sm:$0xff]  ;;  %v565_v62 = vadd.f32 %v557_v56, %v549_v52  ;;  %v573_v8 = vld [vmem:[%s1268_s28 + $0x30] sm:$0xff]  ;;  %v568_v13 = vld [vmem:[%s1268_s28 + $0x8] sm:$0xff]  ;;  %s669_s14 = sshll.u32 %s666_s30, 4  ;;  %s670_s14 = int_to_ptr.hbm [resolvable:$true] %s669_s14 }
  0x5b   : > { %v561_v0 = vadd.f32 %v553_v60, %v545_v58  ;;  %v570_v14 = vld [vmem:[%s1268_s28 + $0x18] sm:$0xff]  ;;  %v572_v19 = vld [vmem:[%s1268_s28 + $0x28] sm:$0xff]  ;;  %s972_s16 = sshra.s32 %s670_s14, 4  ;;  %s973_s16 = int_to_ptr.hbm [resolvable:$true] %s972_s16 }
  0x5c   : > { %v574_v20 = vld [vmem:[%s1268_s28 + $0x38] sm:$0xff]  ;;  %s974_s8 = scalar_lea.hbm %s973_s16, 64  ;;  %p979_p7 = scmp.lt.s32.totalorder %s973_s16, %s1354_s5 }
  0x5d   : > { %p975_p3 = scmp.ne.s32.totalorder %s973_s16, %s974_s8  ;;  %p980_p8 = scmp.lt.s32.totalorder %s978_s7, %s974_s8 }
  0x5f   : > { %p976_p4 = pnand %p975_p3, %p1171_p6  ;;  %p981_p9 = por %p980_p8, %p979_p7 }
  0x60   : > { %852 = vmatmul.msk.f32.gmra.mxu3 %vm575_vm0, %v565_v62 }
  0x61   : > { %850 = vmatmul.msk.f32.gmra.mxu2 %vm575_vm0, %v563_v61  ;;  %848 = vmatmul.msk.f32.gmra.mxu1 %vm575_vm0, %v561_v0  ;;  %p977_p5 = pneg %p976_p4 }
  0x62   : > { %846 = vmatmul.msk.f32.gmra.mxu0 %vm575_vm0, %v559_v63 }
  0x63   : > { %p982_p11 = pnand %p981_p9, %p977_p5 }
  0xd6   : > { %v623_v4 = vpop.f32.mrf.mxu1 }
  0xd7   : > { %v617_v3 = vpop.f32.mrf.mxu0  ;;  %v624_v6 = vadd.f32 %v623_v4, %v569_v2 }
  0xd8   : > { %v618_v5 = vadd.f32 %v617_v3, %v567_v1 }
  0xd9   : > { %644 = vst.msk [vmem:[%s1275_s11 + $0x10] sm:$0xff] %vm641_vm1, %v624_v6 }
  0xda   : > { %642 = vst.msk [vmem:[%s1275_s11] sm:$0xff] %vm641_vm1, %v618_v5 }
  0xdb   : > { %v635_v10 = vpop.f32.mrf.mxu3 }
  0xdc   : > { %v629_v9 = vpop.f32.mrf.mxu2  ;;  %v636_v12 = vadd.f32 %v635_v10, %v573_v8 }
  0xdd   : > { %v630_v11 = vadd.f32 %v629_v9, %v571_v7 }
  0xde   : > { %v626_v16 = vpop.f32.mrf.mxu1  ;;  %648 = vst.msk [vmem:[%s1275_s11 + $0x30] sm:$0xff] %vm641_vm1, %v636_v12 }
  0xdf   : > { %646 = vst.msk [vmem:[%s1275_s11 + $0x20] sm:$0xff] %vm641_vm1, %v630_v11  ;;  %v620_v15 = vpop.f32.mrf.mxu0  ;;  %v627_v18 = vadd.f32 %v626_v16, %v570_v14 }
  0xe0   : > { %v621_v17 = vadd.f32 %v620_v15, %v568_v13 }
  0xe1   : > { %645 = vst.msk [vmem:[%s1275_s11 + $0x18] sm:$0xff] %vm641_vm1, %v627_v18 }
  0xe2   : > { %643 = vst.msk [vmem:[%s1275_s11 + $0x8] sm:$0xff] %vm641_vm1, %v621_v17 }
  0xe3   : > { %v638_v22 = vpop.f32.mrf.mxu3 }
  0xe4   : > { %v632_v21 = vpop.f32.mrf.mxu2  ;;  %v639_v24 = vadd.f32 %v638_v22, %v574_v20 }
  0xe5   : > { %v633_v23 = vadd.f32 %v632_v21, %v572_v19 }
  0xe6   : > { %649 = vst.msk [vmem:[%s1275_s11 + $0x38] sm:$0xff] %vm641_vm1, %v639_v24 }
  0xe7   : > { %647 = vst.msk [vmem:[%s1275_s11 + $0x28] sm:$0xff] %vm641_vm1, %v633_v23 }
  0xe8   : > { %985 = shalt.err (!%p982_p11)
}
  0xe9   : > { %s1070_s6 = smov 128   ;;  %s1071_s11 = smov 256  }
  0xea   : > { %s1072_s22 = smov 8  }
  0xeb   : > { %868 = dma.vmem_to_hbm [thread:$0]  (%p1171_p6), %s668_s13, 1024, %s670_s14, %s651_s15, %s1070_s6, %s1071_s11, %s1072_s22  }
  0xec PF: > { %p874_p12 = scmp.ge.s32.totalorder %s1068_s27, 2  ;;  %s684_s23 = sand.u32 1, %s1032_s18  }
  0xed   : > { %s685_s30 = scalar_lea.sflag [#allocation6], %s684_s23 }
  0xee   : > { %p871_p13 = pnand %p874_p12, %p1183_p10 }
  0xf0   : > { %p872_p0 = pneg %p871_p13 }
  0xf2   : > { %1027 = dma.done.wait (%p872_p0), %s685_s30, 1024  }
  0xf3   : > { %1029 = vsyncadd (%p872_p0), %s685_s30, 4294966272  ;;  %s18_s27 = sadd.s32 1, %s1068_s27   ;;  %s1364_s9 = sld [smem:[#allocation8_spill]] }
  0xf4   : > { %p15_p1 = scmp.ge.s32.totalorder %s18_s27, 10   ;;  %s1365_s13 = sld [smem:[#allocation9_spill]] }
  0xf5   : > { %s1366_s14 = sld [smem:[#allocation10_spill]]  ;;  %s1367_s18 = smov %s1036_s19 }
  0xf6   : > { %s1368_s19 = smov %s1040_s20  ;;  %s1369_s20 = smov %s1191_s17 }
  0xf7   : > { %s1370_s21 = smov %s1056_s24  ;;  %s1371_s22 = smov %s1060_s25 }
  0xf8   : > { %s1372_s23 = smov %s1064_s26  ;;  %17 = sbr.rel (!%p15_p1) target bundleno = 6 (0x6), region = 213 }
  0xf9   : > { %s1373_s24 = smov %s1364_s9 }
  0xfa   : > { %s1374_s25 = smov %s1365_s13 }
  0xfb   : > { %s1375_s26 = smov %s1366_s14 }
  0xfd   :  { %691 = vsyncpa [#allocation6], 1 }
  0xfe   :  { %693 = vsyncpa [#allocation6 + $0x1], 1 }

// kernel: ffc_forward.5
= control target key start
LH: loop header
LB: loop body
LE: loop exit
PB: predicated region body
PF: predicated region fallthrough
CT: control target
= control target key end

     0   :  { %s1814_s15 = smov 0   ;;  %s1816_s16 = smov 0   ;;  %s2603_s0 = inlined_call_operand.vmem [shape: f32[2,16,16,32], index: 0, kind: input, shape index: {}, may-alias: {0,1,2}]   ;;  %s2604_s1 = inlined_call_operand.vmem [shape: f32[2,16,16,32], index: 1, kind: input, shape index: {}, may-alias: {0,1,2}]   ;;  %s2605_s2 = inlined_call_operand.vmem [shape: f32[2,16,16,32], index: 2, kind: input, shape index: {}, may-alias: {0,1,2}]   ;;  %s2606_s3 = inlined_call_operand.vmem [shape: f32[288,32], index: 3, kind: input, shape index: {}]   ;;  %s2607_s4 = inlined_call_operand.vmem [shape: f32[2,256,32], index: 4, kind: output, shape index: {}]  }
   0x1   :  { %s1818_s17 = smov 0   ;;  %s1820_s18 = smov 0  }
   0x2   :  { %s1822_s19 = smov 0  }
   0x3 LB: > { %s23_s20 = sadd.s32 1, %s1776_s17  ;;  %s26_s21 = sadd.s32 1, %s1780_s18  ;;  %s1784_s19 = sphi %s1822_s19, %s14_s19   ;;  %s1780_s18 = sphi %s1820_s18, %s2612_s18   ;;  %s1776_s17 = sphi %s1818_s17, %s2611_s17   ;;  %s1772_s16 = sphi %s1816_s16, %s2610_s16   ;;  %s1768_s15 = sphi %s1814_s15, %s2609_s15  }
   0x4   : > { %p24_p0 = scmp.ge.s32.totalorder %s23_s20, 2  ;;  %p1626_p1 = scmp.ge.s32.totalorder %s1784_s19, 1 }
   0x5   : > { %p244_p2 = scmp.lt.s32.totalorder %s1784_s19, 5 }
   0x6   : > { %s2614_s20 = smov (%p24_p0, %s23_s20), 0  ;;  %s2616_s21 = smov (!%p24_p0, %s26_s21), %s1780_s18 }
   0x7   : > { %p245_p3 = pnand %p1626_p1, %p244_p2  ;;  %p28_p4 = scmp.ge.s32.totalorder %s2616_s21, 2 }
   0x8   : > { %s1627_s22 = sshll.u32 (!%p245_p3), %s1768_s15, 3  ;;  %p306_p5 = scmp.lt.s32.totalorder (!%p245_p3), %s1772_s16, 1 }
   0x9   : > { %s2618_s21 = smov (%p28_p4, %s2616_s21), 0  ;;  %248 = sbr.rel (%p245_p3) target bundleno = 572 (0x23c), region = 36 }
   0xa   : > { %p308_p6 = scmp.lt.s32.totalorder (!%p245_p3), %s1627_s22, 15  ;;  %s1631_s23 = sadd.s32 (!%p245_p3), 4294967295, %s1768_s15 }
   0xb   : > { %p317_p7 = scmp.gt.s32.totalorder (!%p245_p3), %s1631_s23, 0  ;;  %s333_s26 = sadd.s32 (!%p245_p3), 1, %s1768_s15 }
   0xc   : > { %p334_p8 = scmp.lt.s32.totalorder (!%p245_p3), %s333_s26, 1  ;;  %s1640_s8 = sshll.u32 (!%p245_p3), %s1768_s15, 4 }
   0xd   : > { %p1873_p11 = scmp.lt.s32.totalorder (!%p245_p3), %s1640_s8, 31  ;;  %p1643_p12 = scmp.ne.s32.totalorder (!%p245_p3), %s1768_s15, 0 }
   0xe   : > { %s2620_s16 = smov (!%p306_p5, %s1772_s16), 1  ;;  %s2622_s22 = smov (!%p308_p6, %s1627_s22), 15  ;;  %vm377_vm0 = vcmask 261120  }
   0xf   : > { %s1848_s24 = sshll.u32 %s2620_s16, 5  ;;  %s1628_s25 = sshll.u32 %s2622_s22, 1 }
  0x10   : > { %s312_s27 = sadd.s32 %s1848_s24, %s1628_s25  ;;  %s2624_s23 = smov (!%p317_p7, %s1631_s23), 0 }
  0x11   : > { %s1630_s28 = sshll.u32 %s312_s27, 3  ;;  %s2626_s26 = smov (!%p334_p8, %s333_s26), 1 }
  0x12   : > { %s1855_s5 = scalar_lea.vmem %s2603_s0, %s1630_s28  ;;  %s1632_s6 = sshll.u32 %s2624_s23, 3 }
  0x13   : > { %v360_v0 = vld [vmem:[%s1855_s5] sm:$0xff]  ;;  %v361_v1 = vld [vmem:[%s1855_s5 + $0x8] sm:$0xff]  ;;  %v362_v2 = vld [vmem:[%s1855_s5 + $0x10] sm:$0xff]  ;;  %p322_p9 = scmp.lt.s32.totalorder %s1632_s6, 15  ;;  %s1636_s7 = sshll.u32 %s2626_s26, 3 }
  0x14   : > { %378 = vst.msk [vmem:[#allocation2 + $0x19] sm:$0xff] %vm377_vm0, %v360_v0  ;;  %v363_v3 = vld [vmem:[%s1855_s5 + $0x18] sm:$0xff]  ;;  %v364_v4 = vld [vmem:[%s1855_s5 + $0x20] sm:$0xff]  ;;  %v365_v5 = vld [vmem:[%s1855_s5 + $0x28] sm:$0xff]  ;;  %p339_p10 = scmp.lt.s32.totalorder %s1636_s7, 15  ;;  %s2632_s8 = smov (!%p1873_p11, %s1640_s8), 31 }
  0x15   : > { %379 = vst.msk [vmem:[#allocation2 + $0x21] sm:$0xff] %vm377_vm0, %v361_v1  ;;  %v366_v6 = vld [vmem:[%s1855_s5 + $0x30] sm:$0xff]  ;;  %s2628_s6 = smov (!%p322_p9, %s1632_s6), 15  ;;  %v367_v7 = vld [vmem:[%s1855_s5 + $0x38] sm:$0xff]  ;;  %v368_v8 = vld [vmem:[%s1855_s5 + $0x40] sm:$0xff]  ;;  %s356_s29 = sadd.s32 %s1848_s24, %s2632_s8 }
  0x16   : > { %380 = vst.msk [vmem:[#allocation2 + $0x31] sm:$0xff] %vm377_vm0, %v362_v2  ;;  %s2630_s7 = smov (!%p339_p10, %s1636_s7), 15  ;;  %s1633_s9 = sshll.u32 %s2628_s6, 1  ;;  %v369_v9 = vld [vmem:[%s1855_s5 + $0x48] sm:$0xff]  ;;  %v370_v10 = vld [vmem:[%s1855_s5 + $0x50] sm:$0xff]  ;;  %v371_v11 = vld [vmem:[%s1855_s5 + $0x58] sm:$0xff] }
  0x17   : > { %381 = vst.msk [vmem:[#allocation2 + $0x39] sm:$0xff] %vm377_vm0, %v363_v3  ;;  %s326_s11 = sadd.s32 %s1633_s9, %s1848_s24  ;;  %s1637_s12 = sshll.u32 %s2630_s7, 1  ;;  %v372_v12 = vld [vmem:[%s1855_s5 + $0x60] sm:$0xff]  ;;  %v373_v13 = vld [vmem:[%s1855_s5 + $0x68] sm:$0xff]  ;;  %v374_v14 = vld [vmem:[%s1855_s5 + $0x70] sm:$0xff] }
  0x18   : > { %382 = vst.msk [vmem:[#allocation2 + $0x49] sm:$0xff] %vm377_vm0, %v364_v4  ;;  %s1635_s13 = sshll.u32 %s326_s11, 3  ;;  %s343_s14 = sadd.s32 %s1637_s12, %s1848_s24  ;;  %v375_v15 = vld [vmem:[%s1855_s5 + $0x78] sm:$0xff] }
  0x19   : > { %383 = vst.msk [vmem:[#allocation2 + $0x51] sm:$0xff] %vm377_vm0, %v365_v5  ;;  %s328_s23 = scalar_lea.vmem %s2604_s1, %s1635_s13  ;;  %s1639_s25 = sshll.u32 %s343_s14, 3 }
  0x1a   : > { %384 = vst.msk [vmem:[#allocation2 + $0x61] sm:$0xff] %vm377_vm0, %v366_v6  ;;  %s1893_s28 = scalar_lea.vmem %s2605_s2, %s1639_s25  ;;  %s1642_s30 = sshll.u32 %s356_s29, 3 }
  0x1b   : > { %385 = vst.msk [vmem:[#allocation2 + $0x69] sm:$0xff] %vm377_vm0, %v367_v7  ;;  %s1909_s9 = scalar_lea.vmem %s2607_s4, %s1642_s30 }
  0x1c   : > { %386 = vst.msk [vmem:[#allocation2 + $0x79] sm:$0xff] %vm377_vm0, %v368_v8 }
  0x1d   : > { %387 = vst.msk [vmem:[#allocation2 + $0x81] sm:$0xff] %vm377_vm0, %v369_v9 }
  0x1e   : > { %388 = vst.msk [vmem:[#allocation2 + $0x91] sm:$0xff] %vm377_vm0, %v370_v10 }
  0x1f   : > { %389 = vst.msk [vmem:[#allocation2 + $0x99] sm:$0xff] %vm377_vm0, %v371_v11  ;;  %397 = sbr.rel (%p1643_p12) target bundleno = 38 (0x26), region = 40 }
  0x20   : > { %390 = vst.msk [vmem:[#allocation2 + $0xa9] sm:$0xff] %vm377_vm0, %v372_v12 }
  0x21   : > { %391 = vst.msk [vmem:[#allocation2 + $0xb1] sm:$0xff] %vm377_vm0, %v373_v13 }
  0x22   : > { %392 = vst.msk [vmem:[#allocation2 + $0xc1] sm:$0xff] %vm377_vm0, %v374_v14 }
  0x23   : > { %393 = vst.msk [vmem:[#allocation2 + $0xc9] sm:$0xff] %vm377_vm0, %v375_v15 }
  0x24   : > { %398 = vst.msk [vmem:[#allocation2 + $0x1] sm:$0xff] %vm377_vm0, %v362_v2 }
  0x25   : > { %399 = vst.msk [vmem:[#allocation2 + $0x9] sm:$0xff] %vm377_vm0, %v363_v3 }
  0x26 PF: > { %p1644_p13 = scmp.le.s32.totalorder %s1768_s15, 0 }
  0x28   : > { %403 = sbr.rel (%p1644_p13) target bundleno = 48 (0x30), region = 44 }
  0x2d   : > { %v1645_v16 = vld [vmem:[%s328_s23 + $0x70] sm:$0xff]  ;;  %v1646_v17 = vld [vmem:[%s328_s23 + $0x78] sm:$0xff] }
  0x2e   : > { %407 = vst.msk [vmem:[#allocation2 + $0x1] sm:$0xff] %vm377_vm0, %v1645_v16 }
  0x2f   : > { %408 = vst.msk [vmem:[#allocation2 + $0x9] sm:$0xff] %vm377_vm0, %v1646_v17 }
  0x30 PF: > { %p1647_p0 = scmp.ne.s32.totalorder %s1768_s15, 1 }
  0x32   : > { %412 = sbr.rel (%p1647_p0) target bundleno = 57 (0x39), region = 48 }
  0x37   : > { %414 = vst.msk [vmem:[#allocation2 + $0xd9] sm:$0xff] %vm377_vm0, %v372_v12 }
  0x38   : > { %415 = vst.msk [vmem:[#allocation2 + $0xe1] sm:$0xff] %vm377_vm0, %v373_v13 }
  0x39 PF: > { %p1648_p1 = scmp.ge.s32.totalorder %s1768_s15, 1 }
  0x3b   : > { %419 = sbr.rel (%p1648_p1) target bundleno = 67 (0x43), region = 52 }
  0x40   : > { %v420_v18 = vld [vmem:[%s1893_s28] sm:$0xff]  ;;  %v421_v19 = vld [vmem:[%s1893_s28 + $0x8] sm:$0xff] }
  0x41   : > { %423 = vst.msk [vmem:[#allocation2 + $0xd9] sm:$0xff] %vm377_vm0, %v420_v18 }
  0x42   : > { %424 = vst.msk [vmem:[#allocation2 + $0xe1] sm:$0xff] %vm377_vm0, %v421_v19 }
  0x43 PF: > { %v500_v20 = vld [vmem:[#allocation2 + $0x19] sm:$0xff]  ;;  %v498_v21 = vld [vmem:[#allocation2 + $0x1] sm:$0xff]  ;;  %vm435_vm1 = vcmask 253952   ;;  %s1786_s24 = smov 32   ;;  %v427_v23 = vld [vmem:[#allocation2 + $0x32] sm:$0x1] }
  0x44   : > { %534 = vrot.lane.b32.xlu1 %v500_v20, %s1786_s24  ;;  %530 = vrot.lane.b32.xlu0 %v498_v21, %s1786_s24  ;;  %v501_v22 = vld [vmem:[#allocation2 + $0x21] sm:$0xff]  ;;  %805 = vst.msk [vmem:[#allocation3 + $0x8] sm:$0xff] %vm377_vm0, %v500_v20  ;;  %v426_v24 = vld [vmem:[#allocation2 + $0x1a] sm:$0x1]  ;;  %v502_v25 = vld [vmem:[#allocation2 + $0x31] sm:$0xff]  ;;  %s1787_s15 = smov 64  }
  0x45   : > { %806 = vst.msk [vmem:[#allocation3 + $0x20] sm:$0xff] %vm377_vm0, %v501_v22  ;;  %538 = vrot.lane.b32.xlu2 %v502_v25, %s1786_s24  ;;  %v447_v26 = vld [vmem:[#allocation2 + $0x27] sm:$0x1]  ;;  %v446_v27 = vld [vmem:[#allocation2 + $0xf] sm:$0x1]  ;;  %v503_v30 = vld [vmem:[#allocation2 + $0x39] sm:$0xff] }
  0x46   : > { %438 = vst.msk [vmem:[#allocation2 + $0x30] sm:$0x1] %vm435_vm1, %v427_v23  ;;  %v499_v28 = vld [vmem:[#allocation2 + $0x9] sm:$0xff]  ;;  %v693_v29 = vld [vmem:[#allocation2 + $0x20] sm:$0xff]  ;;  %v448_v39 = vld [vmem:[#allocation2 + $0x3f] sm:$0x1] }
  0x47   : > { %437 = vst.msk [vmem:[#allocation2 + $0x18] sm:$0x1] %vm435_vm1, %v426_v24  ;;  %v428_v31 = vld [vmem:[#allocation2 + $0x4a] sm:$0x1]  ;;  %v821_v35 = vld [vmem:[#allocation2 + $0x1a] sm:$0xff]  ;;  %v595_v36 = vld [vmem:[#allocation2 + $0x2] sm:$0xff] }
  0x48   : > { %457 = vst.msk [vmem:[#allocation2 + $0x29] sm:$0x1] %vm435_vm1, %v447_v26  ;;  %v504_v34 = vld [vmem:[#allocation2 + $0x49] sm:$0xff]  ;;  %s1788_s5 = smov 96   ;;  %v919_v40 = vld [vmem:[#allocation2 + $0x38] sm:$0xff]  ;;  %v2012_v54 = vld [vmem:[#allocation2 + $0x61] sm:$0xff] }
  0x49   : > { %456 = vst.msk [vmem:[#allocation2 + $0x11] sm:$0x1] %vm435_vm1, %v446_v27  ;;  %v432_v38 = vld [vmem:[#allocation2 + $0xaa] sm:$0x1]  ;;  %v1962_v44 = vld [vmem:[#allocation2 + $0x32] sm:$0xff]  ;;  %vm578_vm2 = vcmask 523520  }
  0x4a   : > { %485 = vst.msk [vmem:[#allocation3 + $0x48] sm:$0xff] %vm377_vm0, %v693_v29  ;;  %v1971_v46 = vld [vmem:[#allocation2 + $0x50] sm:$0xff]  ;;  %v452_v47 = vld [vmem:[#allocation2 + $0x9f] sm:$0x1]  ;;  %v433_v52 = vld [vmem:[#allocation2 + $0xc2] sm:$0x1] }
  0x4b   : > { %807 = vst.msk [vmem:[#allocation3 + $0x38] sm:$0xff] %vm377_vm0, %v502_v25  ;;  %v1987_v49 = vld [vmem:[#allocation2 + $0x4a] sm:$0xff]  ;;  %v1991_v50 = vld [vmem:[#allocation2 + $0x92] sm:$0xff]  ;;  %v429_v56 = vld [vmem:[#allocation2 + $0x62] sm:$0x1]  ;;  %vm675_vm3 = vcmask 785920  }
  0x4c   : > { %536 = vrot.lane.b32.xlu1 %v501_v22, %s1786_s24  ;;  %532 = vrot.lane.b32.xlu0 %v499_v28, %s1786_s24  ;;  %439 = vst.msk [vmem:[#allocation2 + $0x48] sm:$0x1] %vm435_vm1, %v428_v31  ;;  %v1998_v51 = vld [vmem:[#allocation2 + $0x91] sm:$0xff]  ;;  %v425_v57 = vld [vmem:[#allocation2 + $0x2] sm:$0x1]  ;;  %v2034_v59 = vld [vmem:[#allocation2 + $0x99] sm:$0xff] }
  0x4d   : > { %v918_v32 = vld [vmem:[#allocation2 + $0x30] sm:$0xff]  ;;  %808 = vst.msk [vmem:[#allocation3 + $0x50] sm:$0xff] %vm377_vm0, %v503_v30  ;;  %540 = vrot.lane.b32.xlu2 %v503_v30, %s1786_s24  ;;  %v1205_v61 = vld [vmem:[%s2606_s3 + $0x78] sm:$0xff]  ;;  %v1203_v4 = vld [vmem:[%s2606_s3 + $0x68] sm:$0xff]  ;;  %vm772_vm4 = vcmask 1048320  }
  0x4e   : > { %v692_v33 = vld [vmem:[#allocation2 + $0x18] sm:$0xff]  ;;  %486 = vst.msk [vmem:[#allocation3 + $0x60] sm:$0xff] %vm377_vm0, %v918_v32  ;;  %v2017_v55 = vld [vmem:[#allocation2 + $0xaa] sm:$0xff]  ;;  %1274 = vmatpush.msra.mxu0 %v1205_v61  ;;  %1667 = vmatpush.msra.mxu3 %v1205_v61  ;;  %v449_v6 = vld [vmem:[#allocation2 + $0x57] sm:$0x1] }
  0x4f   : > { %484 = vst.msk [vmem:[#allocation3 + $0x30] sm:$0xff] %vm377_vm0, %v692_v33  ;;  %v822_v41 = vld [vmem:[#allocation2 + $0x22] sm:$0xff]  ;;  %v2009_v53 = vld [vmem:[#allocation2 + $0x51] sm:$0xff]  ;;  %v430_v19 = vld [vmem:[#allocation2 + $0x7a] sm:$0x1] }
  0x50   : > { %809 = vst.msk [vmem:[#allocation3 + $0x68] sm:$0xff] %vm377_vm0, %v504_v34  ;;  %v596_v42 = vld [vmem:[#allocation2 + $0xa] sm:$0xff]  ;;  %v2049_v62 = vld [vmem:[%s2606_s3 + $0xf8] sm:$0xff]  ;;  %v1202_v9 = vld [vmem:[%s2606_s3 + $0x60] sm:$0xff] }
  0x51   : > { %443 = vst.msk [vmem:[#allocation2 + $0xa8] sm:$0x1] %vm435_vm1, %v432_v38  ;;  %v2029_v58 = vld [vmem:[#allocation2 + $0xb0] sm:$0xff]  ;;  %1339 = vmatpush.msra.mxu1 %v2049_v62  ;;  %v2079_v5 = vld [vmem:[%s2606_s3 + $0xe8] sm:$0xff]  ;;  %v2096_v10 = vld [vmem:[%s2606_s3 + $0xe0] sm:$0xff] }
  0x52   : > { %458 = vst.msk [vmem:[#allocation2 + $0x41] sm:$0x1] %vm435_vm1, %v448_v39  ;;  %v1204_v63 = vld [vmem:[%s2606_s3 + $0x70] sm:$0xff]  ;;  %v467_v7 = vld [vmem:[#allocation2 + $0x8] sm:$0xff]  ;;  %v1201_v12 = vld [vmem:[%s2606_s3 + $0x58] sm:$0xff] }
  0x53   : > { %v1945_v37 = vld [vmem:[#allocation2 + $0x48] sm:$0xff]  ;;  %487 = vst.msk [vmem:[#allocation3 + $0x78] sm:$0xff] %vm377_vm0, %v919_v40  ;;  %v2058_v0 = vld [vmem:[%s2606_s3 + $0xf0] sm:$0xff]  ;;  %1275 = vmatpush.msra.mxu0 %v1204_v63  ;;  %1668 = vmatpush.msra.mxu3 %v1204_v63  ;;  %v2105_v13 = vld [vmem:[%s2606_s3 + $0xd8] sm:$0xff] }
  0x54   : > { %853 = vrot.lane.b32.xlu1 %v821_v35, %s1786_s24  ;;  %542 = vrot.lane.b32.xlu0 %v504_v34, %s1786_s24  ;;  %488 = vst.msk [vmem:[#allocation3 + $0x90] sm:$0xff] %vm377_vm0, %v1945_v37  ;;  %v2060_v1 = vld [vmem:[#allocation2 + $0x69] sm:$0xff]  ;;  %v2071_v3 = vld [vmem:[#allocation2 + $0xb1] sm:$0xff]  ;;  %v1198_v21 = vld [vmem:[%s2606_s3 + $0x40] sm:$0xff] }
  0x55   : > { %627 = vrot.lane.b32.xlu2 %v595_v36, %s1787_s15  ;;  %1126 = vst.msk [vmem:[#allocation3 + $0x10] sm:$0xff] %vm377_vm0, %v1962_v44  ;;  %1340 = vmatpush.msra.mxu1 %v2058_v0  ;;  %v2087_v8 = vld [vmem:[#allocation2 + $0xa9] sm:$0xff]  ;;  %v2148_v22 = vld [vmem:[%s2606_s3 + $0xc0] sm:$0xff]  ;;  %v1197_v24 = vld [vmem:[%s2606_s3 + $0x38] sm:$0xff] }
  0x56   : > { %489 = vst.msk [vmem:[#allocation3 + $0xa8] sm:$0xff] %vm377_vm0, %v1971_v46  ;;  %1276 = vmatpush.msra.mxu0 %v1203_v4  ;;  %1669 = vmatpush.msra.mxu3 %v1203_v4  ;;  %v1200_v14 = vld [vmem:[%s2606_s3 + $0x50] sm:$0xff]  ;;  %v1199_v16 = vld [vmem:[%s2606_s3 + $0x48] sm:$0xff]  ;;  %v2189_v31 = vld [vmem:[%s2606_s3 + $0x118] sm:$0xff] }
  0x57   : > { %462 = vst.msk [vmem:[#allocation2 + $0xa1] sm:$0x1] %vm435_vm1, %v452_v47  ;;  %1341 = vmatpush.msra.mxu1 %v2079_v5  ;;  %v2117_v15 = vld [vmem:[%s2606_s3 + $0xd0] sm:$0xff]  ;;  %v2129_v17 = vld [vmem:[%s2606_s3 + $0xc8] sm:$0xff]  ;;  %1416 = vmatpush.msra.mxu2 %v2189_v31  ;;  %v1193_v39 = vld [vmem:[%s2606_s3 + $0x18] sm:$0xff] }
  0x58   : > { %v1958_v43 = vld [vmem:[#allocation2 + $0xa8] sm:$0xff]  ;;  %1128 = vst.msk [vmem:[#allocation3 + $0x40] sm:$0xff] %vm377_vm0, %v1987_v49  ;;  %1277 = vmatpush.msra.mxu0 %v1202_v9  ;;  %1670 = vmatpush.msra.mxu3 %v1202_v9  ;;  %v1196_v27 = vld [vmem:[%s2606_s3 + $0x30] sm:$0xff]  ;;  %v2243_v47 = vld [vmem:[%s2606_s3 + $0x100] sm:$0xff] }
  0x59   : > { %496 = vst.msk [vmem:[#allocation3 + $0x150] sm:$0xff] %vm377_vm0, %v1958_v43  ;;  %v1966_v45 = vld [vmem:[#allocation2 + $0x3a] sm:$0xff]  ;;  %1342 = vmatpush.msra.mxu1 %v2096_v10  ;;  %v2131_v18 = vld [vmem:[#allocation2 + $0x62] sm:$0xff]  ;;  %v2170_v28 = vld [vmem:[%s2606_s3 + $0xb0] sm:$0xff] }
  0x5a   : > { %1127 = vst.msk [vmem:[#allocation3 + $0x28] sm:$0xff] %vm377_vm0, %v1966_v45  ;;  %1278 = vmatpush.msra.mxu0 %v1201_v12  ;;  %1671 = vmatpush.msra.mxu3 %v1201_v12  ;;  %v2209_v36 = vld [vmem:[%s2606_s3 + $0x110] sm:$0xff]  ;;  %v2270_v4 = vld [vmem:[%s2606_s3 + $0x80] sm:$0xff] }
  0x5b   : > { %1134 = vst.msk [vmem:[#allocation3 + $0xd0] sm:$0xff] %vm377_vm0, %v1991_v50  ;;  %1343 = vmatpush.msra.mxu1 %v2105_v13  ;;  %1417 = vmatpush.msra.mxu2 %v2209_v36 }
  0x5c   : > { %950 = vrot.lane.b32.xlu0 %v918_v32, %s1787_s15  ;;  %724 = vrot.lane.b32.xlu1 %v692_v33, %s1788_s5  ;;  %444 = vst.msk [vmem:[#allocation2 + $0xc0] sm:$0x1] %vm435_vm1, %v433_v52  ;;  %v1144_v52 = vld [vmem:[#allocation3 + $0x10] sm:$0xff] }
  0x5d   : > { %1046 = vrot.lane.b32.xlu2 %v502_v25, %s1788_s5  ;;  %810 = vst.msk [vmem:[#allocation3 + $0x80] sm:$0xff] %vm377_vm0, %v2009_v53  ;;  %1279 = vmatpush.msra.mxu0 %v1200_v14  ;;  %v2158_v25 = vld [vmem:[%s2606_s3 + $0xb8] sm:$0xff] }
  0x5e   : > { %v1982_v48 = vld [vmem:[#allocation2 + $0x9a] sm:$0xff]  ;;  %811 = vst.msk [vmem:[#allocation3 + $0x98] sm:$0xff] %vm377_vm0, %v2012_v54  ;;  %1344 = vmatpush.msra.mxu1 %v2117_v15  ;;  %1672 = vmatpush.msra.mxu3 %v1200_v14 }
  0x5f   : > { %1135 = vst.msk [vmem:[#allocation3 + $0xe8] sm:$0xff] %vm377_vm0, %v1982_v48  ;;  %1280 = vmatpush.msra.mxu0 %v1199_v16 }
  0x60   : > { %1136 = vst.msk [vmem:[#allocation3 + $0x100] sm:$0xff] %vm377_vm0, %v2017_v55  ;;  %1345 = vmatpush.msra.mxu1 %v2129_v17  ;;  %1673 = vmatpush.msra.mxu3 %v1199_v16  ;;  %v2292_v16 = vld [vmem:[#allocation2 + $0x80] sm:$0xff] }
  0x61   : > { %440 = vst.msk [vmem:[#allocation2 + $0x60] sm:$0x1] %vm435_vm1, %v429_v56  ;;  %1281 = vmatpush.msra.mxu0 %v1198_v21  ;;  %v1191_v56 = vld [vmem:[%s2606_s3 + $0x8] sm:$0xff]  ;;  %v1147_v14 = vld [vmem:[#allocation3 + $0x28] sm:$0xff] }
  0x62   : > { %436 = vst.msk [vmem:[#allocation2] sm:$0x1] %vm435_vm1, %v425_v57  ;;  %1346 = vmatpush.msra.mxu1 %v2148_v22  ;;  %1674 = vmatpush.msra.mxu3 %v1198_v21  ;;  %v2256_v57 = vld [vmem:[%s2606_s3 + $0x88] sm:$0xff]  ;;  %v2303_v21 = vld [vmem:[#allocation2 + $0x79] sm:$0xff] }
  0x63   : > { %497 = vst.msk [vmem:[#allocation3 + $0x168] sm:$0xff] %vm377_vm0, %v2029_v58  ;;  %v2160_v26 = vld [vmem:[#allocation2 + $0xc0] sm:$0xff]  ;;  %1282 = vmatpush.msra.mxu0 %v1197_v24 }
  0x64   : > { %855 = vrot.lane.b32.xlu0 %v822_v41, %s1786_s24  ;;  %629 = vrot.lane.b32.xlu1 %v596_v42, %s1787_s15  ;;  %812 = vst.msk [vmem:[#allocation3 + $0xb0] sm:$0xff] %vm377_vm0, %v2060_v1  ;;  %v1192_v42 = vld [vmem:[%s2606_s3 + $0x10] sm:$0xff] }
  0x65   : > { %952 = vrot.lane.b32.xlu2 %v919_v40, %s1787_s15  ;;  %818 = vst.msk [vmem:[#allocation3 + $0x140] sm:$0xff] %vm377_vm0, %v2071_v3  ;;  %1347 = vmatpush.msra.mxu1 %v2158_v25 }
  0x66   : > { %459 = vst.msk [vmem:[#allocation2 + $0x59] sm:$0x1] %vm435_vm1, %v449_v6  ;;  %1283 = vmatpush.msra.mxu0 %v1196_v27  ;;  %1675 = vmatpush.msra.mxu3 %v1197_v24 }
  0x67   : > { %483 = vst.msk [vmem:[#allocation3 + $0x18] sm:$0xff] %vm377_vm0, %v467_v7  ;;  %1348 = vmatpush.msra.mxu1 %v2170_v28 }
  0x68   : > { %v2064_v2 = vld [vmem:[#allocation2 + $0x60] sm:$0xff]  ;;  %817 = vst.msk [vmem:[#allocation3 + $0x128] sm:$0xff] %vm377_vm0, %v2087_v8  ;;  %1676 = vmatpush.msra.mxu3 %v1196_v27  ;;  %v431_v27 = vld [vmem:[#allocation2 + $0x92] sm:$0x1] }
  0x69   : > { %v466_v60 = vld [vmem:[#allocation2] sm:$0xff]  ;;  %1130 = vst.msk [vmem:[#allocation3 + $0x70] sm:$0xff] %vm377_vm0, %v2131_v18 }
  0x6a   : > { %482 = vst.msk [vmem:[#allocation3] sm:$0xff] %vm377_vm0, %v466_v60  ;;  %v450_v60 = vld [vmem:[#allocation2 + $0x6f] sm:$0x1] }
  0x6b   : > { %441 = vst.msk [vmem:[#allocation2 + $0x78] sm:$0x1] %vm435_vm1, %v430_v19  ;;  %v2294_v19 = vld [vmem:[#allocation2 + $0xc8] sm:$0xff] }
  0x6c   : > { %726 = vrot.lane.b32.xlu0 %v693_v29, %s1788_s5  ;;  %1048 = vrot.lane.b32.xlu1 %v503_v30, %s1788_s5  ;;  %v1195_v29 = vld [vmem:[%s2606_s3 + $0x28] sm:$0xff]  ;;  %460 = vst.msk [vmem:[#allocation2 + $0x71] sm:$0x1] %vm435_vm1, %v450_v60 }
  0x6d   : > { %857 = vrot.lane.b32.xlu2 %v1962_v44, %s1786_s24  ;;  %v2138_v20 = vld [vmem:[#allocation2 + $0x52] sm:$0xff]  ;;  %v2183_v30 = vld [vmem:[%s2606_s3 + $0xa8] sm:$0xff]  ;;  %1284 = vmatpush.msra.mxu0 %v1195_v29  ;;  %493 = vst.msk [vmem:[#allocation3 + $0x108] sm:$0xff] %vm377_vm0, %v2292_v16 }
  0x6e   : > { %1129 = vst.msk [vmem:[#allocation3 + $0x58] sm:$0xff] %vm377_vm0, %v2138_v20  ;;  %1349 = vmatpush.msra.mxu1 %v2183_v30  ;;  %1677 = vmatpush.msra.mxu3 %v1195_v29 }
  0x6f   : > { %813 = vst.msk [vmem:[#allocation3 + $0xc8] sm:$0xff] %vm377_vm0, %v2303_v21 }
  0x70   : > { %442 = vst.msk [vmem:[#allocation2 + $0x90] sm:$0x1] %vm435_vm1, %v431_v27  ;;  %v1028_v27 = vld [vmem:[#allocation2 + $0xd9] sm:$0xff] }
  0x72   : > { %v2193_v33 = vld [vmem:[#allocation2 + $0x78] sm:$0xff] }
  0x73   : > { %492 = vst.msk [vmem:[#allocation3 + $0xf0] sm:$0xff] %vm377_vm0, %v2193_v33  ;;  %v2284_v7 = vld [vmem:[#allocation2 + $0x6a] sm:$0xff] }
  0x74   : > { %631 = vrot.lane.b32.xlu0 %v821_v35, %s1787_s15  ;;  %954 = vrot.lane.b32.xlu1 %v1945_v37, %s1787_s15  ;;  %v2204_v35 = vld [vmem:[%s2606_s3 + $0xa0] sm:$0xff]  ;;  %1131 = vst.msk [vmem:[#allocation3 + $0x88] sm:$0xff] %vm377_vm0, %v2284_v7 }
  0x75   : > { %728 = vrot.lane.b32.xlu2 %v918_v32, %s1788_s5  ;;  %v453_v32 = vld [vmem:[#allocation2 + $0xb7] sm:$0x1]  ;;  %1350 = vmatpush.msra.mxu1 %v2204_v35 }
  0x76   : > { %463 = vst.msk [vmem:[#allocation2 + $0xb9] sm:$0x1] %vm435_vm1, %v453_v32 }
  0x7c   : > { %1050 = vrot.lane.b32.xlu0 %v504_v34, %s1788_s5  ;;  %554 = vrot.lane.b32.xlu1 %v1998_v51, %s1786_s24  ;;  %v1194_v34 = vld [vmem:[%s2606_s3 + $0x20] sm:$0xff] }
  0x7d   : > { %651 = vrot.lane.b32.xlu2 %v1991_v50, %s1787_s15  ;;  %1285 = vmatpush.msra.mxu0 %v1194_v34  ;;  %v2275_v6 = vld [vmem:[#allocation2 + $0xb2] sm:$0xff] }
  0x7e   : > { %1137 = vst.msk [vmem:[#allocation3 + $0x118] sm:$0xff] %vm377_vm0, %v2275_v6  ;;  %1678 = vmatpush.msra.mxu3 %v1194_v34 }
  0x7f   : > { %1286 = vmatpush.msra.mxu0 %v1193_v39 }
  0x80   : > { %1679 = vmatpush.msra.mxu3 %v1193_v39 }
  0x81   : > { %1287 = vmatpush.msra.mxu0 %v1192_v42 }
  0x82   : > { %1680 = vmatpush.msra.mxu3 %v1192_v42 }
  0x83   : > { %1288 = vmatpush.msra.mxu0 %v1191_v56 }
  0x84   : > { %748 = vrot.lane.b32.xlu0 %v1958_v43, %s1788_s5  ;;  %859 = vrot.lane.b32.xlu1 %v1966_v45, %s1786_s24 }
  0x85   : > { %633 = vrot.lane.b32.xlu2 %v822_v41, %s1787_s15  ;;  %v2228_v41 = vld [vmem:[%s2606_s3 + $0x108] sm:$0xff]  ;;  %1681 = vmatpush.msra.mxu3 %v1191_v56 }
  0x86   : > { %1418 = vmatpush.msra.mxu2 %v2228_v41 }
  0x88   : > { %1419 = vmatpush.msra.mxu2 %v2243_v47 }
  0x89   : > { %1649 = vmatmul.msk.f32.vlgmr.msra.gmra.mxu2 %vm377_vm0, %v1144_v52  ;;  %v1027_v52 = vld [vmem:[#allocation2 + $0xc9] sm:$0xff] }
  0x8a   : > { %820 = vst.msk [vmem:[#allocation3 + $0x170] sm:$0xff] %vm377_vm0, %v1027_v52 }
  0x8c   : > { %956 = vrot.lane.b32.xlu0 %v1971_v46, %s1787_s15  ;;  %730 = vrot.lane.b32.xlu1 %v919_v40, %s1788_s5  ;;  %v2223_v40 = vld [vmem:[%s2606_s3 + $0x98] sm:$0xff] }
  0x8d   : > { %1052 = vrot.lane.b32.xlu2 %v2009_v53, %s1788_s5  ;;  %1351 = vmatpush.msra.mxu1 %v2223_v40 }
  0x91   : > { %1650 = vmatmul.msk.f32.gmra.mxu2 %vm377_vm0, %v1147_v14 }
  0x94   : > { %556 = vrot.lane.b32.xlu0 %v2034_v59, %s1786_s24  ;;  %653 = vrot.lane.b32.xlu1 %v1982_v48, %s1787_s15 }
  0x95   : > { %750 = vrot.lane.b32.xlu2 %v2029_v58, %s1788_s5 }
  0x9c   : > { %861 = vrot.lane.b32.xlu0 %v1987_v49, %s1786_s24  ;;  %635 = vrot.lane.b32.xlu1 %v1962_v44, %s1787_s15  ;;  %v2237_v44 = vld [vmem:[%s2606_s3 + $0x90] sm:$0xff] }
  0x9d   : > { %958 = vrot.lane.b32.xlu2 %v2064_v2, %s1787_s15  ;;  %1352 = vmatpush.msra.mxu1 %v2237_v44 }
  0x9f   : > { %v539_v11 = vpop.permute.xlu2 %538  ;;  %1353 = vmatpush.msra.mxu1 %v2256_v57 }
  0xa0   : > { %583 = vst.msk [vmem:[#allocation3 + $0x60] sm:$0xff] %vm578_vm2, %v539_v11 }
  0xa1   : > { %1354 = vmatpush.msra.mxu1 %v2270_v4 }
  0xa4   : > { %732 = vrot.lane.b32.xlu0 %v1945_v37, %s1788_s5  ;;  %1054 = vrot.lane.b32.xlu1 %v2012_v54, %s1788_s5  ;;  %v2213_v37 = vld [vmem:[#allocation2 + $0x68] sm:$0xff] }
  0xa5   : > { %558 = vrot.lane.b32.xlu2 %v2087_v8, %s1786_s24 }
  0xa7   : > { %v541_v23 = vpop.permute.xlu2 %540 }
  0xa8   : > { %584 = vst.msk [vmem:[#allocation3 + $0x78] sm:$0xff] %vm578_vm2, %v541_v23 }
  0xac   : > { %655 = vrot.lane.b32.xlu0 %v2017_v55, %s1787_s15  ;;  %752 = vrot.lane.b32.xlu1 %v2160_v26, %s1788_s5 }
  0xad   : > { %863 = vrot.lane.b32.xlu2 %v2138_v20, %s1786_s24 }
  0xaf   : > { %v628_v38 = vpop.permute.xlu2 %627 }
  0xb4   : > { %637 = vrot.lane.b32.xlu0 %v1966_v45, %s1787_s15  ;;  %960 = vrot.lane.b32.xlu1 %v2213_v37, %s1787_s15  ;;  %v1190_v45 = vld [vmem:[%s2606_s3] sm:$0xff] }
  0xb5   : > { %734 = vrot.lane.b32.xlu2 %v1971_v46, %s1788_s5  ;;  %1289 = vmatpush.msra.mxu0 %v1190_v45 }
  0xb6   : > { %v535_v61 = vpop.permute.xlu1 %534  ;;  %v531_v63 = vpop.permute.xlu0 %530  ;;  %1682 = vmatpush.msra.mxu3 %v1190_v45  ;;  %v1156_v45 = vld [vmem:[#allocation3 + $0x70] sm:$0xff] }
  0xb7   : > { %581 = vst.msk [vmem:[#allocation3 + $0x30] sm:$0xff] %vm578_vm2, %v535_v61  ;;  %v1047_v46 = vpop.permute.xlu2 %1046 }
  0xb8   : > { %579 = vst.msk [vmem:[#allocation3] sm:$0xff] %vm578_vm2, %v531_v63  ;;  %1683 = vmatpush.msrb.mxu3 %v2049_v62 }
  0xb9   : > { %676 = vst.msk [vmem:[#allocation3] sm:$0xff] %vm675_vm3, %v628_v38 }
  0xba   : > { %1684 = vmatpush.msrb.mxu3 %v2058_v0 }
  0xbc   : > { %1056 = vrot.lane.b32.xlu0 %v2060_v1, %s1788_s5  ;;  %560 = vrot.lane.b32.xlu1 %v2071_v3, %s1786_s24 }
  0xbd   : > { %657 = vrot.lane.b32.xlu2 %v2275_v6, %s1787_s15  ;;  %1685 = vmatpush.msrb.mxu3 %v2079_v5 }
  0xbe   : > { %v537_v9 = vpop.permute.xlu1 %536  ;;  %v533_v11 = vpop.permute.xlu0 %532 }
  0xbf   : > { %582 = vst.msk [vmem:[#allocation3 + $0x48] sm:$0xff] %vm578_vm2, %v537_v9  ;;  %v953_v12 = vpop.permute.xlu2 %952  ;;  %1686 = vmatpush.msrb.mxu3 %v2096_v10  ;;  %v1150_v10 = vld [vmem:[#allocation3 + $0x40] sm:$0xff] }
  0xc0   : > { %580 = vst.msk [vmem:[#allocation3 + $0x18] sm:$0xff] %vm578_vm2, %v533_v11  ;;  %1651 = vmatmul.msk.f32.gmra.mxu2 %vm377_vm0, %v1150_v10  ;;  %v1168_v10 = vld [vmem:[#allocation3 + $0xd0] sm:$0xff] }
  0xc1   : > { %1687 = vmatpush.msrb.mxu3 %v2105_v13  ;;  %v2341_v13 = vld [vmem:[#allocation2 + $0x7a] sm:$0xff] }
  0xc2   : > { %1132 = vst.msk [vmem:[#allocation3 + $0xa0] sm:$0xff] %vm377_vm0, %v2341_v13 }
  0xc3   : > { %1688 = vmatpush.msrb.mxu3 %v2117_v15 }
  0xc4   : > { %754 = vrot.lane.b32.xlu0 %v2294_v19, %s1788_s5  ;;  %865 = vrot.lane.b32.xlu1 %v2131_v18, %s1786_s24 }
  0xc5   : > { %639 = vrot.lane.b32.xlu2 %v1987_v49, %s1787_s15  ;;  %v1026_v49 = vld [vmem:[#allocation2 + $0xc1] sm:$0xff]  ;;  %1689 = vmatpush.msrb.mxu3 %v2129_v17 }
  0xc6   : > { %v854_v23 = vpop.permute.xlu1 %853  ;;  %v543_v24 = vpop.permute.xlu0 %542  ;;  %819 = vst.msk [vmem:[#allocation3 + $0x158] sm:$0xff] %vm377_vm0, %v1026_v49 }
  0xc7   : > { %901 = vst.msk [vmem:[#allocation3 + $0x8] sm:$0xff] %vm578_vm2, %v854_v23  ;;  %v858_v29 = vpop.permute.xlu2 %857  ;;  %1690 = vmatpush.msrb.mxu3 %v2148_v22  ;;  %v2357_v22 = vld [vmem:[#allocation2 + $0x81] sm:$0xff] }
  0xc8   : > { %585 = vst.msk [vmem:[#allocation3 + $0x90] sm:$0xff] %vm578_vm2, %v543_v24 }
  0xc9   : > { %903 = vst.msk [vmem:[#allocation3 + $0x38] sm:$0xff] %vm578_vm2, %v858_v29  ;;  %1691 = vmatpush.msrb.mxu3 %v2158_v25  ;;  %v434_v25 = vld [vmem:[#allocation2 + $0xda] sm:$0x1]  ;;  %v1162_v24 = vld [vmem:[#allocation3 + $0xa0] sm:$0xff] }
  0xca   : > { %814 = vst.msk [vmem:[#allocation3 + $0xe0] sm:$0xff] %vm377_vm0, %v2357_v22 }
  0xcb   : > { %1692 = vmatpush.msrb.mxu3 %v2170_v28  ;;  %445 = vst.msk [vmem:[#allocation2 + $0xd8] sm:$0x1] %vm435_vm1, %v434_v25  ;;  %v1153_v28 = vld [vmem:[#allocation3 + $0x58] sm:$0xff] }
  0xcc   : > { %962 = vrot.lane.b32.xlu0 %v2193_v33, %s1787_s15  ;;  %736 = vrot.lane.b32.xlu1 %v2064_v2, %s1788_s5  ;;  %v2330_v2 = vld [vmem:[#allocation2 + $0x90] sm:$0xff] }
  0xcd   : > { %1058 = vrot.lane.b32.xlu2 %v2303_v21, %s1788_s5  ;;  %494 = vst.msk [vmem:[#allocation3 + $0x120] sm:$0xff] %vm377_vm0, %v2330_v2  ;;  %1693 = vmatpush.msrb.mxu3 %v2183_v30  ;;  %v2369_v30 = vld [vmem:[#allocation2 + $0xc2] sm:$0xff] }
  0xce   : > { %v951_v62 = vpop.permute.xlu0 %950  ;;  %v725_v0 = vpop.permute.xlu1 %724  ;;  %1652 = vmatmul.msk.f32.gmra.mxu2 %vm377_vm0, %v1153_v28  ;;  %1138 = vst.msk [vmem:[#allocation3 + $0x130] sm:$0xff] %vm377_vm0, %v2369_v30 }
  0xcf   : > { %998 = vst.msk [vmem:[#allocation3 + $0x8] sm:$0xff] %vm675_vm3, %v951_v62  ;;  %v2327_v5 = vpop.permute.xlu2 %728  ;;  %1694 = vmatpush.msrb.mxu3 %v2204_v35  ;;  %v451_v35 = vld [vmem:[#allocation2 + $0x87] sm:$0x1] }
  0xd0   : > { %773 = vst.msk [vmem:[#allocation3] sm:$0xff] %vm772_vm4, %v725_v0 }
  0xd1   : > { %1094 = vst.msk [vmem:[#allocation3 + $0x8] sm:$0xff] %vm772_vm4, %v1047_v46  ;;  %1695 = vmatpush.msrb.mxu3 %v2223_v40 }
  0xd2   : > { %461 = vst.msk [vmem:[#allocation2 + $0x89] sm:$0x1] %vm435_vm1, %v451_v35 }
  0xd3   : > { %1696 = vmatpush.msrb.mxu3 %v2237_v44 }
  0xd4   : > { %877 = vrot.lane.b32.xlu0 %v2017_v55, %s1786_s24  ;;  %974 = vrot.lane.b32.xlu1 %v2160_v26, %s1787_s15 }
  0xd5   : > { %1070 = vrot.lane.b32.xlu2 %v1026_v49, %s1788_s5  ;;  %1697 = vmatpush.msrb.mxu3 %v2256_v57 }
  0xd6   : > { %v856_v15 = vpop.permute.xlu0 %855  ;;  %v630_v32 = vpop.permute.xlu1 %629  ;;  %1653 = vmatmul.msk.f32.gmra.mxu2 %vm377_vm0, %v1156_v45 }
  0xd7   : > { %902 = vst.msk [vmem:[#allocation3 + $0x20] sm:$0xff] %vm578_vm2, %v856_v15  ;;  %v1142_v17 = vld [vmem:[#allocation3] sm:$0xff]  ;;  %v652_v26 = vpop.permute.xlu2 %651  ;;  %1698 = vmatpush.msrb.mxu3 %v2270_v4  ;;  %v454_v4 = vld [vmem:[#allocation2 + $0xcf] sm:$0x1] }
  0xd8   : > { %677 = vst.msk [vmem:[#allocation3 + $0x18] sm:$0xff] %vm675_vm3, %v630_v32  ;;  %1290 = vmatmul.f32.vlgmr.msra.gmra.mxu0 %v1142_v17  ;;  %v1143_v55 = vld [vmem:[#allocation3 + $0x8] sm:$0xff]  ;;  %v933_v17 = vld [vmem:[#allocation2 + $0xe0] sm:$0xff] }
  0xd9   : > { %999 = vst.msk [vmem:[#allocation3 + $0x20] sm:$0xff] %vm675_vm3, %v953_v12  ;;  %1355 = vmatmul.f32.vlgmr.msra.gmra.mxu1 %v1143_v55  ;;  %v2397_v56 = vld [vmem:[#allocation2 + $0x82] sm:$0xff]  ;;  %v1159_v12 = vld [vmem:[#allocation3 + $0x88] sm:$0xff] }
  0xda   : > { %1133 = vst.msk [vmem:[#allocation3 + $0xb8] sm:$0xff] %vm377_vm0, %v2397_v56  ;;  %v1171_v32 = vld [vmem:[#allocation3 + $0xe8] sm:$0xff]  ;;  %v1029_v55 = vld [vmem:[#allocation2 + $0xe1] sm:$0xff] }
  0xdb   : > { %464 = vst.msk [vmem:[#allocation2 + $0xd1] sm:$0x1] %vm435_vm1, %v454_v4 }
  0xdc   : > { %544 = vrot.lane.b32.xlu0 %v2009_v53, %s1786_s24  ;;  %867 = vrot.lane.b32.xlu1 %v2284_v7, %s1786_s24 }
  0xdd   : > { %641 = vrot.lane.b32.xlu2 %v2138_v20, %s1787_s15  ;;  %v2380_v20 = vld [vmem:[#allocation2 + $0x98] sm:$0xff] }
  0xde   : > { %v727_v34 = vpop.permute.xlu0 %726  ;;  %v1049_v38 = vpop.permute.xlu1 %1048  ;;  %495 = vst.msk [vmem:[#allocation3 + $0x138] sm:$0xff] %vm377_vm0, %v2380_v20  ;;  %1654 = vmatmul.msk.f32.gmra.mxu2 %vm377_vm0, %v1159_v12 }
  0xdf   : > { %774 = vst.msk [vmem:[#allocation3 + $0x18] sm:$0xff] %vm772_vm4, %v727_v34  ;;  %v634_v53 = vpop.permute.xlu2 %633 }
  0xe0   : > { %1095 = vst.msk [vmem:[#allocation3 + $0x20] sm:$0xff] %vm772_vm4, %v1049_v38  ;;  %v1174_v38 = vld [vmem:[#allocation3 + $0x100] sm:$0xff] }
  0xe1   : > { %679 = vst.msk [vmem:[#allocation3 + $0x48] sm:$0xff] %vm675_vm3, %v634_v53  ;;  %v1165_v62 = vld [vmem:[#allocation3 + $0xb8] sm:$0xff] }
  0xe4   : > { %964 = vrot.lane.b32.xlu0 %v2292_v16, %s1787_s15  ;;  %738 = vrot.lane.b32.xlu1 %v2213_v37, %s1788_s5 }
  0xe5   : > { %1060 = vrot.lane.b32.xlu2 %v2357_v22, %s1788_s5 }
  0xe6   : > { %v632_v39 = vpop.permute.xlu0 %631  ;;  %v955_v40 = vpop.permute.xlu1 %954  ;;  %v1145_v42 = vld [vmem:[#allocation3 + $0x18] sm:$0xff]  ;;  %1655 = vmatmul.msk.f32.gmra.mxu2 %vm377_vm0, %v1162_v24 }
  0xe7   : > { %678 = vst.msk [vmem:[#allocation3 + $0x30] sm:$0xff] %vm675_vm3, %v632_v39  ;;  %1293 = vmatmul.f32.gmra.mxu0 %v1145_v42  ;;  %v1146_v37 = vld [vmem:[#allocation3 + $0x20] sm:$0xff]  ;;  %v1053_v44 = vpop.permute.xlu2 %1052  ;;  %v1177_v39 = vld [vmem:[#allocation3 + $0x118] sm:$0xff]  ;;  %v1180_v42 = vld [vmem:[#allocation3 + $0x130] sm:$0xff] }
  0xe8   : > { %1000 = vst.msk [vmem:[#allocation3 + $0x38] sm:$0xff] %vm675_vm3, %v955_v40  ;;  %1358 = vmatmul.f32.gmra.mxu1 %v1146_v37 }
  0xe9   : > { %775 = vst.msk [vmem:[#allocation3 + $0x30] sm:$0xff] %vm772_vm4, %v2327_v5 }
  0xec   : > { %879 = vrot.lane.b32.xlu0 %v2275_v6, %s1786_s24  ;;  %976 = vrot.lane.b32.xlu1 %v2294_v19, %s1787_s15 }
  0xed   : > { %1072 = vrot.lane.b32.xlu2 %v1027_v52, %s1788_s5 }
  0xee   : > { %v1051_v57 = vpop.permute.xlu0 %1050  ;;  %v555_v60 = vpop.permute.xlu1 %554  ;;  %1656 = vmatmul.msk.f32.gmra.mxu2 %vm377_vm0, %v1165_v62 }
  0xef   : > { %1096 = vst.msk [vmem:[#allocation3 + $0x38] sm:$0xff] %vm772_vm4, %v1051_v57  ;;  %v751_v63 = vpop.permute.xlu2 %750 }
  0xf0   : > { %591 = vst.msk [vmem:[#allocation3 + $0x120] sm:$0xff] %vm578_vm2, %v555_v60  ;;  %v1148_v61 = vld [vmem:[#allocation3 + $0x30] sm:$0xff] }
  0xf1   : > { %688 = vst.msk [vmem:[#allocation3 + $0x120] sm:$0xff] %vm675_vm3, %v652_v26  ;;  %1296 = vmatmul.f32.gmra.mxu0 %v1148_v61 }
  0xf4   : > { %546 = vrot.lane.b32.xlu0 %v2012_v54, %s1786_s24  ;;  %869 = vrot.lane.b32.xlu1 %v2341_v13, %s1786_s24  ;;  %v836_v54 = vld [vmem:[#allocation2 + $0xca] sm:$0xff] }
  0xf5   : > { %643 = vrot.lane.b32.xlu2 %v2131_v18, %s1787_s15  ;;  %1139 = vst.msk [vmem:[#allocation3 + $0x148] sm:$0xff] %vm377_vm0, %v836_v54 }
  0xf6   : > { %v749_v46 = vpop.permute.xlu0 %748  ;;  %v860_v6 = vpop.permute.xlu1 %859  ;;  %v1149_v9 = vld [vmem:[#allocation3 + $0x38] sm:$0xff]  ;;  %1657 = vmatmul.msk.f32.gmra.mxu2 %vm377_vm0, %v1168_v10 }
  0xf7   : > { %785 = vst.msk [vmem:[#allocation3 + $0x120] sm:$0xff] %vm772_vm4, %v749_v46  ;;  %1361 = vmatmul.f32.gmra.mxu1 %v1149_v9  ;;  %v959_v11 = vpop.permute.xlu2 %958 }
  0xf8   : > { %904 = vst.msk [vmem:[#allocation3 + $0x50] sm:$0xff] %vm578_vm2, %v860_v6 }
  0xfc   : > { %966 = vrot.lane.b32.xlu0 %v2330_v2, %s1787_s15  ;;  %740 = vrot.lane.b32.xlu1 %v2193_v33, %s1788_s5  ;;  %v932_v33 = vld [vmem:[#allocation2 + $0xd8] sm:$0xff] }
  0xfd   : > { %1062 = vrot.lane.b32.xlu2 %v1998_v51, %s1788_s5  ;;  %v1183_v61 = vld [vmem:[#allocation3 + $0x148] sm:$0xff] }
  0xfe   : > { %v957_v14 = vpop.permute.xlu0 %956  ;;  %v731_v18 = vpop.permute.xlu1 %730  ;;  %v1178_v19 = vld [vmem:[#allocation3 + $0x120] sm:$0xff]  ;;  %1658 = vmatmul.msk.f32.gmra.mxu2 %vm377_vm0, %v1171_v32 }
  0xff   : > { %1001 = vst.msk [vmem:[#allocation3 + $0x50] sm:$0xff] %vm675_vm3, %v957_v14  ;;  %1326 = vmatmul.f32.vlgmr.msra.gmra.mxu3 %v1178_v19  ;;  %v559_v23 = vpop.permute.xlu2 %558  ;;  %v475_v19 = vld [vmem:[#allocation2 + $0x68] sm:$0xff] }
 0x100   : > { %776 = vst.msk [vmem:[#allocation3 + $0x48] sm:$0xff] %vm772_vm4, %v731_v18  ;;  %1699 = vmatpush.msra.mxu3 %v2189_v31 }
 0x101   : > { %1097 = vst.msk [vmem:[#allocation3 + $0x50] sm:$0xff] %vm772_vm4, %v1053_v44 }
 0x102   : > { %593 = vst.msk [vmem:[#allocation3 + $0x150] sm:$0xff] %vm578_vm2, %v559_v23  ;;  %1700 = vmatpush.msra.mxu3 %v2209_v36  ;;  %v1124_v23 = vld [vmem:[#allocation2 + $0xda] sm:$0xff] }
 0x103   : > { %491 = vst.msk [vmem:[#allocation3 + $0xd8] sm:$0xff] %vm377_vm0, %v475_v19 }
 0x104   : > { %881 = vrot.lane.b32.xlu0 %v2369_v30, %s1786_s24  ;;  %978 = vrot.lane.b32.xlu1 %v932_v33, %s1787_s15  ;;  %1140 = vst.msk [vmem:[#allocation3 + $0x160] sm:$0xff] %vm377_vm0, %v1124_v23 }
 0x105   : > { %1701 = vmatpush.msra.mxu3 %v2228_v41  ;;  %1074 = vrot.lane.b32.xlu2 %v1028_v27, %s1788_s5 }
 0x106   : > { %v557_v51 = vpop.permute.xlu0 %556  ;;  %v654_v29 = vpop.permute.xlu1 %653  ;;  %1659 = vmatmul.msk.f32.gmra.mxu2 %vm377_vm0, %v1174_v38 }
 0x107   : > { %592 = vst.msk [vmem:[#allocation3 + $0x138] sm:$0xff] %vm578_vm2, %v557_v51  ;;  %v1151_v31 = vld [vmem:[#allocation3 + $0x48] sm:$0xff]  ;;  %1702 = vmatpush.msra.mxu3 %v2243_v47  ;;  %v864_v49 = vpop.permute.xlu2 %863 }
 0x108   : > { %689 = vst.msk [vmem:[#allocation3 + $0x138] sm:$0xff] %vm675_vm3, %v654_v29  ;;  %1299 = vmatmul.f32.gmra.mxu0 %v1151_v31  ;;  %v1152_v36 = vld [vmem:[#allocation3 + $0x50] sm:$0xff] }
 0x109   : > { %786 = vst.msk [vmem:[#allocation3 + $0x138] sm:$0xff] %vm772_vm4, %v751_v63  ;;  %1364 = vmatmul.f32.gmra.mxu1 %v1152_v36 }
 0x10a   : > { %906 = vst.msk [vmem:[#allocation3 + $0x80] sm:$0xff] %vm578_vm2, %v864_v49 }
 0x10b   : > { %v1186_v36 = vld [vmem:[#allocation3 + $0x160] sm:$0xff] }
 0x10c   : > { %548 = vrot.lane.b32.xlu0 %v2060_v1, %s1786_s24  ;;  %871 = vrot.lane.b32.xlu1 %v2397_v56, %s1786_s24  ;;  %v1421_v9 = vpop.f32.mrf.mxu2 }
 0x10d   : > { %645 = vrot.lane.b32.xlu2 %v2284_v7, %s1787_s15 }
 0x10e   : > { %v862_v41 = vpop.permute.xlu0 %861  ;;  %v636_v47 = vpop.permute.xlu1 %635  ;;  %1660 = vmatmul.msk.f32.gmra.mxu2 %vm377_vm0, %v1177_v39 }
 0x10f   : > { %905 = vst.msk [vmem:[#allocation3 + $0x68] sm:$0xff] %vm578_vm2, %v862_v41  ;;  %v735_v5 = vpop.permute.xlu2 %734 }
 0x110   : > { %680 = vst.msk [vmem:[#allocation3 + $0x60] sm:$0xff] %vm675_vm3, %v636_v47  ;;  %v1181_v0 = vld [vmem:[#allocation3 + $0x138] sm:$0xff] }
 0x111   : > { %1002 = vst.msk [vmem:[#allocation3 + $0x68] sm:$0xff] %vm675_vm3, %v959_v11  ;;  %1329 = vmatmul.f32.gmra.mxu3 %v1181_v0 }
 0x114   : > { %968 = vrot.lane.b32.xlu0 %v2380_v20, %s1787_s15  ;;  %742 = vrot.lane.b32.xlu1 %v2292_v16, %s1788_s5  ;;  %v1424_v62 = vpop.f32.mrf.mxu2 }
 0x115   : > { %1064 = vrot.lane.b32.xlu2 %v2034_v59, %s1788_s5 }
 0x116   : > { %v733_v1 = vpop.permute.xlu0 %732  ;;  %v1055_v7 = vpop.permute.xlu1 %1054  ;;  %1661 = vmatmul.msk.f32.gmra.mxu2 %vm377_vm0, %v1180_v42 }
 0x117   : > { %777 = vst.msk [vmem:[#allocation3 + $0x60] sm:$0xff] %vm772_vm4, %v733_v1  ;;  %v658_v15 = vpop.permute.xlu2 %657 }
 0x118   : > { %1098 = vst.msk [vmem:[#allocation3 + $0x68] sm:$0xff] %vm772_vm4, %v1055_v7 }
 0x11c   : > { %883 = vrot.lane.b32.xlu0 %v836_v54, %s1786_s24  ;;  %980 = vrot.lane.b32.xlu1 %v933_v17, %s1787_s15  ;;  %v455_v17 = vld [vmem:[#allocation2 + $0xe7] sm:$0x1] }
 0x11d   : > { %1076 = vrot.lane.b32.xlu2 %v1029_v55, %s1788_s5  ;;  %465 = vst.msk [vmem:[#allocation2 + $0xe9] sm:$0x1] %vm435_vm1, %v455_v17 }
 0x11e   : > { %v656_v16 = vpop.permute.xlu0 %655  ;;  %v753_v26 = vpop.permute.xlu1 %752  ;;  %v1154_v25 = vld [vmem:[#allocation3 + $0x60] sm:$0xff]  ;;  %1662 = vmatmul.msk.f32.gmra.mxu2 %vm377_vm0, %v1183_v61 }
 0x11f   : > { %690 = vst.msk [vmem:[#allocation3 + $0x150] sm:$0xff] %vm675_vm3, %v656_v16  ;;  %1302 = vmatmul.f32.gmra.mxu0 %v1154_v25  ;;  %v1155_v59 = vld [vmem:[#allocation3 + $0x68] sm:$0xff]  ;;  %v640_v34 = vpop.permute.xlu2 %639 }
 0x120   : > { %787 = vst.msk [vmem:[#allocation3 + $0x150] sm:$0xff] %vm772_vm4, %v753_v26  ;;  %1367 = vmatmul.f32.gmra.mxu1 %v1155_v59 }
 0x121   : > { %682 = vst.msk [vmem:[#allocation3 + $0x90] sm:$0xff] %vm675_vm3, %v640_v34 }
 0x124   : > { %550 = vrot.lane.b32.xlu0 %v2303_v21, %s1786_s24  ;;  %873 = vrot.lane.b32.xlu1 %v1991_v50, %s1786_s24 }
 0x125   : > { %647 = vrot.lane.b32.xlu2 %v2341_v13, %s1787_s15 }
 0x126   : > { %v638_v53 = vpop.permute.xlu0 %637  ;;  %v961_v28 = vpop.permute.xlu1 %960  ;;  %1663 = vmatmul.msk.f32.gmra.mxu2 %vm377_vm0, %v1186_v36 }
 0x127   : > { %681 = vst.msk [vmem:[#allocation3 + $0x78] sm:$0xff] %vm675_vm3, %v638_v53  ;;  %v1184_v30 = vld [vmem:[#allocation3 + $0x150] sm:$0xff]  ;;  %v1059_v35 = vpop.permute.xlu2 %1058 }
 0x128   : > { %1003 = vst.msk [vmem:[#allocation3 + $0x80] sm:$0xff] %vm675_vm3, %v961_v28  ;;  %1332 = vmatmul.f32.gmra.mxu3 %v1184_v30  ;;  %v799_v30 = vld [vmem:[#allocation2 + $0x91] sm:$0xff] }
 0x129   : > { %778 = vst.msk [vmem:[#allocation3 + $0x78] sm:$0xff] %vm772_vm4, %v735_v5 }
 0x12a   : > { %815 = vst.msk [vmem:[#allocation3 + $0xf8] sm:$0xff] %vm377_vm0, %v799_v30 }
 0x12c   : > { %970 = vrot.lane.b32.xlu0 %v1958_v43, %s1787_s15  ;;  %744 = vrot.lane.b32.xlu1 %v2330_v2, %s1788_s5 }
 0x12d   : > { %1066 = vrot.lane.b32.xlu2 %v2087_v8, %s1788_s5 }
 0x12e   : > { %v1057_v50 = vpop.permute.xlu0 %1056  ;;  %v561_v21 = vpop.permute.xlu1 %560 }
 0x12f   : > { %1099 = vst.msk [vmem:[#allocation3 + $0x80] sm:$0xff] %vm772_vm4, %v1057_v50  ;;  %v1071_v40 = vpop.permute.xlu2 %1070 }
 0x130   : > { %594 = vst.msk [vmem:[#allocation3 + $0x168] sm:$0xff] %vm578_vm2, %v561_v21  ;;  %v1157_v13 = vld [vmem:[#allocation3 + $0x78] sm:$0xff] }
 0x131   : > { %691 = vst.msk [vmem:[#allocation3 + $0x168] sm:$0xff] %vm675_vm3, %v658_v15  ;;  %1305 = vmatmul.f32.gmra.mxu0 %v1157_v13 }
 0x134   : > { %552 = vrot.lane.b32.xlu0 %v2357_v22, %s1786_s24  ;;  %875 = vrot.lane.b32.xlu1 %v1982_v48, %s1786_s24 }
 0x135   : > { %649 = vrot.lane.b32.xlu2 %v2397_v56, %s1787_s15 }
 0x136   : > { %v755_v43 = vpop.permute.xlu0 %754  ;;  %v1158_v8 = vld [vmem:[#allocation3 + $0x80] sm:$0xff]  ;;  %v866_v2 = vpop.permute.xlu1 %865 }
 0x137   : > { %788 = vst.msk [vmem:[#allocation3 + $0x168] sm:$0xff] %vm772_vm4, %v755_v43  ;;  %1370 = vmatmul.f32.gmra.mxu1 %v1158_v8  ;;  %v642_v37 = vpop.permute.xlu2 %641 }
 0x138   : > { %907 = vst.msk [vmem:[#allocation3 + $0x98] sm:$0xff] %vm578_vm2, %v866_v2 }
 0x13c   : > { %972 = vrot.lane.b32.xlu0 %v2029_v58, %s1787_s15  ;;  %746 = vrot.lane.b32.xlu1 %v2380_v20, %s1788_s5  ;;  %v474_v20 = vld [vmem:[#allocation2 + $0x60] sm:$0xff] }
 0x13d   : > { %1068 = vrot.lane.b32.xlu2 %v2071_v3, %s1788_s5  ;;  %490 = vst.msk [vmem:[#allocation3 + $0xc0] sm:$0xff] %vm377_vm0, %v474_v20 }
 0x13e   : > { %v963_v22 = vpop.permute.xlu0 %962  ;;  %v1187_v48 = vld [vmem:[#allocation3 + $0x168] sm:$0xff]  ;;  %v737_v44 = vpop.permute.xlu1 %736 }
 0x13f   : > { %1004 = vst.msk [vmem:[#allocation3 + $0x98] sm:$0xff] %vm675_vm3, %v963_v22  ;;  %1335 = vmatmul.f32.gmra.mxu3 %v1187_v48  ;;  %v1061_v52 = vpop.permute.xlu2 %1060 }
 0x140   : > { %1100 = vst.msk [vmem:[#allocation3 + $0x98] sm:$0xff] %vm772_vm4, %v1059_v35  ;;  %v1125_v35 = vld [vmem:[#allocation2 + $0xe2] sm:$0xff] }
 0x141   : > { %779 = vst.msk [vmem:[#allocation3 + $0x90] sm:$0xff] %vm772_vm4, %v737_v44  ;;  %v800_v44 = vld [vmem:[#allocation2 + $0x99] sm:$0xff] }
 0x142   : > { %1141 = vst.msk [vmem:[#allocation3 + $0x178] sm:$0xff] %vm377_vm0, %v1125_v35 }
 0x143   : > { %v1427_v55 = vpop.f32.mrf.mxu2  ;;  %816 = vst.msk [vmem:[#allocation3 + $0x110] sm:$0xff] %vm377_vm0, %v800_v44 }
 0x146   : > { %v878_v56 = vpop.permute.xlu0 %877  ;;  %v975_v57 = vpop.permute.xlu1 %974 }
 0x147   : > { %913 = vst.msk [vmem:[#allocation3 + $0x128] sm:$0xff] %vm578_vm2, %v878_v56  ;;  %v1161_v58 = vld [vmem:[#allocation3 + $0x98] sm:$0xff]  ;;  %v1073_v3 = vpop.permute.xlu2 %1072 }
 0x148   : > { %1010 = vst.msk [vmem:[#allocation3 + $0x128] sm:$0xff] %vm675_vm3, %v975_v57  ;;  %v1160_v60 = vld [vmem:[#allocation3 + $0x90] sm:$0xff]  ;;  %1373 = vmatmul.f32.gmra.mxu1 %v1161_v58 }
 0x149   : > { %1106 = vst.msk [vmem:[#allocation3 + $0x128] sm:$0xff] %vm772_vm4, %v1071_v40  ;;  %1308 = vmatmul.f32.gmra.mxu0 %v1160_v60 }
 0x14e   : > { %v545_v63 = vpop.permute.xlu0 %544  ;;  %v868_v45 = vpop.permute.xlu1 %867 }
 0x14f   : > { %586 = vst.msk [vmem:[#allocation3 + $0xa8] sm:$0xff] %vm578_vm2, %v545_v63  ;;  %v644_v46 = vpop.permute.xlu2 %643 }
 0x150   : > { %683 = vst.msk [vmem:[#allocation3 + $0xa8] sm:$0xff] %vm675_vm3, %v642_v37  ;;  %v1179_v4 = vld [vmem:[#allocation3 + $0x128] sm:$0xff] }
 0x151   : > { %908 = vst.msk [vmem:[#allocation3 + $0xb0] sm:$0xff] %vm578_vm2, %v868_v45  ;;  %1391 = vmatmul.f32.vlgmr.msrb.gmra.mxu3 %v1179_v4  ;;  %v1430_v50 = vpop.f32.mrf.mxu2 }
 0x155   : > { %v1291_v6 = vpop.f32.mrf.mxu0 }
 0x156   : > { %v1356_v11 = vpop.f32.mrf.mxu1  ;;  %v965_v12 = vpop.permute.xlu0 %964 }
 0x157   : > { %v1357_v54 = vadd.f32 %v1356_v11, %v1291_v6  ;;  %1005 = vst.msk [vmem:[#allocation3 + $0xb0] sm:$0xff] %vm675_vm3, %v965_v12  ;;  %v739_v14 = vpop.permute.xlu1 %738  ;;  %v1063_v24 = vpop.permute.xlu2 %1062 }
 0x158   : > { %1101 = vst.msk [vmem:[#allocation3 + $0xb0] sm:$0xff] %vm772_vm4, %v1061_v52 }
 0x159   : > { %v1422_v18 = vadd.f32 %v1421_v9, %v1357_v54  ;;  %780 = vst.msk [vmem:[#allocation3 + $0xa8] sm:$0xff] %vm772_vm4, %v739_v14  ;;  %v1433_v42 = vpop.f32.mrf.mxu2  ;;  %v1189_v54 = vld [vmem:[#allocation3 + $0x178] sm:$0xff] }
 0x15b   : > { %1469 = vst.msk [vmem:[%s1909_s9] sm:$0xff] %vm377_vm0, %v1422_v18 }
 0x15e   : > { %v880_v33 = vpop.permute.xlu0 %879 }
 0x15f   : > { %914 = vst.msk [vmem:[#allocation3 + $0x140] sm:$0xff] %vm578_vm2, %v880_v33  ;;  %v977_v27 = vpop.permute.xlu1 %976  ;;  %v1164_v51 = vld [vmem:[#allocation3 + $0xb0] sm:$0xff]  ;;  %v1075_v5 = vpop.permute.xlu2 %1074 }
 0x160   : > { %1011 = vst.msk [vmem:[#allocation3 + $0x140] sm:$0xff] %vm675_vm3, %v977_v27  ;;  %v1163_v29 = vld [vmem:[#allocation3 + $0xa8] sm:$0xff]  ;;  %1376 = vmatmul.f32.gmra.mxu1 %v1164_v51 }
 0x161   : > { %1107 = vst.msk [vmem:[#allocation3 + $0x140] sm:$0xff] %vm772_vm4, %v1073_v3  ;;  %1311 = vmatmul.f32.gmra.mxu0 %v1163_v29  ;;  %v1436_v57 = vpop.f32.mrf.mxu2 }
 0x164   : > { %v1294_v31 = vpop.f32.mrf.mxu0 }
 0x165   : > { %v1359_v49 = vpop.f32.mrf.mxu1 }
 0x166   : > { %v1360_v41 = vadd.f32 %v1359_v49, %v1294_v31  ;;  %v547_v47 = vpop.permute.xlu0 %546 }
 0x167   : > { %587 = vst.msk [vmem:[#allocation3 + $0xc0] sm:$0xff] %vm578_vm2, %v547_v47  ;;  %v870_v0 = vpop.permute.xlu1 %869  ;;  %v646_v32 = vpop.permute.xlu2 %645 }
 0x168   : > { %v1425_v10 = vadd.f32 %v1424_v62, %v1360_v41  ;;  %684 = vst.msk [vmem:[#allocation3 + $0xc0] sm:$0xff] %vm675_vm3, %v644_v46  ;;  %v1182_v1 = vld [vmem:[#allocation3 + $0x140] sm:$0xff] }
 0x169   : > { %909 = vst.msk [vmem:[#allocation3 + $0xc8] sm:$0xff] %vm578_vm2, %v870_v0  ;;  %1394 = vmatmul.f32.gmra.mxu3 %v1182_v1  ;;  %v1439_v4 = vpop.f32.mrf.mxu2 }
 0x16a   : > { %1470 = vst.msk [vmem:[%s1909_s9 + $0x8] sm:$0xff] %vm377_vm0, %v1425_v10 }
 0x16e   : > { %v967_v7 = vpop.permute.xlu0 %966  ;;  %v1297_v16 = vpop.f32.mrf.mxu0 }
 0x16f   : > { %1006 = vst.msk [vmem:[#allocation3 + $0xc8] sm:$0xff] %vm675_vm3, %v967_v7  ;;  %v741_v15 = vpop.permute.xlu1 %740  ;;  %v1065_v39 = vpop.permute.xlu2 %1064 }
 0x170   : > { %1102 = vst.msk [vmem:[#allocation3 + $0xc8] sm:$0xff] %vm772_vm4, %v1063_v24 }
 0x171   : > { %781 = vst.msk [vmem:[#allocation3 + $0xc0] sm:$0xff] %vm772_vm4, %v741_v15  ;;  %v1442_v19 = vpop.f32.mrf.mxu2 }
 0x174   : > { %v1362_v26 = vpop.f32.mrf.mxu1 }
 0x175   : > { %v1363_v25 = vadd.f32 %v1362_v26, %v1297_v16 }
 0x176   : > { %v882_v59 = vpop.permute.xlu0 %881 }
 0x177   : > { %v1428_v34 = vadd.f32 %v1427_v55, %v1363_v25  ;;  %915 = vst.msk [vmem:[#allocation3 + $0x158] sm:$0xff] %vm578_vm2, %v882_v59  ;;  %v979_v38 = vpop.permute.xlu1 %978  ;;  %v1167_v53 = vld [vmem:[#allocation3 + $0xc8] sm:$0xff]  ;;  %v1077_v8 = vpop.permute.xlu2 %1076 }
 0x178   : > { %1012 = vst.msk [vmem:[#allocation3 + $0x158] sm:$0xff] %vm675_vm3, %v979_v38  ;;  %v1166_v28 = vld [vmem:[#allocation3 + $0xc0] sm:$0xff]  ;;  %1379 = vmatmul.f32.gmra.mxu1 %v1167_v53 }
 0x179   : > { %1471 = vst.msk [vmem:[%s1909_s9 + $0x10] sm:$0xff] %vm377_vm0, %v1428_v34  ;;  %1314 = vmatmul.f32.gmra.mxu0 %v1166_v28  ;;  %v1445_v29 = vpop.f32.mrf.mxu2 }
 0x17a   : > { %1108 = vst.msk [vmem:[#allocation3 + $0x158] sm:$0xff] %vm772_vm4, %v1075_v5 }
 0x17e   : > { %v549_v21 = vpop.permute.xlu0 %548 }
 0x17f   : > { %588 = vst.msk [vmem:[#allocation3 + $0xd8] sm:$0xff] %vm578_vm2, %v549_v21  ;;  %v872_v13 = vpop.permute.xlu1 %871  ;;  %v648_v60 = vpop.permute.xlu2 %647 }
 0x180   : > { %685 = vst.msk [vmem:[#allocation3 + $0xd8] sm:$0xff] %vm675_vm3, %v646_v32 }
 0x181   : > { %910 = vst.msk [vmem:[#allocation3 + $0xe0] sm:$0xff] %vm578_vm2, %v872_v13  ;;  %v1185_v40 = vld [vmem:[#allocation3 + $0x158] sm:$0xff]  ;;  %v1448_v5 = vpop.f32.mrf.mxu2 }
 0x182   : > { %1397 = vmatmul.f32.gmra.mxu3 %v1185_v40  ;;  %v1327_v62 = vpop.f32.mrf.mxu3 }
 0x185   : > { %v1300_v43 = vpop.f32.mrf.mxu0 }
 0x186   : > { %v1365_v2 = vpop.f32.mrf.mxu1  ;;  %v969_v37 = vpop.permute.xlu0 %968 }
 0x187   : > { %v1366_v22 = vadd.f32 %v1365_v2, %v1300_v43  ;;  %1007 = vst.msk [vmem:[#allocation3 + $0xe0] sm:$0xff] %vm675_vm3, %v969_v37  ;;  %v743_v48 = vpop.permute.xlu1 %742  ;;  %v1067_v46 = vpop.permute.xlu2 %1066 }
 0x188   : > { %1103 = vst.msk [vmem:[#allocation3 + $0xe0] sm:$0xff] %vm772_vm4, %v1065_v39 }
 0x189   : > { %v1431_v52 = vadd.f32 %v1430_v50, %v1366_v22  ;;  %782 = vst.msk [vmem:[#allocation3 + $0xd8] sm:$0xff] %vm772_vm4, %v743_v48  ;;  %v1451_v32 = vpop.f32.mrf.mxu2 }
 0x18b   : > { %1472 = vst.msk [vmem:[%s1909_s9 + $0x18] sm:$0xff] %vm377_vm0, %v1431_v52 }
 0x18e   : > { %v884_v56 = vpop.permute.xlu0 %883 }
 0x18f   : > { %916 = vst.msk [vmem:[#allocation3 + $0x170] sm:$0xff] %vm578_vm2, %v884_v56  ;;  %v981_v58 = vpop.permute.xlu1 %980  ;;  %v1170_v20 = vld [vmem:[#allocation3 + $0xe0] sm:$0xff]  ;;  %v650_v23 = vpop.permute.xlu2 %649 }
 0x190   : > { %1013 = vst.msk [vmem:[#allocation3 + $0x170] sm:$0xff] %vm675_vm3, %v981_v58  ;;  %v1169_v3 = vld [vmem:[#allocation3 + $0xd8] sm:$0xff]  ;;  %1382 = vmatmul.f32.gmra.mxu1 %v1170_v20 }
 0x191   : > { %1109 = vst.msk [vmem:[#allocation3 + $0x170] sm:$0xff] %vm772_vm4, %v1077_v8  ;;  %1317 = vmatmul.f32.gmra.mxu0 %v1169_v3  ;;  %v1454_v59 = vpop.f32.mrf.mxu2 }
 0x194   : > { %v1330_v15 = vpop.f32.mrf.mxu3 }
 0x196   : > { %v551_v61 = vpop.permute.xlu0 %550 }
 0x197   : > { %589 = vst.msk [vmem:[#allocation3 + $0xf0] sm:$0xff] %vm578_vm2, %v551_v61  ;;  %v874_v63 = vpop.permute.xlu1 %873  ;;  %v1069_v31 = vpop.permute.xlu2 %1068 }
 0x198   : > { %686 = vst.msk [vmem:[#allocation3 + $0xf0] sm:$0xff] %vm675_vm3, %v648_v60  ;;  %v1188_v45 = vld [vmem:[#allocation3 + $0x170] sm:$0xff] }
 0x199   : > { %911 = vst.msk [vmem:[#allocation3 + $0xf8] sm:$0xff] %vm578_vm2, %v874_v63  ;;  %1400 = vmatmul.f32.gmra.mxu3 %v1188_v45  ;;  %v1457_v53 = vpop.f32.mrf.mxu2 }
 0x19c   : > { %v1303_v6 = vpop.f32.mrf.mxu0 }
 0x19d   : > { %v1368_v9 = vpop.f32.mrf.mxu1 }
 0x19e   : > { %v1369_v11 = vadd.f32 %v1368_v9, %v1303_v6  ;;  %v971_v12 = vpop.permute.xlu0 %970 }
 0x19f   : > { %1008 = vst.msk [vmem:[#allocation3 + $0xf8] sm:$0xff] %vm675_vm3, %v971_v12  ;;  %v745_v14 = vpop.permute.xlu1 %744 }
 0x1a0   : > { %v1434_v18 = vadd.f32 %v1433_v42, %v1369_v11  ;;  %1104 = vst.msk [vmem:[#allocation3 + $0xf8] sm:$0xff] %vm772_vm4, %v1067_v46 }
 0x1a1   : > { %783 = vst.msk [vmem:[#allocation3 + $0xf0] sm:$0xff] %vm772_vm4, %v745_v14  ;;  %1664 = vmatmul.msk.f32.vlgmr.msra.gmra.mxu3 %vm377_vm0, %v1189_v54  ;;  %v1460_v40 = vpop.f32.mrf.mxu2 }
 0x1a2   : > { %1473 = vst.msk [vmem:[%s1909_s9 + $0x20] sm:$0xff] %vm377_vm0, %v1434_v18 }
 0x1a6   : > { %v553_v24 = vpop.permute.xlu0 %552 }
 0x1a7   : > { %590 = vst.msk [vmem:[#allocation3 + $0x108] sm:$0xff] %vm578_vm2, %v553_v24  ;;  %v876_v33 = vpop.permute.xlu1 %875  ;;  %v1173_v27 = vld [vmem:[#allocation3 + $0xf8] sm:$0xff] }
 0x1a8   : > { %687 = vst.msk [vmem:[#allocation3 + $0x108] sm:$0xff] %vm675_vm3, %v650_v23  ;;  %v1172_v51 = vld [vmem:[#allocation3 + $0xf0] sm:$0xff]  ;;  %1385 = vmatmul.f32.gmra.mxu1 %v1173_v27 }
 0x1a9   : > { %912 = vst.msk [vmem:[#allocation3 + $0x110] sm:$0xff] %vm578_vm2, %v876_v33  ;;  %1320 = vmatmul.f32.gmra.mxu0 %v1172_v51  ;;  %v1463_v44 = vpop.f32.mrf.mxu2 }
 0x1ab   : > { %v1333_v17 = vpop.f32.mrf.mxu3 }
 0x1ae   : > { %v973_v36 = vpop.permute.xlu0 %972  ;;  %v1306_v41 = vpop.f32.mrf.mxu0 }
 0x1af   : > { %1009 = vst.msk [vmem:[#allocation3 + $0x110] sm:$0xff] %vm675_vm3, %v973_v36  ;;  %v747_v49 = vpop.permute.xlu1 %746 }
 0x1b0   : > { %1105 = vst.msk [vmem:[#allocation3 + $0x110] sm:$0xff] %vm772_vm4, %v1069_v31 }
 0x1b1   : > { %784 = vst.msk [vmem:[#allocation3 + $0x108] sm:$0xff] %vm772_vm4, %v747_v49 }
 0x1b4   : > { %v1371_v47 = vpop.f32.mrf.mxu1 }
 0x1b5   : > { %v1372_v0 = vadd.f32 %v1371_v47, %v1306_v41 }
 0x1b7   : > { %v1437_v10 = vadd.f32 %v1436_v57, %v1372_v0  ;;  %v1176_v1 = vld [vmem:[#allocation3 + $0x110] sm:$0xff] }
 0x1b8   : > { %v1175_v7 = vld [vmem:[#allocation3 + $0x108] sm:$0xff]  ;;  %1388 = vmatmul.f32.gmra.mxu1 %v1176_v1 }
 0x1b9   : > { %1474 = vst.msk [vmem:[%s1909_s9 + $0x28] sm:$0xff] %vm377_vm0, %v1437_v10  ;;  %1323 = vmatmul.f32.gmra.mxu0 %v1175_v7 }
 0x1c2   : > { %v1336_v34 = vpop.f32.mrf.mxu3 }
 0x1c5   : > { %v1374_v55 = vpop.f32.mrf.mxu1 }
 0x1c6   : > { %v1309_v16 = vpop.f32.mrf.mxu0 }
 0x1c7   : > { %v1375_v26 = vadd.f32 %v1374_v55, %v1309_v16 }
 0x1c9   : > { %v1440_v25 = vadd.f32 %v1439_v4, %v1375_v26 }
 0x1cb   : > { %1475 = vst.msk [vmem:[%s1909_s9 + $0x30] sm:$0xff] %vm377_vm0, %v1440_v25 }
 0x1d4   : > { %v1392_v38 = vpop.f32.mrf.mxu3 }
 0x1d5   : > { %v1393_v28 = vadd.f32 %v1392_v38, %v1327_v62 }
 0x1d7   : > { %v1458_v30 = vadd.f32 %v1457_v53, %v1393_v28 }
 0x1d9   : > { %1481 = vst.msk [vmem:[%s1909_s9 + $0x60] sm:$0xff] %vm377_vm0, %v1458_v30 }
 0x1dd   : > { %v1377_v35 = vpop.f32.mrf.mxu1 }
 0x1de   : > { %v1312_v39 = vpop.f32.mrf.mxu0 }
 0x1df   : > { %v1378_v50 = vadd.f32 %v1377_v35, %v1312_v39 }
 0x1e1   : > { %v1443_v21 = vadd.f32 %v1442_v19, %v1378_v50 }
 0x1e3   : > { %1476 = vst.msk [vmem:[%s1909_s9 + $0x38] sm:$0xff] %vm377_vm0, %v1443_v21 }
 0x1ec   : > { %v1395_v13 = vpop.f32.mrf.mxu3 }
 0x1ed   : > { %v1396_v42 = vadd.f32 %v1395_v13, %v1330_v15 }
 0x1ef   : > { %v1461_v43 = vadd.f32 %v1460_v40, %v1396_v42 }
 0x1f1   : > { %1482 = vst.msk [vmem:[%s1909_s9 + $0x68] sm:$0xff] %vm377_vm0, %v1461_v43 }
 0x1f5   : > { %v1380_v8 = vpop.f32.mrf.mxu1 }
 0x1f6   : > { %v1315_v2 = vpop.f32.mrf.mxu0 }
 0x1f7   : > { %v1381_v37 = vadd.f32 %v1380_v8, %v1315_v2 }
 0x1f9   : > { %v1446_v22 = vadd.f32 %v1445_v29, %v1381_v37 }
 0x1fb   : > { %1477 = vst.msk [vmem:[%s1909_s9 + $0x40] sm:$0xff] %vm377_vm0, %v1446_v22 }
 0x205   : > { %v1398_v48 = vpop.f32.mrf.mxu3 }
 0x206   : > { %v1399_v52 = vadd.f32 %v1398_v48, %v1333_v17 }
 0x208   : > { %v1464_v56 = vadd.f32 %v1463_v44, %v1399_v52 }
 0x20a   : > { %1483 = vst.msk [vmem:[%s1909_s9 + $0x70] sm:$0xff] %vm377_vm0, %v1464_v56 }
 0x20d   : > { %v1383_v57 = vpop.f32.mrf.mxu1 }
 0x20e   : > { %v1318_v58 = vpop.f32.mrf.mxu0 }
 0x20f   : > { %v1384_v20 = vadd.f32 %v1383_v57, %v1318_v58 }
 0x211   : > { %v1449_v60 = vadd.f32 %v1448_v5, %v1384_v20 }
 0x213   : > { %1478 = vst.msk [vmem:[%s1909_s9 + $0x48] sm:$0xff] %vm377_vm0, %v1449_v60 }
 0x21c   : > { %v1401_v3 = vpop.f32.mrf.mxu3 }
 0x21d   : > { %v1402_v61 = vadd.f32 %v1401_v3, %v1336_v34 }
 0x224   : > { %v1466_v63 = vpop.f32.mrf.mxu3 }
 0x225   : > { %v1467_v45 = vadd.f32 %v1466_v63, %v1402_v61  ;;  %v1386_v4 = vpop.f32.mrf.mxu1 }
 0x226   : > { %v1321_v46 = vpop.f32.mrf.mxu0 }
 0x227   : > { %1484 = vst.msk [vmem:[%s1909_s9 + $0x78] sm:$0xff] %vm377_vm0, %v1467_v45  ;;  %v1387_v6 = vadd.f32 %v1386_v4, %v1321_v46 }
 0x229   : > { %v1452_v9 = vadd.f32 %v1451_v32, %v1387_v6 }
 0x22b   : > { %1479 = vst.msk [vmem:[%s1909_s9 + $0x50] sm:$0xff] %vm377_vm0, %v1452_v9 }
 0x235   : > { %v1389_v11 = vpop.f32.mrf.mxu1 }
 0x236   : > { %v1324_v12 = vpop.f32.mrf.mxu0 }
 0x237   : > { %v1390_v54 = vadd.f32 %v1389_v11, %v1324_v12 }
 0x239   : > { %v1455_v14 = vadd.f32 %v1454_v59, %v1390_v54 }
 0x23b   : > { %1480 = vst.msk [vmem:[%s1909_s9 + $0x58] sm:$0xff] %vm377_vm0, %v1455_v14 }
 0x23c PF: > { %s14_s19 = sadd.s32 1, %s1784_s19   ;;  %s2609_s15 = smov %s1776_s17 }
 0x23d   : > { %p11_p2 = scmp.ge.s32.totalorder %s14_s19, 6   ;;  %s2610_s16 = smov %s1780_s18 }
 0x23e   : > { %s2611_s17 = smov %s2614_s20  ;;  %s2612_s18 = smov %s2618_s21 }
 0x23f   :  { %13 = sbr.rel (!%p11_p2) target bundleno = 3 (0x3), region = 93 }

</bundles_post_ra>
